<compile_context>
chip_gen: v6e
topology: v6e:2x2x1
jax: 0.10.0
libtpu: 0.0.40
codegen_flags: <defaults>
</compile_context>

<pallas_src>
import numpy as np
import jax
import jax.numpy as jnp
from jax import lax
from jax.experimental import pallas as pl
from jax.experimental.pallas import tpu as pltpu

# ---------------- model dimensions --------------------------------------------
B = 2               # batch
C_IN = 4            # num_inputs (spatial channels)
H, W = 7, 14        # conv1 (3x3, pad 1) keeps (7,14); conv2 (2x2, pad 1) -> (8,15)
PH, PW = H + 2, W + 2       # zero-padded plane shared by conv1 output / conv2 input (9,16)
HP, WP = H + 1, W + 1       # conv2 output spatial (8, 15)
C1, C2 = 16, 32
NS_FEAT, NS_HID = 49, 24
FLAT_X = C2 * HP * WP       # 3840
CAT = FLAT_X + NS_HID       # 3864 (torch actor/critic in-dim)
N_ACT = 1078
N_OUT = N_ACT + 1           # actor columns + folded-in critic column
TN = 384                    # head output tile (lanes)
NT = 3
N_OUT_PAD = NT * TN         # 1152

K1 = 9 * C_IN               # 36 conv1 im2col taps
K1E = K1 + 1                # 37 (+ indicator column carrying conv1 bias)
PLANE = B * PH * PW         # 288 flattened padded-plane positions
PLANE_PAD = 296             # >= 289 (max tap column + 1)
QB = 128                    # per-batch conv2 output positions kept (8 rows x 16 cols)
K_FX = QB * C2              # 4096 conv features per batch in kernel layout (zero-weight pads)
K_HEAD = K_FX + NS_HID      # 4120 head contraction length
TAP_OFFS = (0, 1, 16, 17)   # conv2 2x2 taps: dh*PW + dw


# ---------------- fused Pallas kernel ------------------------------------------

def _policy_kernel(x1t_ref, w1t_ref, w2t_ref, b2t_ref, y_ref, wl_ref, bl_ref,
                   wh_ref, bh_ref, out_ref, cat_ref):
    """grid=(NT,). Step 0 computes the trunk into cat_ref (VMEM scratch, persists);
    every step computes one (B, TN) tile of the fused actor+critic head."""

    @pl.when(pl.program_id(0) == 0)
    def _trunk():
        # conv1 + bias + relu, emitted directly on the zero-padded plane.
        # Layout: channels on sublanes, flattened (b, pi, pj) positions on lanes.
        # Pad positions have all-zero im2col columns (incl. indicator) -> stay exactly 0.
        plane = jnp.maximum(
            jnp.dot(w1t_ref[...], x1t_ref[...],
                    preferred_element_type=jnp.float32), 0.0)              # (C1, PLANE_PAD)

        # conv2: the 4 taps are lane-offset slices of the plane; one dot, K=64.
        blocks = []
        for d in TAP_OFFS:
            blocks.append(jnp.concatenate(
                [plane[:, d:d + QB],
                 plane[:, PH * PW + d: PH * PW + d + QB]], axis=1))        # (C1, 2*QB)
        lhs2 = jnp.concatenate(blocks, axis=0)                             # (4*C1, 2*QB)
        h2t = jnp.maximum(
            jnp.dot(w2t_ref[...], lhs2, preferred_element_type=jnp.float32)
            + b2t_ref[...], 0.0)                                           # (C2, 2*QB)

        # Scatter conv features into the flat head-feature layout:
        #   cat[b, c*QB + q] = h2t[c, b*QB + q]    (head weight rows match this order)
        for c in range(C2):
            row = h2t[c:c + 1, :]                                          # (1, 2*QB)
            cat_ref[0:1, pl.ds(c * QB, QB)] = row[:, :QB]
            cat_ref[1:2, pl.ds(c * QB, QB)] = row[:, QB:]

        # non-spatial branch: relu(linear1)
        yh = jnp.maximum(
            jnp.dot(y_ref[...], wl_ref[...], preferred_element_type=jnp.float32)
            + bl_ref[...], 0.0)                                            # (B, NS_HID)
        cat_ref[:, pl.ds(K_FX, NS_HID)] = yh

    # fused actor+critic head tile: (B, K_HEAD) @ (K_HEAD, TN) + bias, bf16 weights,
    # f32 accumulation on the MXU.
    out_ref[...] = (jnp.dot(cat_ref[...].astype(jnp.bfloat16), wh_ref[0],
                            preferred_element_type=jnp.float32)
                    + bh_ref[0])


def policy_call(x1t, prep, y2d):
    return pl.pallas_call(
        _policy_kernel,
        out_shape=jax.ShapeDtypeStruct((B, N_OUT_PAD), jnp.float32),
        grid=(NT,),
        in_specs=[
            pl.BlockSpec((K1E, PLANE_PAD), lambda j: (0, 0)),    # conv1 im2col (transposed)
            pl.BlockSpec((C1, K1E), lambda j: (0, 0)),           # conv1 weight (+bias row)
            pl.BlockSpec((C2, 4 * C1), lambda j: (0, 0)),        # conv2 weight (taps merged)
            pl.BlockSpec((C2, 1), lambda j: (0, 0)),             # conv2 bias
            pl.BlockSpec((B, NS_FEAT), lambda j: (0, 0)),        # non-spatial input
            pl.BlockSpec((NS_FEAT, NS_HID), lambda j: (0, 0)),   # linear1 weight
            pl.BlockSpec((1, NS_HID), lambda j: (0, 0)),         # linear1 bias
            pl.BlockSpec((1, K_HEAD, TN), lambda j: (j, 0, 0)),  # pre-tiled bf16 head weight
            pl.BlockSpec((1, 1, TN), lambda j: (j, 0, 0)),       # pre-tiled f32 head bias
        ],
        out_specs=pl.BlockSpec((B, TN), lambda j: (0, j)),
        scratch_shapes=[pltpu.VMEM((B, K_HEAD), jnp.float32)],   # cat, persists across steps
        compiler_params=pltpu.CompilerParams(
            dimension_semantics=("arbitrary",)),                 # sequential: scratch carried
    )(x1t, prep["w1t"], prep["w2t"], prep["b2t"], y2d,
      prep["wl"], prep["bl"], prep["w_head"], prep["b_head"])


# ---------------- one-time weight preprocessing ---------------------------------

def prepare_params(params):
    """Torch-layout weights -> kernel layouts.  Run ONCE, outside the jitted forward."""
    # conv1: rows ordered (dh, dw, cin), bias appended as the indicator row; transposed.
    w1 = jnp.transpose(params["conv1_w"], (2, 3, 1, 0)).reshape(K1, C1)
    w1t = jnp.concatenate([w1, params["conv1_b"].reshape(1, C1)], axis=0).T    # (16, 37)
    # conv2: rows ordered (tap=dh*2+dw, cin), taps merged into one K=64 dot; transposed.
    w2t = jnp.transpose(params["conv2_w"], (2, 3, 1, 0)).reshape(4 * C1, C2).T  # (32, 64)
    b2t = params["conv2_b"].reshape(C2, 1)
    wl = params["lin1_w"].T                                                     # (49, 24)
    bl = params["lin1_b"].reshape(1, NS_HID)

    # Fused actor+critic head: critic folded in as column 1078; rows re-indexed to the
    # kernel's feature order k = c*128 + oi*16 + oj (oj==15 -> zero row), then the 24
    # linear1 features; zero-padded to 1152 columns; pre-tiled (NT, K_HEAD, TN) bf16.
    w_full = jnp.concatenate([params["actor_w"], params["critic_w"]], axis=0).T  # (3864,1079)
    k = np.arange(K_FX)
    c, q = k // QB, k % QB
    oi, oj = q // PW, q % PW
    valid = oj <= (WP - 1)
    src_fx = np.where(valid, c * (HP * WP) + oi * WP + np.minimum(oj, WP - 1), 0)
    src = np.concatenate([src_fx, FLAT_X + np.arange(NS_HID)]).astype(np.int32)
    keep = np.concatenate([valid, np.ones(NS_HID, dtype=bool)])
    w_k = jnp.where(jnp.asarray(keep)[:, None], w_full[jnp.asarray(src)], 0.0)   # (4120,1079)
    w_head = jnp.pad(w_k, ((0, 0), (0, N_OUT_PAD - N_OUT))).astype(jnp.bfloat16)
    w_head = w_head.reshape(K_HEAD, NT, TN).transpose(1, 0, 2)                   # (3,4120,384)

    b_full = jnp.concatenate([params["actor_b"], params["critic_b"]])
    b_head = jnp.pad(b_full, (0, N_OUT_PAD - N_OUT)).reshape(NT, 1, TN)

    return dict(w1t=w1t, w2t=w2t, b2t=b2t, wl=wl, bl=bl,
                w_head=w_head, b_head=b_head)


# ---------------- forward --------------------------------------------------------

def cnn_policy_forward(prep, spatial_nchw, non_spatial):
    """Pallas implementation of CNNPolicy.forward -> (value, policy)."""
    # conv1 im2col over the zero-padded plane, incl. the indicator column; one small
    # XLA fusion (~45 KB).  Everything downstream is a single pallas_call.
    x_nhwc = jnp.transpose(spatial_nchw, (0, 2, 3, 1))
    xp = jnp.pad(x_nhwc, ((0, 0), (1, 1), (1, 1), (0, 0)))
    cols = jnp.concatenate(
        [xp[:, dh:dh + H, dw:dw + W, :] for dh in range(3) for dw in range(3)]
        + [jnp.ones((B, H, W, 1), jnp.float32)], axis=-1)                 # (B, H, W, 37)
    x1 = jnp.pad(cols, ((0, 0), (1, 1), (1, 1), (0, 0))).reshape(PLANE, K1E)
    x1t = jnp.pad(x1, ((0, PLANE_PAD - PLANE), (0, 0))).T                 # (37, 296)
    y2d = non_spatial.reshape(B, NS_FEAT)

    out = policy_call(x1t, prep, y2d)                                     # (B, 1152) f32
    value = out[:, N_ACT:N_ACT + 1]
    policy = out[:, :N_ACT]
    return value, policy


# ---------------- synthetic params & pure-JAX reference --------------------------

def init_params(key):
    """Deterministic synthetic weights in torch layout conventions
    (Conv2d: (O,I,kh,kw), Linear: (out,in)), with reset_parameters' relu gain."""
    ks = jax.random.split(key, 10)
    relu_gain = float(np.sqrt(2.0))

    def u(k, shape, fan_in):
        bound = 1.0 / float(np.sqrt(fan_in))
        return jax.random.uniform(k, shape, jnp.float32, -bound, bound)

    p = {}
    p["conv1_w"] = u(ks[0], (C1, C_IN, 3, 3), C_IN * 9) * relu_gain
    p["conv1_b"] = u(ks[1], (C1,), C_IN * 9)
    p["conv2_w"] = u(ks[2], (C2, C1, 2, 2), C1 * 4) * relu_gain
    p["conv2_b"] = u(ks[3], (C2,), C1 * 4)
    p["lin1_w"] = u(ks[4], (NS_HID, NS_FEAT), NS_FEAT) * relu_gain
    p["lin1_b"] = u(ks[5], (NS_HID,), NS_FEAT)
    p["critic_w"] = u(ks[6], (1, CAT), CAT)
    p["critic_b"] = u(ks[7], (1,), CAT)
    p["actor_w"] = u(ks[8], (N_ACT, CAT), CAT)
    p["actor_b"] = u(ks[9], (N_ACT,), CAT)
    return p


def reference_forward(params, spatial_nchw, non_spatial):
    """Pure-JAX reference with exact torch semantics (NCHW convs), f32 throughout."""
    x = lax.conv_general_dilated(spatial_nchw, params["conv1_w"], (1, 1),
                                 ((1, 1), (1, 1)),
                                 dimension_numbers=("NCHW", "OIHW", "NCHW"))
    x = jax.nn.relu(x + params["conv1_b"][None, :, None, None])
    x = lax.conv_general_dilated(x, params["conv2_w"], (1, 1),
                                 ((1, 1), (1, 1)),
                                 dimension_numbers=("NCHW", "OIHW", "NCHW"))
    x = jax.nn.relu(x + params["conv2_b"][None, :, None, None])
    y = jax.nn.relu(non_spatial @ params["lin1_w"].T + params["lin1_b"])
    cat = jnp.concatenate([x.reshape(B, -1), y.reshape(B, -1)], axis=1)
    value = cat @ params["critic_w"].T + params["critic_b"]
    policy = cat @ params["actor_w"].T + params["actor_b"]
    return value, policy


# TODO(synk): act()/evaluate_actions() multinomial sampling & action masking are
# host-side policy utilities, not part of the forward pass; not implemented here.

if __name__ == "__main__":
    key = jax.random.PRNGKey(0)
    kp, ks, kn = jax.random.split(key, 3)
    params = init_params(kp)
    prep = prepare_params(params)              # one-time weight prep, outside forward
    spatial = jax.random.normal(ks, (B, C_IN, H, W), jnp.float32)
    non_spatial = jax.random.normal(kn, (B, 1, NS_FEAT), jnp.float32)

    fwd = jax.jit(cnn_policy_forward)
    value, policy = fwd(prep, spatial, non_spatial)
    jax.block_until_ready((value, policy))

    assert value.shape == (B, 1) and policy.shape == (B, N_ACT)
    v_ref, p_ref = reference_forward(params, spatial, non_spatial)
    # bf16 head weight/activation stream -> slightly looser tolerance vs f32 reference
    np.testing.assert_allclose(np.asarray(value), np.asarray(v_ref), rtol=2e-2, atol=2e-2)
    np.testing.assert_allclose(np.asarray(policy), np.asarray(p_ref), rtol=2e-2, atol=2e-2)
    print("KERNEL_OK")
</pallas_src>

<mosaic_0001>
module attributes {stable_mosaic.version = 11 : i64} {
  func.func @_policy_kernel(%arg0: i32, %arg1: memref<37x296xf32, #tpu.memory_space<vmem>>, %arg2: memref<16x37xf32, #tpu.memory_space<vmem>>, %arg3: memref<32x64xf32, #tpu.memory_space<vmem>>, %arg4: memref<32x1xf32, #tpu.memory_space<vmem>>, %arg5: memref<2x49xf32, #tpu.memory_space<vmem>>, %arg6: memref<49x24xf32, #tpu.memory_space<vmem>>, %arg7: memref<1x24xf32, #tpu.memory_space<vmem>>, %arg8: memref<1x4120x384xbf16, #tpu.memory_space<vmem>>, %arg9: memref<1x1x384xf32, #tpu.memory_space<vmem>>, %arg10: memref<2x384xf32, #tpu.memory_space<vmem>>, %arg11: memref<2x4120xf32, #tpu.memory_space<vmem>>) attributes {dimension_semantics = [#tpu.dimension_semantics<arbitrary>], iteration_bounds = array<i64: 3>, scalar_prefetch = 0 : i64, scratch_operands = 1 : i64, tpu.core_type = #tpu.core_type<tc>, window_params = [{pipeline_mode = #tpu.pipeline_mode<synchronous>, transform_indices = @transform_0, window_bounds = array<i64: 37, 296>}, {pipeline_mode = #tpu.pipeline_mode<synchronous>, transform_indices = @transform_1, window_bounds = array<i64: 16, 37>}, {pipeline_mode = #tpu.pipeline_mode<synchronous>, transform_indices = @transform_2, window_bounds = array<i64: 32, 64>}, {pipeline_mode = #tpu.pipeline_mode<synchronous>, transform_indices = @transform_3, window_bounds = array<i64: 32, 1>}, {pipeline_mode = #tpu.pipeline_mode<synchronous>, transform_indices = @transform_4, window_bounds = array<i64: 2, 49>}, {pipeline_mode = #tpu.pipeline_mode<synchronous>, transform_indices = @transform_5, window_bounds = array<i64: 49, 24>}, {pipeline_mode = #tpu.pipeline_mode<synchronous>, transform_indices = @transform_6, window_bounds = array<i64: 1, 24>}, {transform_indices = @transform_7, window_bounds = array<i64: 1, 4120, 384>}, {transform_indices = @transform_8, window_bounds = array<i64: 1, 1, 384>}, {transform_indices = @transform_9, window_bounds = array<i64: 2, 384>}]} {
    %c0_i32 = arith.constant 0 : i32
    %0 = arith.cmpi eq, %arg0, %c0_i32 : i32
    %1 = arith.extui %0 : i1 to i32
    %c0_i32_0 = arith.constant 0 : i32
    %2 = arith.cmpi ne, %1, %c0_i32_0 : i32
    scf.if %2 {
      %c0_10 = arith.constant 0 : index
      %c0_11 = arith.constant 0 : index
      %13 = vector.load %arg2[%c0_10, %c0_11] : memref<16x37xf32, #tpu.memory_space<vmem>>, vector<16x37xf32>
      %c0_12 = arith.constant 0 : index
      %c0_13 = arith.constant 0 : index
      %14 = vector.load %arg1[%c0_12, %c0_13] : memref<37x296xf32, #tpu.memory_space<vmem>>, vector<37x296xf32>
      %cst_14 = arith.constant dense<0.000000e+00> : vector<16x296xf32>
      %15 = tpu.matmul %13, %14, %cst_14 {dimension_numbers = #tpu.dot_dimension_numbers<[1], [0], [0], [1], [0, 0, 1, 1], [], []>} : vector<16x37xf32>, vector<37x296xf32>, vector<16x296xf32> -> vector<16x296xf32>
      %cst_15 = arith.constant 0.000000e+00 : f32
      %16 = vector.broadcast %cst_15 : f32 to vector<16x296xf32>
      %17 = arith.maximumf %15, %16 : vector<16x296xf32>
      %18 = vector.extract_strided_slice %17 {offsets = [0, 0], sizes = [16, 128], strides = [1, 1]} : vector<16x296xf32> to vector<16x128xf32>
      %19 = vector.extract_strided_slice %17 {offsets = [0, 144], sizes = [16, 128], strides = [1, 1]} : vector<16x296xf32> to vector<16x128xf32>
      %20 = tpu.concatenate %18, %19 in 1 : vector<16x128xf32>, vector<16x128xf32> -> vector<16x256xf32>
      %21 = vector.extract_strided_slice %17 {offsets = [0, 1], sizes = [16, 128], strides = [1, 1]} : vector<16x296xf32> to vector<16x128xf32>
      %22 = vector.extract_strided_slice %17 {offsets = [0, 145], sizes = [16, 128], strides = [1, 1]} : vector<16x296xf32> to vector<16x128xf32>
      %23 = tpu.concatenate %21, %22 in 1 : vector<16x128xf32>, vector<16x128xf32> -> vector<16x256xf32>
      %24 = vector.extract_strided_slice %17 {offsets = [0, 16], sizes = [16, 128], strides = [1, 1]} : vector<16x296xf32> to vector<16x128xf32>
      %25 = vector.extract_strided_slice %17 {offsets = [0, 160], sizes = [16, 128], strides = [1, 1]} : vector<16x296xf32> to vector<16x128xf32>
      %26 = tpu.concatenate %24, %25 in 1 : vector<16x128xf32>, vector<16x128xf32> -> vector<16x256xf32>
      %27 = vector.extract_strided_slice %17 {offsets = [0, 17], sizes = [16, 128], strides = [1, 1]} : vector<16x296xf32> to vector<16x128xf32>
      %28 = vector.extract_strided_slice %17 {offsets = [0, 161], sizes = [16, 128], strides = [1, 1]} : vector<16x296xf32> to vector<16x128xf32>
      %29 = tpu.concatenate %27, %28 in 1 : vector<16x128xf32>, vector<16x128xf32> -> vector<16x256xf32>
      %30 = tpu.concatenate %20, %23, %26, %29 in 0 : vector<16x256xf32>, vector<16x256xf32>, vector<16x256xf32>, vector<16x256xf32> -> vector<64x256xf32>
      %c0_16 = arith.constant 0 : index
      %c0_17 = arith.constant 0 : index
      %31 = vector.load %arg3[%c0_16, %c0_17] : memref<32x64xf32, #tpu.memory_space<vmem>>, vector<32x64xf32>
      %cst_18 = arith.constant dense<0.000000e+00> : vector<32x256xf32>
      %32 = tpu.matmul %31, %30, %cst_18 {dimension_numbers = #tpu.dot_dimension_numbers<[1], [0], [0], [1], [0, 0, 1, 1], [], []>} : vector<32x64xf32>, vector<64x256xf32>, vector<32x256xf32> -> vector<32x256xf32>
      %c0_19 = arith.constant 0 : index
      %c0_20 = arith.constant 0 : index
      %33 = vector.load %arg4[%c0_19, %c0_20] : memref<32x1xf32, #tpu.memory_space<vmem>>, vector<32x1xf32>
      %34 = vector.broadcast %33 : vector<32x1xf32> to vector<32x256xf32>
      %35 = arith.addf %32, %34 : vector<32x256xf32>
      %cst_21 = arith.constant 0.000000e+00 : f32
      %36 = vector.broadcast %cst_21 : f32 to vector<32x256xf32>
      %37 = arith.maximumf %35, %36 : vector<32x256xf32>
      %38 = vector.extract_strided_slice %37 {offsets = [0, 0], sizes = [1, 256], strides = [1, 1]} : vector<32x256xf32> to vector<1x256xf32>
      %39 = vector.extract_strided_slice %38 {offsets = [0, 0], sizes = [1, 128], strides = [1, 1]} : vector<1x256xf32> to vector<1x128xf32>
      %c0_22 = arith.constant 0 : index
      %c0_23 = arith.constant 0 : index
      %40 = vector.load %arg11[%c0_22, %c0_23] : memref<2x4120xf32, #tpu.memory_space<vmem>>, vector<1x128xf32>
      tpu.vector_store %arg11[%c0_22, %c0_23], %39 {strides = array<i32>} : memref<2x4120xf32, #tpu.memory_space<vmem>>, vector<1x128xf32>,
      %41 = vector.extract_strided_slice %38 {offsets = [0, 128], sizes = [1, 128], strides = [1, 1]} : vector<1x256xf32> to vector<1x128xf32>
      %c1 = arith.constant 1 : index
      %c0_24 = arith.constant 0 : index
      %42 = vector.load %arg11[%c1, %c0_24] : memref<2x4120xf32, #tpu.memory_space<vmem>>, vector<1x128xf32>
      tpu.vector_store %arg11[%c1, %c0_24], %41 {strides = array<i32>} : memref<2x4120xf32, #tpu.memory_space<vmem>>, vector<1x128xf32>,
      %43 = vector.extract_strided_slice %37 {offsets = [1, 0], sizes = [1, 256], strides = [1, 1]} : vector<32x256xf32> to vector<1x256xf32>
      %44 = vector.extract_strided_slice %43 {offsets = [0, 0], sizes = [1, 128], strides = [1, 1]} : vector<1x256xf32> to vector<1x128xf32>
      %c0_25 = arith.constant 0 : index
      %c128 = arith.constant 128 : index
      %45 = vector.load %arg11[%c0_25, %c128] : memref<2x4120xf32, #tpu.memory_space<vmem>>, vector<1x128xf32>
      tpu.vector_store %arg11[%c0_25, %c128], %44 {strides = array<i32>} : memref<2x4120xf32, #tpu.memory_space<vmem>>, vector<1x128xf32>,
      %46 = vector.extract_strided_slice %43 {offsets = [0, 128], sizes = [1, 128], strides = [1, 1]} : vector<1x256xf32> to vector<1x128xf32>
      %c1_26 = arith.constant 1 : index
      %c128_27 = arith.constant 128 : index
      %47 = vector.load %arg11[%c1_26, %c128_27] : memref<2x4120xf32, #tpu.memory_space<vmem>>, vector<1x128xf32>
      tpu.vector_store %arg11[%c1_26, %c128_27], %46 {strides = array<i32>} : memref<2x4120xf32, #tpu.memory_space<vmem>>, vector<1x128xf32>,
      %48 = vector.extract_strided_slice %37 {offsets = [2, 0], sizes = [1, 256], strides = [1, 1]} : vector<32x256xf32> to vector<1x256xf32>
      %49 = vector.extract_strided_slice %48 {offsets = [0, 0], sizes = [1, 128], strides = [1, 1]} : vector<1x256xf32> to vector<1x128xf32>
      %c0_28 = arith.constant 0 : index
      %c256 = arith.constant 256 : index
      %50 = vector.load %arg11[%c0_28, %c256] : memref<2x4120xf32, #tpu.memory_space<vmem>>, vector<1x128xf32>
      tpu.vector_store %arg11[%c0_28, %c256], %49 {strides = array<i32>} : memref<2x4120xf32, #tpu.memory_space<vmem>>, vector<1x128xf32>,
      %51 = vector.extract_strided_slice %48 {offsets = [0, 128], sizes = [1, 128], strides = [1, 1]} : vector<1x256xf32> to vector<1x128xf32>
      %c1_29 = arith.constant 1 : index
      %c256_30 = arith.constant 256 : index
      %52 = vector.load %arg11[%c1_29, %c256_30] : memref<2x4120xf32, #tpu.memory_space<vmem>>, vector<1x128xf32>
      tpu.vector_store %arg11[%c1_29, %c256_30], %51 {strides = array<i32>} : memref<2x4120xf32, #tpu.memory_space<vmem>>, vector<1x128xf32>,
      %53 = vector.extract_strided_slice %37 {offsets = [3, 0], sizes = [1, 256], strides = [1, 1]} : vector<32x256xf32> to vector<1x256xf32>
      %54 = vector.extract_strided_slice %53 {offsets = [0, 0], sizes = [1, 128], strides = [1, 1]} : vector<1x256xf32> to vector<1x128xf32>
      %c0_31 = arith.constant 0 : index
      %c384 = arith.constant 384 : index
      %55 = vector.load %arg11[%c0_31, %c384] : memref<2x4120xf32, #tpu.memory_space<vmem>>, vector<1x128xf32>
      tpu.vector_store %arg11[%c0_31, %c384], %54 {strides = array<i32>} : memref<2x4120xf32, #tpu.memory_space<vmem>>, vector<1x128xf32>,
      %56 = vector.extract_strided_slice %53 {offsets = [0, 128], sizes = [1, 128], strides = [1, 1]} : vector<1x256xf32> to vector<1x128xf32>
      %c1_32 = arith.constant 1 : index
      %c384_33 = arith.constant 384 : index
      %57 = vector.load %arg11[%c1_32, %c384_33] : memref<2x4120xf32, #tpu.memory_space<vmem>>, vector<1x128xf32>
      tpu.vector_store %arg11[%c1_32, %c384_33], %56 {strides = array<i32>} : memref<2x4120xf32, #tpu.memory_space<vmem>>, vector<1x128xf32>,
      %58 = vector.extract_strided_slice %37 {offsets = [4, 0], sizes = [1, 256], strides = [1, 1]} : vector<32x256xf32> to vector<1x256xf32>
      %59 = vector.extract_strided_slice %58 {offsets = [0, 0], sizes = [1, 128], strides = [1, 1]} : vector<1x256xf32> to vector<1x128xf32>
      %c0_34 = arith.constant 0 : index
      %c512 = arith.constant 512 : index
      %60 = vector.load %arg11[%c0_34, %c512] : memref<2x4120xf32, #tpu.memory_space<vmem>>, vector<1x128xf32>
      tpu.vector_store %arg11[%c0_34, %c512], %59 {strides = array<i32>} : memref<2x4120xf32, #tpu.memory_space<vmem>>, vector<1x128xf32>,
      %61 = vector.extract_strided_slice %58 {offsets = [0, 128], sizes = [1, 128], strides = [1, 1]} : vector<1x256xf32> to vector<1x128xf32>
      %c1_35 = arith.constant 1 : index
      %c512_36 = arith.constant 512 : index
      %62 = vector.load %arg11[%c1_35, %c512_36] : memref<2x4120xf32, #tpu.memory_space<vmem>>, vector<1x128xf32>
      tpu.vector_store %arg11[%c1_35, %c512_36], %61 {strides = array<i32>} : memref<2x4120xf32, #tpu.memory_space<vmem>>, vector<1x128xf32>,
      %63 = vector.extract_strided_slice %37 {offsets = [5, 0], sizes = [1, 256], strides = [1, 1]} : vector<32x256xf32> to vector<1x256xf32>
      %64 = vector.extract_strided_slice %63 {offsets = [0, 0], sizes = [1, 128], strides = [1, 1]} : vector<1x256xf32> to vector<1x128xf32>
      %c0_37 = arith.constant 0 : index
      %c640 = arith.constant 640 : index
      %65 = vector.load %arg11[%c0_37, %c640] : memref<2x4120xf32, #tpu.memory_space<vmem>>, vector<1x128xf32>
      tpu.vector_store %arg11[%c0_37, %c640], %64 {strides = array<i32>} : memref<2x4120xf32, #tpu.memory_space<vmem>>, vector<1x128xf32>,
      %66 = vector.extract_strided_slice %63 {offsets = [0, 128], sizes = [1, 128], strides = [1, 1]} : vector<1x256xf32> to vector<1x128xf32>
      %c1_38 = arith.constant 1 : index
      %c640_39 = arith.constant 640 : index
      %67 = vector.load %arg11[%c1_38, %c640_39] : memref<2x4120xf32, #tpu.memory_space<vmem>>, vector<1x128xf32>
      tpu.vector_store %arg11[%c1_38, %c640_39], %66 {strides = array<i32>} : memref<2x4120xf32, #tpu.memory_space<vmem>>, vector<1x128xf32>,
      %68 = vector.extract_strided_slice %37 {offsets = [6, 0], sizes = [1, 256], strides = [1, 1]} : vector<32x256xf32> to vector<1x256xf32>
      %69 = vector.extract_strided_slice %68 {offsets = [0, 0], sizes = [1, 128], strides = [1, 1]} : vector<1x256xf32> to vector<1x128xf32>
      %c0_40 = arith.constant 0 : index
      %c768 = arith.constant 768 : index
      %70 = vector.load %arg11[%c0_40, %c768] : memref<2x4120xf32, #tpu.memory_space<vmem>>, vector<1x128xf32>
      tpu.vector_store %arg11[%c0_40, %c768], %69 {strides = array<i32>} : memref<2x4120xf32, #tpu.memory_space<vmem>>, vector<1x128xf32>,
      %71 = vector.extract_strided_slice %68 {offsets = [0, 128], sizes = [1, 128], strides = [1, 1]} : vector<1x256xf32> to vector<1x128xf32>
      %c1_41 = arith.constant 1 : index
      %c768_42 = arith.constant 768 : index
      %72 = vector.load %arg11[%c1_41, %c768_42] : memref<2x4120xf32, #tpu.memory_space<vmem>>, vector<1x128xf32>
      tpu.vector_store %arg11[%c1_41, %c768_42], %71 {strides = array<i32>} : memref<2x4120xf32, #tpu.memory_space<vmem>>, vector<1x128xf32>,
      %73 = vector.extract_strided_slice %37 {offsets = [7, 0], sizes = [1, 256], strides = [1, 1]} : vector<32x256xf32> to vector<1x256xf32>
      %74 = vector.extract_strided_slice %73 {offsets = [0, 0], sizes = [1, 128], strides = [1, 1]} : vector<1x256xf32> to vector<1x128xf32>
      %c0_43 = arith.constant 0 : index
      %c896 = arith.constant 896 : index
      %75 = vector.load %arg11[%c0_43, %c896] : memref<2x4120xf32, #tpu.memory_space<vmem>>, vector<1x128xf32>
      tpu.vector_store %arg11[%c0_43, %c896], %74 {strides = array<i32>} : memref<2x4120xf32, #tpu.memory_space<vmem>>, vector<1x128xf32>,
      %76 = vector.extract_strided_slice %73 {offsets = [0, 128], sizes = [1, 128], strides = [1, 1]} : vector<1x256xf32> to vector<1x128xf32>
      %c1_44 = arith.constant 1 : index
      %c896_45 = arith.constant 896 : index
      %77 = vector.load %arg11[%c1_44, %c896_45] : memref<2x4120xf32, #tpu.memory_space<vmem>>, vector<1x128xf32>
      tpu.vector_store %arg11[%c1_44, %c896_45], %76 {strides = array<i32>} : memref<2x4120xf32, #tpu.memory_space<vmem>>, vector<1x128xf32>,
      %78 = vector.extract_strided_slice %37 {offsets = [8, 0], sizes = [1, 256], strides = [1, 1]} : vector<32x256xf32> to vector<1x256xf32>
      %79 = vector.extract_strided_slice %78 {offsets = [0, 0], sizes = [1, 128], strides = [1, 1]} : vector<1x256xf32> to vector<1x128xf32>
      %c0_46 = arith.constant 0 : index
      %c1024 = arith.constant 1024 : index
      %80 = vector.load %arg11[%c0_46, %c1024] : memref<2x4120xf32, #tpu.memory_space<vmem>>, vector<1x128xf32>
      tpu.vector_store %arg11[%c0_46, %c1024], %79 {strides = array<i32>} : memref<2x4120xf32, #tpu.memory_space<vmem>>, vector<1x128xf32>,
      %81 = vector.extract_strided_slice %78 {offsets = [0, 128], sizes = [1, 128], strides = [1, 1]} : vector<1x256xf32> to vector<1x128xf32>
      %c1_47 = arith.constant 1 : index
      %c1024_48 = arith.constant 1024 : index
      %82 = vector.load %arg11[%c1_47, %c1024_48] : memref<2x4120xf32, #tpu.memory_space<vmem>>, vector<1x128xf32>
      tpu.vector_store %arg11[%c1_47, %c1024_48], %81 {strides = array<i32>} : memref<2x4120xf32, #tpu.memory_space<vmem>>, vector<1x128xf32>,
      %83 = vector.extract_strided_slice %37 {offsets = [9, 0], sizes = [1, 256], strides = [1, 1]} : vector<32x256xf32> to vector<1x256xf32>
      %84 = vector.extract_strided_slice %83 {offsets = [0, 0], sizes = [1, 128], strides = [1, 1]} : vector<1x256xf32> to vector<1x128xf32>
      %c0_49 = arith.constant 0 : index
      %c1152 = arith.constant 1152 : index
      %85 = vector.load %arg11[%c0_49, %c1152] : memref<2x4120xf32, #tpu.memory_space<vmem>>, vector<1x128xf32>
      tpu.vector_store %arg11[%c0_49, %c1152], %84 {strides = array<i32>} : memref<2x4120xf32, #tpu.memory_space<vmem>>, vector<1x128xf32>,
      %86 = vector.extract_strided_slice %83 {offsets = [0, 128], sizes = [1, 128], strides = [1, 1]} : vector<1x256xf32> to vector<1x128xf32>
      %c1_50 = arith.constant 1 : index
      %c1152_51 = arith.constant 1152 : index
      %87 = vector.load %arg11[%c1_50, %c1152_51] : memref<2x4120xf32, #tpu.memory_space<vmem>>, vector<1x128xf32>
      tpu.vector_store %arg11[%c1_50, %c1152_51], %86 {strides = array<i32>} : memref<2x4120xf32, #tpu.memory_space<vmem>>, vector<1x128xf32>,
      %88 = vector.extract_strided_slice %37 {offsets = [10, 0], sizes = [1, 256], strides = [1, 1]} : vector<32x256xf32> to vector<1x256xf32>
      %89 = vector.extract_strided_slice %88 {offsets = [0, 0], sizes = [1, 128], strides = [1, 1]} : vector<1x256xf32> to vector<1x128xf32>
      %c0_52 = arith.constant 0 : index
      %c1280 = arith.constant 1280 : index
      %90 = vector.load %arg11[%c0_52, %c1280] : memref<2x4120xf32, #tpu.memory_space<vmem>>, vector<1x128xf32>
      tpu.vector_store %arg11[%c0_52, %c1280], %89 {strides = array<i32>} : memref<2x4120xf32, #tpu.memory_space<vmem>>, vector<1x128xf32>,
      %91 = vector.extract_strided_slice %88 {offsets = [0, 128], sizes = [1, 128], strides = [1, 1]} : vector<1x256xf32> to vector<1x128xf32>
      %c1_53 = arith.constant 1 : index
      %c1280_54 = arith.constant 1280 : index
      %92 = vector.load %arg11[%c1_53, %c1280_54] : memref<2x4120xf32, #tpu.memory_space<vmem>>, vector<1x128xf32>
      tpu.vector_store %arg11[%c1_53, %c1280_54], %91 {strides = array<i32>} : memref<2x4120xf32, #tpu.memory_space<vmem>>, vector<1x128xf32>,
      %93 = vector.extract_strided_slice %37 {offsets = [11, 0], sizes = [1, 256], strides = [1, 1]} : vector<32x256xf32> to vector<1x256xf32>
      %94 = vector.extract_strided_slice %93 {offsets = [0, 0], sizes = [1, 128], strides = [1, 1]} : vector<1x256xf32> to vector<1x128xf32>
      %c0_55 = arith.constant 0 : index
      %c1408 = arith.constant 1408 : index
      %95 = vector.load %arg11[%c0_55, %c1408] : memref<2x4120xf32, #tpu.memory_space<vmem>>, vector<1x128xf32>
      tpu.vector_store %arg11[%c0_55, %c1408], %94 {strides = array<i32>} : memref<2x4120xf32, #tpu.memory_space<vmem>>, vector<1x128xf32>,
      %96 = vector.extract_strided_slice %93 {offsets = [0, 128], sizes = [1, 128], strides = [1, 1]} : vector<1x256xf32> to vector<1x128xf32>
      %c1_56 = arith.constant 1 : index
      %c1408_57 = arith.constant 1408 : index
      %97 = vector.load %arg11[%c1_56, %c1408_57] : memref<2x4120xf32, #tpu.memory_space<vmem>>, vector<1x128xf32>
      tpu.vector_store %arg11[%c1_56, %c1408_57], %96 {strides = array<i32>} : memref<2x4120xf32, #tpu.memory_space<vmem>>, vector<1x128xf32>,
      %98 = vector.extract_strided_slice %37 {offsets = [12, 0], sizes = [1, 256], strides = [1, 1]} : vector<32x256xf32> to vector<1x256xf32>
      %99 = vector.extract_strided_slice %98 {offsets = [0, 0], sizes = [1, 128], strides = [1, 1]} : vector<1x256xf32> to vector<1x128xf32>
      %c0_58 = arith.constant 0 : index
      %c1536 = arith.constant 1536 : index
      %100 = vector.load %arg11[%c0_58, %c1536] : memref<2x4120xf32, #tpu.memory_space<vmem>>, vector<1x128xf32>
      tpu.vector_store %arg11[%c0_58, %c1536], %99 {strides = array<i32>} : memref<2x4120xf32, #tpu.memory_space<vmem>>, vector<1x128xf32>,
      %101 = vector.extract_strided_slice %98 {offsets = [0, 128], sizes = [1, 128], strides = [1, 1]} : vector<1x256xf32> to vector<1x128xf32>
      %c1_59 = arith.constant 1 : index
      %c1536_60 = arith.constant 1536 : index
      %102 = vector.load %arg11[%c1_59, %c1536_60] : memref<2x4120xf32, #tpu.memory_space<vmem>>, vector<1x128xf32>
      tpu.vector_store %arg11[%c1_59, %c1536_60], %101 {strides = array<i32>} : memref<2x4120xf32, #tpu.memory_space<vmem>>, vector<1x128xf32>,
      %103 = vector.extract_strided_slice %37 {offsets = [13, 0], sizes = [1, 256], strides = [1, 1]} : vector<32x256xf32> to vector<1x256xf32>
      %104 = vector.extract_strided_slice %103 {offsets = [0, 0], sizes = [1, 128], strides = [1, 1]} : vector<1x256xf32> to vector<1x128xf32>
      %c0_61 = arith.constant 0 : index
      %c1664 = arith.constant 1664 : index
      %105 = vector.load %arg11[%c0_61, %c1664] : memref<2x4120xf32, #tpu.memory_space<vmem>>, vector<1x128xf32>
      tpu.vector_store %arg11[%c0_61, %c1664], %104 {strides = array<i32>} : memref<2x4120xf32, #tpu.memory_space<vmem>>, vector<1x128xf32>,
      %106 = vector.extract_strided_slice %103 {offsets = [0, 128], sizes = [1, 128], strides = [1, 1]} : vector<1x256xf32> to vector<1x128xf32>
      %c1_62 = arith.constant 1 : index
      %c1664_63 = arith.constant 1664 : index
      %107 = vector.load %arg11[%c1_62, %c1664_63] : memref<2x4120xf32, #tpu.memory_space<vmem>>, vector<1x128xf32>
      tpu.vector_store %arg11[%c1_62, %c1664_63], %106 {strides = array<i32>} : memref<2x4120xf32, #tpu.memory_space<vmem>>, vector<1x128xf32>,
      %108 = vector.extract_strided_slice %37 {offsets = [14, 0], sizes = [1, 256], strides = [1, 1]} : vector<32x256xf32> to vector<1x256xf32>
      %109 = vector.extract_strided_slice %108 {offsets = [0, 0], sizes = [1, 128], strides = [1, 1]} : vector<1x256xf32> to vector<1x128xf32>
      %c0_64 = arith.constant 0 : index
      %c1792 = arith.constant 1792 : index
      %110 = vector.load %arg11[%c0_64, %c1792] : memref<2x4120xf32, #tpu.memory_space<vmem>>, vector<1x128xf32>
      tpu.vector_store %arg11[%c0_64, %c1792], %109 {strides = array<i32>} : memref<2x4120xf32, #tpu.memory_space<vmem>>, vector<1x128xf32>,
      %111 = vector.extract_strided_slice %108 {offsets = [0, 128], sizes = [1, 128], strides = [1, 1]} : vector<1x256xf32> to vector<1x128xf32>
      %c1_65 = arith.constant 1 : index
      %c1792_66 = arith.constant 1792 : index
      %112 = vector.load %arg11[%c1_65, %c1792_66] : memref<2x4120xf32, #tpu.memory_space<vmem>>, vector<1x128xf32>
      tpu.vector_store %arg11[%c1_65, %c1792_66], %111 {strides = array<i32>} : memref<2x4120xf32, #tpu.memory_space<vmem>>, vector<1x128xf32>,
      %113 = vector.extract_strided_slice %37 {offsets = [15, 0], sizes = [1, 256], strides = [1, 1]} : vector<32x256xf32> to vector<1x256xf32>
      %114 = vector.extract_strided_slice %113 {offsets = [0, 0], sizes = [1, 128], strides = [1, 1]} : vector<1x256xf32> to vector<1x128xf32>
      %c0_67 = arith.constant 0 : index
      %c1920 = arith.constant 1920 : index
      %115 = vector.load %arg11[%c0_67, %c1920] : memref<2x4120xf32, #tpu.memory_space<vmem>>, vector<1x128xf32>
      tpu.vector_store %arg11[%c0_67, %c1920], %114 {strides = array<i32>} : memref<2x4120xf32, #tpu.memory_space<vmem>>, vector<1x128xf32>,
      %116 = vector.extract_strided_slice %113 {offsets = [0, 128], sizes = [1, 128], strides = [1, 1]} : vector<1x256xf32> to vector<1x128xf32>
      %c1_68 = arith.constant 1 : index
      %c1920_69 = arith.constant 1920 : index
      %117 = vector.load %arg11[%c1_68, %c1920_69] : memref<2x4120xf32, #tpu.memory_space<vmem>>, vector<1x128xf32>
      tpu.vector_store %arg11[%c1_68, %c1920_69], %116 {strides = array<i32>} : memref<2x4120xf32, #tpu.memory_space<vmem>>, vector<1x128xf32>,
      %118 = vector.extract_strided_slice %37 {offsets = [16, 0], sizes = [1, 256], strides = [1, 1]} : vector<32x256xf32> to vector<1x256xf32>
      %119 = vector.extract_strided_slice %118 {offsets = [0, 0], sizes = [1, 128], strides = [1, 1]} : vector<1x256xf32> to vector<1x128xf32>
      %c0_70 = arith.constant 0 : index
      %c2048 = arith.constant 2048 : index
      %120 = vector.load %arg11[%c0_70, %c2048] : memref<2x4120xf32, #tpu.memory_space<vmem>>, vector<1x128xf32>
      tpu.vector_store %arg11[%c0_70, %c2048], %119 {strides = array<i32>} : memref<2x4120xf32, #tpu.memory_space<vmem>>, vector<1x128xf32>,
      %121 = vector.extract_strided_slice %118 {offsets = [0, 128], sizes = [1, 128], strides = [1, 1]} : vector<1x256xf32> to vector<1x128xf32>
      %c1_71 = arith.constant 1 : index
      %c2048_72 = arith.constant 2048 : index
      %122 = vector.load %arg11[%c1_71, %c2048_72] : memref<2x4120xf32, #tpu.memory_space<vmem>>, vector<1x128xf32>
      tpu.vector_store %arg11[%c1_71, %c2048_72], %121 {strides = array<i32>} : memref<2x4120xf32, #tpu.memory_space<vmem>>, vector<1x128xf32>,
      %123 = vector.extract_strided_slice %37 {offsets = [17, 0], sizes = [1, 256], strides = [1, 1]} : vector<32x256xf32> to vector<1x256xf32>
      %124 = vector.extract_strided_slice %123 {offsets = [0, 0], sizes = [1, 128], strides = [1, 1]} : vector<1x256xf32> to vector<1x128xf32>
      %c0_73 = arith.constant 0 : index
      %c2176 = arith.constant 2176 : index
      %125 = vector.load %arg11[%c0_73, %c2176] : memref<2x4120xf32, #tpu.memory_space<vmem>>, vector<1x128xf32>
      tpu.vector_store %arg11[%c0_73, %c2176], %124 {strides = array<i32>} : memref<2x4120xf32, #tpu.memory_space<vmem>>, vector<1x128xf32>,
      %126 = vector.extract_strided_slice %123 {offsets = [0, 128], sizes = [1, 128], strides = [1, 1]} : vector<1x256xf32> to vector<1x128xf32>
      %c1_74 = arith.constant 1 : index
      %c2176_75 = arith.constant 2176 : index
      %127 = vector.load %arg11[%c1_74, %c2176_75] : memref<2x4120xf32, #tpu.memory_space<vmem>>, vector<1x128xf32>
      tpu.vector_store %arg11[%c1_74, %c2176_75], %126 {strides = array<i32>} : memref<2x4120xf32, #tpu.memory_space<vmem>>, vector<1x128xf32>,
      %128 = vector.extract_strided_slice %37 {offsets = [18, 0], sizes = [1, 256], strides = [1, 1]} : vector<32x256xf32> to vector<1x256xf32>
      %129 = vector.extract_strided_slice %128 {offsets = [0, 0], sizes = [1, 128], strides = [1, 1]} : vector<1x256xf32> to vector<1x128xf32>
      %c0_76 = arith.constant 0 : index
      %c2304 = arith.constant 2304 : index
      %130 = vector.load %arg11[%c0_76, %c2304] : memref<2x4120xf32, #tpu.memory_space<vmem>>, vector<1x128xf32>
      tpu.vector_store %arg11[%c0_76, %c2304], %129 {strides = array<i32>} : memref<2x4120xf32, #tpu.memory_space<vmem>>, vector<1x128xf32>,
      %131 = vector.extract_strided_slice %128 {offsets = [0, 128], sizes = [1, 128], strides = [1, 1]} : vector<1x256xf32> to vector<1x128xf32>
      %c1_77 = arith.constant 1 : index
      %c2304_78 = arith.constant 2304 : index
      %132 = vector.load %arg11[%c1_77, %c2304_78] : memref<2x4120xf32, #tpu.memory_space<vmem>>, vector<1x128xf32>
      tpu.vector_store %arg11[%c1_77, %c2304_78], %131 {strides = array<i32>} : memref<2x4120xf32, #tpu.memory_space<vmem>>, vector<1x128xf32>,
      %133 = vector.extract_strided_slice %37 {offsets = [19, 0], sizes = [1, 256], strides = [1, 1]} : vector<32x256xf32> to vector<1x256xf32>
      %134 = vector.extract_strided_slice %133 {offsets = [0, 0], sizes = [1, 128], strides = [1, 1]} : vector<1x256xf32> to vector<1x128xf32>
      %c0_79 = arith.constant 0 : index
      %c2432 = arith.constant 2432 : index
      %135 = vector.load %arg11[%c0_79, %c2432] : memref<2x4120xf32, #tpu.memory_space<vmem>>, vector<1x128xf32>
      tpu.vector_store %arg11[%c0_79, %c2432], %134 {strides = array<i32>} : memref<2x4120xf32, #tpu.memory_space<vmem>>, vector<1x128xf32>,
      %136 = vector.extract_strided_slice %133 {offsets = [0, 128], sizes = [1, 128], strides = [1, 1]} : vector<1x256xf32> to vector<1x128xf32>
      %c1_80 = arith.constant 1 : index
      %c2432_81 = arith.constant 2432 : index
      %137 = vector.load %arg11[%c1_80, %c2432_81] : memref<2x4120xf32, #tpu.memory_space<vmem>>, vector<1x128xf32>
      tpu.vector_store %arg11[%c1_80, %c2432_81], %136 {strides = array<i32>} : memref<2x4120xf32, #tpu.memory_space<vmem>>, vector<1x128xf32>,
      %138 = vector.extract_strided_slice %37 {offsets = [20, 0], sizes = [1, 256], strides = [1, 1]} : vector<32x256xf32> to vector<1x256xf32>
      %139 = vector.extract_strided_slice %138 {offsets = [0, 0], sizes = [1, 128], strides = [1, 1]} : vector<1x256xf32> to vector<1x128xf32>
      %c0_82 = arith.constant 0 : index
      %c2560 = arith.constant 2560 : index
      %140 = vector.load %arg11[%c0_82, %c2560] : memref<2x4120xf32, #tpu.memory_space<vmem>>, vector<1x128xf32>
      tpu.vector_store %arg11[%c0_82, %c2560], %139 {strides = array<i32>} : memref<2x4120xf32, #tpu.memory_space<vmem>>, vector<1x128xf32>,
      %141 = vector.extract_strided_slice %138 {offsets = [0, 128], sizes = [1, 128], strides = [1, 1]} : vector<1x256xf32> to vector<1x128xf32>
      %c1_83 = arith.constant 1 : index
      %c2560_84 = arith.constant 2560 : index
      %142 = vector.load %arg11[%c1_83, %c2560_84] : memref<2x4120xf32, #tpu.memory_space<vmem>>, vector<1x128xf32>
      tpu.vector_store %arg11[%c1_83, %c2560_84], %141 {strides = array<i32>} : memref<2x4120xf32, #tpu.memory_space<vmem>>, vector<1x128xf32>,
      %143 = vector.extract_strided_slice %37 {offsets = [21, 0], sizes = [1, 256], strides = [1, 1]} : vector<32x256xf32> to vector<1x256xf32>
      %144 = vector.extract_strided_slice %143 {offsets = [0, 0], sizes = [1, 128], strides = [1, 1]} : vector<1x256xf32> to vector<1x128xf32>
      %c0_85 = arith.constant 0 : index
      %c2688 = arith.constant 2688 : index
      %145 = vector.load %arg11[%c0_85, %c2688] : memref<2x4120xf32, #tpu.memory_space<vmem>>, vector<1x128xf32>
      tpu.vector_store %arg11[%c0_85, %c2688], %144 {strides = array<i32>} : memref<2x4120xf32, #tpu.memory_space<vmem>>, vector<1x128xf32>,
      %146 = vector.extract_strided_slice %143 {offsets = [0, 128], sizes = [1, 128], strides = [1, 1]} : vector<1x256xf32> to vector<1x128xf32>
      %c1_86 = arith.constant 1 : index
      %c2688_87 = arith.constant 2688 : index
      %147 = vector.load %arg11[%c1_86, %c2688_87] : memref<2x4120xf32, #tpu.memory_space<vmem>>, vector<1x128xf32>
      tpu.vector_store %arg11[%c1_86, %c2688_87], %146 {strides = array<i32>} : memref<2x4120xf32, #tpu.memory_space<vmem>>, vector<1x128xf32>,
      %148 = vector.extract_strided_slice %37 {offsets = [22, 0], sizes = [1, 256], strides = [1, 1]} : vector<32x256xf32> to vector<1x256xf32>
      %149 = vector.extract_strided_slice %148 {offsets = [0, 0], sizes = [1, 128], strides = [1, 1]} : vector<1x256xf32> to vector<1x128xf32>
      %c0_88 = arith.constant 0 : index
      %c2816 = arith.constant 2816 : index
      %150 = vector.load %arg11[%c0_88, %c2816] : memref<2x4120xf32, #tpu.memory_space<vmem>>, vector<1x128xf32>
      tpu.vector_store %arg11[%c0_88, %c2816], %149 {strides = array<i32>} : memref<2x4120xf32, #tpu.memory_space<vmem>>, vector<1x128xf32>,
      %151 = vector.extract_strided_slice %148 {offsets = [0, 128], sizes = [1, 128], strides = [1, 1]} : vector<1x256xf32> to vector<1x128xf32>
      %c1_89 = arith.constant 1 : index
      %c2816_90 = arith.constant 2816 : index
      %152 = vector.load %arg11[%c1_89, %c2816_90] : memref<2x4120xf32, #tpu.memory_space<vmem>>, vector<1x128xf32>
      tpu.vector_store %arg11[%c1_89, %c2816_90], %151 {strides = array<i32>} : memref<2x4120xf32, #tpu.memory_space<vmem>>, vector<1x128xf32>,
      %153 = vector.extract_strided_slice %37 {offsets = [23, 0], sizes = [1, 256], strides = [1, 1]} : vector<32x256xf32> to vector<1x256xf32>
      %154 = vector.extract_strided_slice %153 {offsets = [0, 0], sizes = [1, 128], strides = [1, 1]} : vector<1x256xf32> to vector<1x128xf32>
      %c0_91 = arith.constant 0 : index
      %c2944 = arith.constant 2944 : index
      %155 = vector.load %arg11[%c0_91, %c2944] : memref<2x4120xf32, #tpu.memory_space<vmem>>, vector<1x128xf32>
      tpu.vector_store %arg11[%c0_91, %c2944], %154 {strides = array<i32>} : memref<2x4120xf32, #tpu.memory_space<vmem>>, vector<1x128xf32>,
      %156 = vector.extract_strided_slice %153 {offsets = [0, 128], sizes = [1, 128], strides = [1, 1]} : vector<1x256xf32> to vector<1x128xf32>
      %c1_92 = arith.constant 1 : index
      %c2944_93 = arith.constant 2944 : index
      %157 = vector.load %arg11[%c1_92, %c2944_93] : memref<2x4120xf32, #tpu.memory_space<vmem>>, vector<1x128xf32>
      tpu.vector_store %arg11[%c1_92, %c2944_93], %156 {strides = array<i32>} : memref<2x4120xf32, #tpu.memory_space<vmem>>, vector<1x128xf32>,
      %158 = vector.extract_strided_slice %37 {offsets = [24, 0], sizes = [1, 256], strides = [1, 1]} : vector<32x256xf32> to vector<1x256xf32>
      %159 = vector.extract_strided_slice %158 {offsets = [0, 0], sizes = [1, 128], strides = [1, 1]} : vector<1x256xf32> to vector<1x128xf32>
      %c0_94 = arith.constant 0 : index
      %c3072 = arith.constant 3072 : index
      %160 = vector.load %arg11[%c0_94, %c3072] : memref<2x4120xf32, #tpu.memory_space<vmem>>, vector<1x128xf32>
      tpu.vector_store %arg11[%c0_94, %c3072], %159 {strides = array<i32>} : memref<2x4120xf32, #tpu.memory_space<vmem>>, vector<1x128xf32>,
      %161 = vector.extract_strided_slice %158 {offsets = [0, 128], sizes = [1, 128], strides = [1, 1]} : vector<1x256xf32> to vector<1x128xf32>
      %c1_95 = arith.constant 1 : index
      %c3072_96 = arith.constant 3072 : index
      %162 = vector.load %arg11[%c1_95, %c3072_96] : memref<2x4120xf32, #tpu.memory_space<vmem>>, vector<1x128xf32>
      tpu.vector_store %arg11[%c1_95, %c3072_96], %161 {strides = array<i32>} : memref<2x4120xf32, #tpu.memory_space<vmem>>, vector<1x128xf32>,
      %163 = vector.extract_strided_slice %37 {offsets = [25, 0], sizes = [1, 256], strides = [1, 1]} : vector<32x256xf32> to vector<1x256xf32>
      %164 = vector.extract_strided_slice %163 {offsets = [0, 0], sizes = [1, 128], strides = [1, 1]} : vector<1x256xf32> to vector<1x128xf32>
      %c0_97 = arith.constant 0 : index
      %c3200 = arith.constant 3200 : index
      %165 = vector.load %arg11[%c0_97, %c3200] : memref<2x4120xf32, #tpu.memory_space<vmem>>, vector<1x128xf32>
      tpu.vector_store %arg11[%c0_97, %c3200], %164 {strides = array<i32>} : memref<2x4120xf32, #tpu.memory_space<vmem>>, vector<1x128xf32>,
      %166 = vector.extract_strided_slice %163 {offsets = [0, 128], sizes = [1, 128], strides = [1, 1]} : vector<1x256xf32> to vector<1x128xf32>
      %c1_98 = arith.constant 1 : index
      %c3200_99 = arith.constant 3200 : index
      %167 = vector.load %arg11[%c1_98, %c3200_99] : memref<2x4120xf32, #tpu.memory_space<vmem>>, vector<1x128xf32>
      tpu.vector_store %arg11[%c1_98, %c3200_99], %166 {strides = array<i32>} : memref<2x4120xf32, #tpu.memory_space<vmem>>, vector<1x128xf32>,
      %168 = vector.extract_strided_slice %37 {offsets = [26, 0], sizes = [1, 256], strides = [1, 1]} : vector<32x256xf32> to vector<1x256xf32>
      %169 = vector.extract_strided_slice %168 {offsets = [0, 0], sizes = [1, 128], strides = [1, 1]} : vector<1x256xf32> to vector<1x128xf32>
      %c0_100 = arith.constant 0 : index
      %c3328 = arith.constant 3328 : index
      %170 = vector.load %arg11[%c0_100, %c3328] : memref<2x4120xf32, #tpu.memory_space<vmem>>, vector<1x128xf32>
      tpu.vector_store %arg11[%c0_100, %c3328], %169 {strides = array<i32>} : memref<2x4120xf32, #tpu.memory_space<vmem>>, vector<1x128xf32>,
      %171 = vector.extract_strided_slice %168 {offsets = [0, 128], sizes = [1, 128], strides = [1, 1]} : vector<1x256xf32> to vector<1x128xf32>
      %c1_101 = arith.constant 1 : index
      %c3328_102 = arith.constant 3328 : index
      %172 = vector.load %arg11[%c1_101, %c3328_102] : memref<2x4120xf32, #tpu.memory_space<vmem>>, vector<1x128xf32>
      tpu.vector_store %arg11[%c1_101, %c3328_102], %171 {strides = array<i32>} : memref<2x4120xf32, #tpu.memory_space<vmem>>, vector<1x128xf32>,
      %173 = vector.extract_strided_slice %37 {offsets = [27, 0], sizes = [1, 256], strides = [1, 1]} : vector<32x256xf32> to vector<1x256xf32>
      %174 = vector.extract_strided_slice %173 {offsets = [0, 0], sizes = [1, 128], strides = [1, 1]} : vector<1x256xf32> to vector<1x128xf32>
      %c0_103 = arith.constant 0 : index
      %c3456 = arith.constant 3456 : index
      %175 = vector.load %arg11[%c0_103, %c3456] : memref<2x4120xf32, #tpu.memory_space<vmem>>, vector<1x128xf32>
      tpu.vector_store %arg11[%c0_103, %c3456], %174 {strides = array<i32>} : memref<2x4120xf32, #tpu.memory_space<vmem>>, vector<1x128xf32>,
      %176 = vector.extract_strided_slice %173 {offsets = [0, 128], sizes = [1, 128], strides = [1, 1]} : vector<1x256xf32> to vector<1x128xf32>
      %c1_104 = arith.constant 1 : index
      %c3456_105 = arith.constant 3456 : index
      %177 = vector.load %arg11[%c1_104, %c3456_105] : memref<2x4120xf32, #tpu.memory_space<vmem>>, vector<1x128xf32>
      tpu.vector_store %arg11[%c1_104, %c3456_105], %176 {strides = array<i32>} : memref<2x4120xf32, #tpu.memory_space<vmem>>, vector<1x128xf32>,
      %178 = vector.extract_strided_slice %37 {offsets = [28, 0], sizes = [1, 256], strides = [1, 1]} : vector<32x256xf32> to vector<1x256xf32>
      %179 = vector.extract_strided_slice %178 {offsets = [0, 0], sizes = [1, 128], strides = [1, 1]} : vector<1x256xf32> to vector<1x128xf32>
      %c0_106 = arith.constant 0 : index
      %c3584 = arith.constant 3584 : index
      %180 = vector.load %arg11[%c0_106, %c3584] : memref<2x4120xf32, #tpu.memory_space<vmem>>, vector<1x128xf32>
      tpu.vector_store %arg11[%c0_106, %c3584], %179 {strides = array<i32>} : memref<2x4120xf32, #tpu.memory_space<vmem>>, vector<1x128xf32>,
      %181 = vector.extract_strided_slice %178 {offsets = [0, 128], sizes = [1, 128], strides = [1, 1]} : vector<1x256xf32> to vector<1x128xf32>
      %c1_107 = arith.constant 1 : index
      %c3584_108 = arith.constant 3584 : index
      %182 = vector.load %arg11[%c1_107, %c3584_108] : memref<2x4120xf32, #tpu.memory_space<vmem>>, vector<1x128xf32>
      tpu.vector_store %arg11[%c1_107, %c3584_108], %181 {strides = array<i32>} : memref<2x4120xf32, #tpu.memory_space<vmem>>, vector<1x128xf32>,
      %183 = vector.extract_strided_slice %37 {offsets = [29, 0], sizes = [1, 256], strides = [1, 1]} : vector<32x256xf32> to vector<1x256xf32>
      %184 = vector.extract_strided_slice %183 {offsets = [0, 0], sizes = [1, 128], strides = [1, 1]} : vector<1x256xf32> to vector<1x128xf32>
      %c0_109 = arith.constant 0 : index
      %c3712 = arith.constant 3712 : index
      %185 = vector.load %arg11[%c0_109, %c3712] : memref<2x4120xf32, #tpu.memory_space<vmem>>, vector<1x128xf32>
      tpu.vector_store %arg11[%c0_109, %c3712], %184 {strides = array<i32>} : memref<2x4120xf32, #tpu.memory_space<vmem>>, vector<1x128xf32>,
      %186 = vector.extract_strided_slice %183 {offsets = [0, 128], sizes = [1, 128], strides = [1, 1]} : vector<1x256xf32> to vector<1x128xf32>
      %c1_110 = arith.constant 1 : index
      %c3712_111 = arith.constant 3712 : index
      %187 = vector.load %arg11[%c1_110, %c3712_111] : memref<2x4120xf32, #tpu.memory_space<vmem>>, vector<1x128xf32>
      tpu.vector_store %arg11[%c1_110, %c3712_111], %186 {strides = array<i32>} : memref<2x4120xf32, #tpu.memory_space<vmem>>, vector<1x128xf32>,
      %188 = vector.extract_strided_slice %37 {offsets = [30, 0], sizes = [1, 256], strides = [1, 1]} : vector<32x256xf32> to vector<1x256xf32>
      %189 = vector.extract_strided_slice %188 {offsets = [0, 0], sizes = [1, 128], strides = [1, 1]} : vector<1x256xf32> to vector<1x128xf32>
      %c0_112 = arith.constant 0 : index
      %c3840 = arith.constant 3840 : index
      %190 = vector.load %arg11[%c0_112, %c3840] : memref<2x4120xf32, #tpu.memory_space<vmem>>, vector<1x128xf32>
      tpu.vector_store %arg11[%c0_112, %c3840], %189 {strides = array<i32>} : memref<2x4120xf32, #tpu.memory_space<vmem>>, vector<1x128xf32>,
      %191 = vector.extract_strided_slice %188 {offsets = [0, 128], sizes = [1, 128], strides = [1, 1]} : vector<1x256xf32> to vector<1x128xf32>
      %c1_113 = arith.constant 1 : index
      %c3840_114 = arith.constant 3840 : index
      %192 = vector.load %arg11[%c1_113, %c3840_114] : memref<2x4120xf32, #tpu.memory_space<vmem>>, vector<1x128xf32>
      tpu.vector_store %arg11[%c1_113, %c3840_114], %191 {strides = array<i32>} : memref<2x4120xf32, #tpu.memory_space<vmem>>, vector<1x128xf32>,
      %193 = vector.extract_strided_slice %37 {offsets = [31, 0], sizes = [1, 256], strides = [1, 1]} : vector<32x256xf32> to vector<1x256xf32>
      %194 = vector.extract_strided_slice %193 {offsets = [0, 0], sizes = [1, 128], strides = [1, 1]} : vector<1x256xf32> to vector<1x128xf32>
      %c0_115 = arith.constant 0 : index
      %c3968 = arith.constant 3968 : index
      %195 = vector.load %arg11[%c0_115, %c3968] : memref<2x4120xf32, #tpu.memory_space<vmem>>, vector<1x128xf32>
      tpu.vector_store %arg11[%c0_115, %c3968], %194 {strides = array<i32>} : memref<2x4120xf32, #tpu.memory_space<vmem>>, vector<1x128xf32>,
      %196 = vector.extract_strided_slice %193 {offsets = [0, 128], sizes = [1, 128], strides = [1, 1]} : vector<1x256xf32> to vector<1x128xf32>
      %c1_116 = arith.constant 1 : index
      %c3968_117 = arith.constant 3968 : index
      %197 = vector.load %arg11[%c1_116, %c3968_117] : memref<2x4120xf32, #tpu.memory_space<vmem>>, vector<1x128xf32>
      tpu.vector_store %arg11[%c1_116, %c3968_117], %196 {strides = array<i32>} : memref<2x4120xf32, #tpu.memory_space<vmem>>, vector<1x128xf32>,
      %c0_118 = arith.constant 0 : index
      %c0_119 = arith.constant 0 : index
      %198 = vector.load %arg5[%c0_118, %c0_119] : memref<2x49xf32, #tpu.memory_space<vmem>>, vector<2x49xf32>
      %c0_120 = arith.constant 0 : index
      %c0_121 = arith.constant 0 : index
      %199 = vector.load %arg6[%c0_120, %c0_121] : memref<49x24xf32, #tpu.memory_space<vmem>>, vector<49x24xf32>
      %cst_122 = arith.constant dense<0.000000e+00> : vector<2x24xf32>
      %200 = tpu.matmul %198, %199, %cst_122 {dimension_numbers = #tpu.dot_dimension_numbers<[1], [0], [0], [1], [0, 0, 1, 1], [], []>} : vector<2x49xf32>, vector<49x24xf32>, vector<2x24xf32> -> vector<2x24xf32>
      %c0_123 = arith.constant 0 : index
      %c0_124 = arith.constant 0 : index
      %201 = vector.load %arg7[%c0_123, %c0_124] : memref<1x24xf32, #tpu.memory_space<vmem>>, vector<1x24xf32>
      %202 = vector.broadcast %201 : vector<1x24xf32> to vector<2x24xf32>
      %203 = arith.addf %200, %202 : vector<2x24xf32>
      %cst_125 = arith.constant 0.000000e+00 : f32
      %204 = vector.broadcast %cst_125 : f32 to vector<2x24xf32>
      %205 = arith.maximumf %203, %204 : vector<2x24xf32>
      %c0_126 = arith.constant 0 : index
      %c4096 = arith.constant 4096 : index
      %206 = vector.load %arg11[%c0_126, %c4096] : memref<2x4120xf32, #tpu.memory_space<vmem>>, vector<2x24xf32>
      tpu.vector_store %arg11[%c0_126, %c4096], %205 {strides = array<i32>} : memref<2x4120xf32, #tpu.memory_space<vmem>>, vector<2x24xf32>,
    } else {
    }
    %c0 = arith.constant 0 : index
    %c0_1 = arith.constant 0 : index
    %3 = vector.load %arg11[%c0, %c0_1] : memref<2x4120xf32, #tpu.memory_space<vmem>>, vector<2x4120xf32>
    %4 = arith.truncf %3 : vector<2x4120xf32> to vector<2x4120xbf16>
    %c0_2 = arith.constant 0 : index
    %c0_3 = arith.constant 0 : index
    %c0_4 = arith.constant 0 : index
    %5 = vector.load %arg8[%c0_2, %c0_3, %c0_4] : memref<1x4120x384xbf16, #tpu.memory_space<vmem>>, vector<1x4120x384xbf16>
    %6 = vector.shape_cast %5 : vector<1x4120x384xbf16> to vector<4120x384xbf16>
    %cst = arith.constant dense<0.000000e+00> : vector<2x384xf32>
    %7 = tpu.matmul %4, %6, %cst {dimension_numbers = #tpu.dot_dimension_numbers<[1], [0], [0], [1], [0, 0, 1, 1], [], []>} : vector<2x4120xbf16>, vector<4120x384xbf16>, vector<2x384xf32> -> vector<2x384xf32>
    %c0_5 = arith.constant 0 : index
    %c0_6 = arith.constant 0 : index
    %c0_7 = arith.constant 0 : index
    %8 = vector.load %arg9[%c0_5, %c0_6, %c0_7] : memref<1x1x384xf32, #tpu.memory_space<vmem>>, vector<1x1x384xf32>
    %9 = vector.shape_cast %8 : vector<1x1x384xf32> to vector<1x384xf32>
    %10 = vector.broadcast %9 : vector<1x384xf32> to vector<2x384xf32>
    %11 = arith.addf %7, %10 : vector<2x384xf32>
    %c0_8 = arith.constant 0 : index
    %c0_9 = arith.constant 0 : index
    %12 = vector.load %arg10[%c0_8, %c0_9] : memref<2x384xf32, #tpu.memory_space<vmem>>, vector<2x384xf32>
    tpu.vector_store %arg10[%c0_8, %c0_9], %11 {strides = array<i32>} : memref<2x384xf32, #tpu.memory_space<vmem>>, vector<2x384xf32>,
    return
  }
  func.func @transform_0(%arg0: i32) -> (i32, i32) {
    %c0_i32 = arith.constant 0 : i32
    %c0_i32_0 = arith.constant 0 : i32
    %c0_i32_1 = arith.constant 0 : i32
    return %c0_i32, %c0_i32_0 : i32, i32
  }
  func.func @transform_1(%arg0: i32) -> (i32, i32) {
    %c0_i32 = arith.constant 0 : i32
    %c0_i32_0 = arith.constant 0 : i32
    %c0_i32_1 = arith.constant 0 : i32
    return %c0_i32, %c0_i32_0 : i32, i32
  }
  func.func @transform_2(%arg0: i32) -> (i32, i32) {
    %c0_i32 = arith.constant 0 : i32
    %c0_i32_0 = arith.constant 0 : i32
    %c0_i32_1 = arith.constant 0 : i32
    return %c0_i32, %c0_i32_0 : i32, i32
  }
  func.func @transform_3(%arg0: i32) -> (i32, i32) {
    %c0_i32 = arith.constant 0 : i32
    %c0_i32_0 = arith.constant 0 : i32
    %c0_i32_1 = arith.constant 0 : i32
    return %c0_i32, %c0_i32_0 : i32, i32
  }
  func.func @transform_4(%arg0: i32) -> (i32, i32) {
    %c0_i32 = arith.constant 0 : i32
    %c0_i32_0 = arith.constant 0 : i32
    %c0_i32_1 = arith.constant 0 : i32
    return %c0_i32, %c0_i32_0 : i32, i32
  }
  func.func @transform_5(%arg0: i32) -> (i32, i32) {
    %c0_i32 = arith.constant 0 : i32
    %c0_i32_0 = arith.constant 0 : i32
    %c0_i32_1 = arith.constant 0 : i32
    return %c0_i32, %c0_i32_0 : i32, i32
  }
  func.func @transform_6(%arg0: i32) -> (i32, i32) {
    %c0_i32 = arith.constant 0 : i32
    %c0_i32_0 = arith.constant 0 : i32
    %c0_i32_1 = arith.constant 0 : i32
    return %c0_i32, %c0_i32_0 : i32, i32
  }
  func.func @transform_7(%arg0: i32) -> (i32, i32, i32) {
    %c0_i32 = arith.constant 0 : i32
    %c0_i32_0 = arith.constant 0 : i32
    %c0_i32_1 = arith.constant 0 : i32
    return %arg0, %c0_i32, %c0_i32_0 : i32, i32, i32
  }
  func.func @transform_8(%arg0: i32) -> (i32, i32, i32) {
    %c0_i32 = arith.constant 0 : i32
    %c0_i32_0 = arith.constant 0 : i32
    %c0_i32_1 = arith.constant 0 : i32
    return %arg0, %c0_i32, %c0_i32_0 : i32, i32, i32
  }
  func.func @transform_9(%arg0: i32) -> (i32, i32) {
    %c0_i32 = arith.constant 0 : i32
    %c0_i32_0 = arith.constant 0 : i32
    return %c0_i32, %arg0 : i32, i32
  }
}

</mosaic_0001>

<bundles_post_ra>
// kernel: cnn_policy_forward.1
= control target key start
LH: loop header
LB: loop body
LE: loop exit
PB: predicated region body
PF: predicated region fallthrough
CT: control target
= control target key end

     0   :  { %s12346_s0 = inlined_call_operand.vmem [shape: f32[37,296], index: 0, kind: input, shape index: {}]   ;;  %s12347_s1 = inlined_call_operand.hbm [shape: f32[16,37], index: 1, kind: input, shape index: {}]   ;;  %s12348_s2 = inlined_call_operand.hbm [shape: f32[32,64], index: 2, kind: input, shape index: {}]   ;;  %s12349_s3 = inlined_call_operand.vmem [shape: f32[32,1], index: 3, kind: input, shape index: {}]   ;;  %s12350_s4 = inlined_call_operand.hbm [shape: f32[2,49], index: 4, kind: input, shape index: {}]   ;;  %s12351_s5 = inlined_call_operand.vmem [shape: f32[49,24], index: 5, kind: input, shape index: {}]   ;;  %s12352_s6 = inlined_call_operand.hbm [shape: f32[1,24], index: 6, kind: input, shape index: {}]   ;;  %s12353_s7 = inlined_call_operand.hbm [shape: bf16[3,4120,384], index: 7, kind: input, shape index: {}]   ;;  %s12354_s8 = inlined_call_operand.hbm [shape: f32[3,1,384], index: 8, kind: input, shape index: {}]   ;;  %s12355_s9 = inlined_call_operand.vmem [shape: f32[2,1152], index: 9, kind: output, shape index: {}]  }
   0x1   :  { %12361 = sst [smem:[#allocation16_spill]] %s12347_s1 }
   0x2   :  { %12362 = sst [smem:[#allocation17_spill]] %s12348_s2 }
   0x3   :  { %14 = vsyncpa [#allocation4], 0 }
   0x4   :  { %15 = vsyncpa [#allocation6], 0 }
   0x5   :  { %16 = vsyncpa [#allocation9], 0  ;;  %s10908_s30 = smov 0   ;;  %s10910_s10 = smov 0  }
   0x6   :  { %s10912_s11 = smov 0   ;;  %s10914_s12 = smov 0  }
   0x7 LB: > { %s10927_s13 = sadd.s32 4294967295, %s10833_s12   ;;  %p189_p0 = scmp.ne.s32.totalorder %s10825_s10, %s10821_s30  ;;  %s10833_s12 = sphi %s10914_s12, %s12384_s12   ;;  %s10829_s11 = sphi %s10912_s11, %s12383_s11   ;;  %s10825_s10 = sphi %s10910_s10, %s12382_s10   ;;  %s10821_s30 = sphi %s10908_s30, %s12381_s30  }
   0x8   : > { %p12356_p1 = scmp.eq.s32.totalorder %s10927_s13, 0  ;;  %p8220_p2 = scmp.ge.s32.totalorder %s10833_s12, 1 }
   0x9   : > { %p252_p3 = scmp.lt.s32.totalorder %s10833_s12, 4  ;;  %s10835_s16 = smov [#allocation3]  }
   0xa   : > { %p10936_p5 = por %p12356_p1, %p189_p0  ;;  %s267_s17 = sshll.u32 %s10835_s16, 4  ;;  %s268_s17 = int_to_ptr.vmem [resolvable:$true] %s267_s17 }
   0xb   : > { %p10940_p6 = pnand %p8220_p2, %p252_p3  ;;  %s10836_s19 = smov [#allocation5]  }
   0xc   : > { %s12363_s14 = scalar_select %p10936_p5, 1, 0 }
   0xd   : > { %s12364_s15 = scalar_select %p10940_p6, 1, 0 }
   0xe   : > { %p9503_p7 = pneg %p10940_p6  ;;  %s280_s20 = sshll.u32 %s10836_s19, 4  ;;  %s281_s20 = int_to_ptr.vmem [resolvable:$true] %s280_s20 }
   0xf   : > { %s10638_s21 = scalar_lea.vmem %s268_s17, 256  ;;  %p10646_p13 = scmp.lt.s32.totalorder %s268_s17, %s268_s17 }
  0x10   : > { %p10948_p8 = pnand %p9503_p7, %p12356_p1  ;;  %p10639_p10 = scmp.ne.s32.totalorder %s268_s17, %s10638_s21 }
  0x11   : > { %p10647_p0 = scmp.lt.s32.totalorder %s10638_s21, %s10638_s21 }
  0x12   : > { %p12358_p9 = pneg %p10948_p8 }
  0x13   : > { %p10648_p2 = por %p10647_p0, %p10646_p13 }
  0x14   : > { %p10641_p11 = pnand %p10639_p10, %p12358_p9 }
  0x16   : > { %p10642_p12 = pneg %p10641_p11 }
  0x18   : > { %p10649_p3 = pnand %p10648_p2, %p10642_p12 }
  0x1a   : > { %10652 = shalt.err (!%p10649_p3)
}
  0x1b   : > { %s10837_s22 = smov 128   ;;  %s10838_s23 = smov 8  }
  0x1c   : > { %s12366_s1 = sld [smem:[#allocation16_spill]]  ;;  %s10664_s26 = scalar_lea.vmem %s281_s20, 512 }
  0x1d   : > { %p10665_p7 = scmp.ne.s32.totalorder %s281_s20, %s10664_s26  ;;  %p10672_p4 = scmp.lt.s32.totalorder %s281_s20, %s281_s20 }
  0x1e   : > { %p10673_p1 = scmp.lt.s32.totalorder %s10664_s26, %s10664_s26 }
  0x1f   : > { %p10667_p10 = pnand %p10665_p7, %p12358_p9 }
  0x20   : > { %p10674_p13 = por %p10673_p1, %p10672_p4 }
  0x21   : > { %p10668_p11 = pneg %p10667_p10 }
  0x22   : > { %9506 = dma.hbm_to_vmem [thread:$0]  (!%p10948_p8), %s12366_s1, 256, %s268_s17, [#allocation4], %s10837_s22, %s10837_s22, %s10838_s23  }
  0x23   : > { %p10675_p12 = pnand %p10674_p13, %p10668_p11 }
  0x25   : > { %10678 = shalt.err (!%p10675_p12)
}
  0x26   : > { %s12367_s2 = sld [smem:[#allocation17_spill]]  ;;  %s10971_s29 = sadd.s32 1, %s10833_s12  }
  0x27   : > { %s176_s30 = sadd.s32 1, %s10829_s11  ;;  %s173_s16 = ssub.s32 %s10833_s12, %s10971_s29 }
  0x28   : > { %p183_p1 = scmp.ne.s32.totalorder %s10829_s11, %s10825_s10  ;;  %p174_p4 = scmp.eq.s32.totalorder %s173_s16, 0 }
  0x29   : > { %p184_p0 = scmp.eq.s32.totalorder %s10833_s12, 0  ;;  %p9527_p2 = scmp.lt.s32.totalorder %s10833_s12, 3 }
  0x2a   : > { %s322_s17 = sand.u32 1, %s10833_s12   ;;  %s12357_s21 = sand.u32 1, %s10829_s11  }
  0x2b   : > { %s10982_s19 = scalar_select %p174_p4, %s10829_s11, %s176_s30  }
  0x2c   : > { %9509 = dma.hbm_to_vmem [thread:$0]  (!%p10948_p8), %s12367_s2, 512, %s281_s20, [#allocation6], %s10837_s22, %s10837_s22, %s10838_s23  }
  0x2d   : > { %p185_p3 = por %p184_p0, %p183_p1  ;;  %s9478_s24 = smul.u32 98880, %s10833_s12 }
  0x2e   : > { %s9477_s25 = smul.u32 6180, %s12357_s21  ;;  %s10999_s30 = scalar_lea.sflag [#allocation4], %s322_s17 }
  0x2f   : > { %p10988_p7 = pnand %p9527_p2, %p185_p3  ;;  %s10995_s23 = scalar_lea.hbm %s12353_s7, %s9478_s24 }
  0x30   : > { %s326_s27 = scalar_lea.vmem [#allocation10], %s9477_s25  ;;  %s10679_s16 = scalar_lea.hbm %s10995_s23, 98880 }
  0x31   : > { %s333_s28 = sshll.u32 %s326_s27, 4  ;;  %p10680_p10 = scmp.ne.s32.totalorder %s10995_s23, %s10679_s16  ;;  %s10997_s28 = int_to_ptr.vmem [resolvable:$true] %s333_s28 }
  0x32   : > { %p10681_p11 = pneg %p10988_p7  ;;  %s10684_s22 = scalar_lea.hbm %s12353_s7, 296640 }
  0x33   : > { %p10685_p1 = scmp.lt.s32.totalorder %s10995_s23, %s12353_s7  ;;  %p10686_p4 = scmp.lt.s32.totalorder %s10684_s22, %s10679_s16 }
  0x34   : > { %p10682_p13 = pnand %p10681_p11, %p10680_p10 }
  0x35   : > { %p10687_p0 = por %p10686_p4, %p10685_p1 }
  0x36   : > { %p10683_p12 = pneg %p10682_p13 }
  0x38   : > { %p10688_p2 = pnand %p10687_p0, %p10683_p12 }
  0x3a   : > { %10691 = shalt.err (!%p10688_p2)
}
  0x3b   : > { %s10692_s17 = scalar_lea.vmem %s10997_s28, 98880  ;;  %s10839_s25 = smov [#allocation10]  }
  0x3c   : > { %p10693_p3 = scmp.ne.s32.totalorder %s10997_s28, %s10692_s17  ;;  %s10697_s27 = sshll.u32 %s10839_s25, 4  ;;  %s10698_s27 = int_to_ptr.vmem [resolvable:$false] %s10697_s27 }
  0x3d   : > { %s10699_s20 = scalar_lea.vmem %s10698_s27, 197760  ;;  %p10700_p9 = scmp.lt.s32.totalorder %s10997_s28, %s10698_s27 }
  0x3e   : > { %p10695_p10 = pnand %p10693_p3, %p10681_p11  ;;  %p10701_p5 = scmp.lt.s32.totalorder %s10699_s20, %s10692_s17 }
  0x40   : > { %p10696_p13 = pneg %p10695_p10  ;;  %p10702_p6 = por %p10701_p5, %p10700_p9 }
  0x42   : > { %p10703_p1 = pnand %p10702_p6, %p10696_p13 }
  0x44   : > { %10706 = shalt.err (!%p10703_p1)
}
  0x45   : > { %s10840_s1 = smov 192   ;;  %s10841_s21 = smov 12  }
  0x46   : > { %9519 = dma.hbm_to_vmem [thread:$0]  (!%p10988_p7), %s10995_s23, 98880, %s10997_s28, %s10999_s30, %s10840_s1, %s10840_s1, %s10841_s21  }
  0x47   : > { %s10842_s16 = smov [#allocation7]   ;;  %s10843_s22 = smov [#allocation8]  }
  0x48   : > { %s297_s24 = sshll.u32 %s10842_s16, 4  ;;  %s311_s25 = sshll.u32 %s10843_s22, 4  ;;  %s298_s24 = int_to_ptr.vmem [resolvable:$true] %s297_s24  ;;  %s312_s25 = int_to_ptr.vmem [resolvable:$true] %s311_s25 }
  0x49   : > { %s10718_s2 = scalar_lea.vmem %s298_s24, 32  ;;  %p12369_p5 = pneg %p10948_p8 }
  0x4a   : > { %p10719_p12 = scmp.ne.s32.totalorder %s298_s24, %s10718_s2  ;;  %p10726_p4 = scmp.lt.s32.totalorder %s298_s24, %s298_s24 }
  0x4b   : > { %p10727_p0 = scmp.lt.s32.totalorder %s10718_s2, %s10718_s2 }
  0x4c   : > { %p10721_p6 = pnand %p10719_p12, %p12369_p5 }
  0x4d   : > { %p10728_p2 = por %p10727_p0, %p10726_p4 }
  0x4e   : > { %p10722_p9 = pneg %p10721_p6 }
  0x50   : > { %p10729_p3 = pnand %p10728_p2, %p10722_p9 }
  0x52   : > { %10732 = shalt.err (!%p10729_p3)
}
  0x53   : > { %9512 = dma.hbm_to_vmem [thread:$0]  (!%p10948_p8), %s12350_s4, 32, %s298_s24, [#allocation6]  }
  0x54   : > { %s12370_s28 = sand.u32 1, %s10829_s11   ;;  %s10744_s20 = scalar_lea.vmem %s312_s25, 16 }
  0x55   : > { %s9479_s27 = smul.u32 3, %s12370_s28  ;;  %p10745_p10 = scmp.ne.s32.totalorder %s312_s25, %s10744_s20 }
  0x56   : > { %p12371_p13 = pmov %p12369_p5  ;;  %s10751_s2 = scalar_lea.vmem %s312_s25, 32 }
  0x57   : > { %p10752_p5 = scmp.lt.s32.totalorder %s312_s25, %s312_s25  ;;  %p10753_p6 = scmp.lt.s32.totalorder %s10751_s2, %s10744_s20 }
  0x58   : > { %p10747_p1 = pnand %p10745_p10, %p12371_p13 }
  0x59   : > { %p10754_p9 = por %p10753_p6, %p10752_p5 }
  0x5a   : > { %p10748_p12 = pneg %p10747_p1 }
  0x5c   : > { %p10755_p4 = pnand %p10754_p9, %p10748_p12 }
  0x5e   : > { %10758 = shalt.err (!%p10755_p4)
}
  0x5f   : > { %9515 = dma.hbm_to_vmem [thread:$0]  (!%p10948_p8), %s12352_s6, 16, %s312_s25, [#allocation9]  }
  0x60   : > { %s9480_s16 = smul.u32 48, %s10833_s12  ;;  %s347_s24 = scalar_lea.vmem [#allocation11], %s9479_s27 }
  0x61   : > { %s355_s22 = sshll.u32 %s347_s24, 4  ;;  %s10764_s1 = scalar_lea.hbm %s12354_s8, 144  ;;  %s356_s22 = int_to_ptr.vmem [resolvable:$true] %s355_s22 }
  0x62   : > { %s353_s28 = scalar_lea.hbm %s12354_s8, %s9480_s16 }
  0x63   : > { %s10759_s20 = scalar_lea.hbm %s353_s28, 48  ;;  %p10765_p8 = scmp.lt.s32.totalorder %s353_s28, %s12354_s8 }
  0x64   : > { %p10760_p0 = scmp.ne.s32.totalorder %s353_s28, %s10759_s20  ;;  %p10766_p10 = scmp.lt.s32.totalorder %s10764_s1, %s10759_s20 }
  0x66   : > { %p10762_p2 = pnand %p10760_p0, %p10681_p11  ;;  %p10767_p13 = por %p10766_p10, %p10765_p8 }
  0x68   : > { %p10763_p3 = pneg %p10762_p2 }
  0x6a   : > { %p10768_p1 = pnand %p10767_p13, %p10763_p3 }
  0x6c   : > { %10771 = shalt.err (!%p10768_p1)
}
  0x6d   : > { %s10772_s12 = scalar_lea.vmem %s356_s22, 48  ;;  %s10844_s27 = smov [#allocation11]  }
  0x6e   : > { %p10773_p12 = scmp.ne.s32.totalorder %s356_s22, %s10772_s12  ;;  %s10777_s16 = sshll.u32 %s10844_s27, 4  ;;  %s10778_s16 = int_to_ptr.vmem [resolvable:$false] %s10777_s16 }
  0x6f   : > { %s10779_s24 = scalar_lea.vmem %s10778_s16, 96  ;;  %p10780_p9 = scmp.lt.s32.totalorder %s356_s22, %s10778_s16 }
  0x70   : > { %p10775_p5 = pnand %p10773_p12, %p10681_p11  ;;  %p10781_p4 = scmp.lt.s32.totalorder %s10779_s24, %s10772_s12 }
  0x72   : > { %p10776_p6 = pneg %p10775_p5  ;;  %p10782_p0 = por %p10781_p4, %p10780_p9 }
  0x74   : > { %p10783_p2 = pnand %p10782_p0, %p10776_p6 }
  0x76   : > { %10786 = shalt.err (!%p10783_p2)
}
  0x77   : > { %9522 = dma.hbm_to_vmem [thread:$0]  (!%p10988_p7), %s353_s28, 48, %s356_s22, %s10999_s30  }
  0x78   : > { %p12372_p3 = scmp.ne.s32.totalorder %s12364_s15, 0 }
  0x79   : > { %p12373_p8 = scmp.eq.s32.totalorder (!%p12372_p3), %s10927_s13, 0 }
  0x7a   : > { %364 = sbr.rel (%p12372_p3) target bundleno = 1736 (0x6c8), region = 56 }
  0x7f   : > { %10804 = dma.done.wait (%p12373_p8), [#allocation4], 256   ;;  %p12374_p11 = pmov %p12373_p8 }
  0x80   : > { %p12375_p10 = pmov %p12373_p8 }
  0x81   : > { %10806 = vsyncadd (%p12374_p11), [#allocation4], 4294967040 }
  0x82   : > { %10808 = dma.done.wait (%p12375_p10), [#allocation6], 544   ;;  %p12376_p13 = pmov %p12373_p8 }
  0x83   : > { %p12377_p1 = pmov %p12373_p8 }
  0x84   : > { %10810 = vsyncadd (%p12376_p13), [#allocation6], 4294966752 }
  0x85   : > { %10812 = dma.done.wait (%p12377_p1), [#allocation9], 16   ;;  %p12378_p7 = pmov %p12377_p1 }
  0x86   : > { %s382_s15 = sand.u32 1, %s10927_s13   ;;  %s384_s26 = sand.u32 1, %s10825_s10  }
  0x87   : > { %10814 = vsyncadd (%p12378_p7), [#allocation9], 4294967280  ;;  %s9481_s30 = smul.u32 6180, %s384_s26  ;;  %s383_s22 = scalar_lea.sflag [#allocation4], %s382_s15 }
  0x88   : > { %p12379_p12 = scmp.ne.s32.totalorder %s12363_s14, 0 }
  0x89   : > { %s11079_s17 = scalar_lea.vmem [#allocation10], %s9481_s30 }
  0x8a   : > { %10816 = dma.done.wait (%p12379_p12), %s383_s22, 98928  }
  0x8b   : > { %10818 = vsyncadd (%p12379_p12), %s383_s22, 4294868368  ;;  %s11085_s23 = smul.u32 3, %s384_s26  ;;  %p12380_p6 = scmp.ne.s32.totalorder %s10927_s13, 0 }
  0x8c   : > { %s435_s28 = smul.u32 3, %s10927_s13  ;;  %s10846_s25 = smov (!%p12380_p6), 111  }
  0x8d   : > { %s395_s21 = scalar_lea.vmem [#allocation11], %s11085_s23  ;;  %s10847_s14 = smov (!%p12380_p6), 95  }
  0x8e   : > { %p436_p5 = scmp.lt.s32.totalorder %s435_s28, 8  ;;  %445 = sbr.rel (%p12380_p6) target bundleno = 753 (0x2f1), region = 84 }
  0x8f   : > { %s10848_s12 = smov (!%p12380_p6), 112   ;;  %s10849_s27 = smov (!%p12380_p6), 96  }
  0x90   : > { %s12386_s28 = smov (!%p436_p5, %s435_s28), 8  ;;  %s10850_s16 = smov (!%p12380_p6), 127  }
  0x91   : > { %s8233_s20 = sshll.u32 %s12386_s28, 1 }
  0x92   : > { %s11091_s1 = scalar_lea.vmem %s12355_s9, %s8233_s20 }
  0x93   : > { %v461_v0 = vld [vmem:[%s12346_s0 + $0x68] sm:$0x1f]  ;;  %vm470_vm0 = vcmask 1044480   ;;  %v460_v1 = vld [vmem:[%s12346_s0 + $0x60] sm:$0x1f]  ;;  %v458_v2 = vld [vmem:[%s12346_s0 + $0x50] sm:$0xff] }
  0x94   : > { %8235 = vmatprep.subr.msk.mxu1 %vm470_vm0, %v461_v0  ;;  %v457_v3 = vld [vmem:[%s12346_s0 + $0x48] sm:$0xff]  ;;  %v455_v4 = vld [vmem:[%s12346_s0 + $0x38] sm:$0xff]  ;;  %v10845_v5 = vmov 0.0   ;;  %v454_v6 = vld [vmem:[%s12346_s0 + $0x30] sm:$0xff]  ;;  %vm463_vm1 = vcmask 302080   ;;  %v10851_v32 = vmov 0  }
  0x95   : > { %8236 = vmatpush1.msk.msra.mxu1 %vm470_vm0, %v460_v1  ;;  %544 = vmatprep.mubr.f32.mxu1 %v10845_v5  ;;  %v452_v7 = vld [vmem:[%s12346_s0 + $0x20] sm:$0xff]  ;;  %v451_v8 = vld [vmem:[%s12346_s0 + $0x18] sm:$0xff]  ;;  %v449_v9 = vld [vmem:[%s12346_s0 + $0x8] sm:$0xff]  ;;  %vm720_vm2 = vcmask 777216   ;;  %vm678_vm3 = vcmask 908288   ;;  %vm699_vm4 = vcmask 785408  }
  0x96   : > { %504 = vmatprep.subr.mxu1 %v458_v2  ;;  %830 = vmatprep.mubr.f32.mxu0 %v10845_v5  ;;  %v448_v10 = vld [vmem:[%s12346_s0] sm:$0xff]  ;;  %v462_v12 = vld [vmem:[%s12346_s0 + $0x70] sm:$0x1f]  ;;  %v459_v13 = vld [vmem:[%s12346_s0 + $0x58] sm:$0xff]  ;;  %vm650_vm5 = vcmask 916480   ;;  %vm665_vm6 = vcmask 1039360  }
  0x97   : > { %505 = vmatpush1.msra.mxu1 %v457_v3  ;;  %v446_v11 = vld [vmem:[#allocation3] sm:$0xff]  ;;  %v447_v14 = vld [vmem:[#allocation3 + $0x8] sm:$0xff]  ;;  %9585 = vset.pattern.permute.xlu0 %v10851_v32  ;;  %v732_v34 = vld [vmem:[%s12349_s3 + $0x18] sm:$0xff]  ;;  %vm753_vm7 = vcmask 523264   ;;  %vm1210_vm8 = vcmask 1040384   ;;  %vm10852_vm9 = vmmov 0  }
  0x98   : > { %506 = vmatprep.subr.mxu1 %v455_v4  ;;  %v456_v15 = vld [vmem:[%s12346_s0 + $0x40] sm:$0xff]  ;;  %v453_v16 = vld [vmem:[%s12346_s0 + $0x28] sm:$0xff]  ;;  %v450_v17 = vld [vmem:[%s12346_s0 + $0x10] sm:$0xff]  ;;  %9586 = vset.pattern.permute.xlu1 %v10851_v32  ;;  %vm1206_vm10 = vcmask 400384   ;;  %vm1285_vm11 = vcmask 189440  }
  0x99   : > { %507 = vmatpush1.msra.mxu1 %v454_v6  ;;  %v729_v30 = vld [vmem:[%s12349_s3] sm:$0xff]  ;;  %v730_v31 = vld [vmem:[%s12349_s3 + $0x8] sm:$0xff]  ;;  %v731_v33 = vld [vmem:[%s12349_s3 + $0x10] sm:$0xff] }
  0x9a   : > { %508 = vmatprep.subr.mxu1 %v452_v7 }
  0x9b   : > { %509 = vmatpush1.msra.mxu1 %v451_v8 }
  0x9c   : > { %510 = vmatprep.subr.mxu1 %v449_v9 }
  0x9d   : > { %511 = vmatpush1.msra.mxu1 %v448_v10  ;;  %v725_v10 = vld [vmem:[#allocation5] sm:$0xff] }
  0x9e   : > { %8237 = vmatmul.mubr.msk.f32.vlgmr.msra.gmra.mxu1 %vm463_vm1, %v446_v11  ;;  %9439 = vmatprep.subr.msk.mxu1 %vm470_vm0, %v462_v12 }
  0x9f   : > { %550 = vmatprep.mubr.f32.mxu1 %v10845_v5  ;;  %9440 = vmatpush3.msk.msra.mxu1 %vm470_vm0, %v462_v12  ;;  %v1197_v12 = vld [vmem:[%s12351_s5 + $0x28] sm:$0xff] }
  0xa0   : > { %9441 = vmatprep.subr.mxu1 %v459_v13 }
  0xa1   : > { %9442 = vmatpush3.msra.mxu1 %v459_v13  ;;  %v726_v13 = vld [vmem:[#allocation5 + $0x8] sm:$0xff] }
  0xa2   : > { %8238 = vmatmul.mubr.msk.f32.gmra.mxu1 %vm463_vm1, %v447_v14  ;;  %9443 = vmatprep.subr.mxu1 %v456_v15 }
  0xa3   : > { %9444 = vmatpush3.msra.mxu1 %v456_v15  ;;  %9449 = vmatprep.mubr.msk.f32.mxu1 %vm463_vm1, %v446_v11  ;;  %v1198_v11 = vld [vmem:[%s12351_s5 + $0x30] sm:$0x1]  ;;  %v1195_v15 = vld [vmem:[%s12351_s5 + $0x18] sm:$0xff] }
  0xa4   : > { %9445 = vmatprep.subr.mxu1 %v453_v16 }
  0xa5   : > { %9446 = vmatpush3.msra.mxu1 %v453_v16  ;;  %v727_v16 = vld [vmem:[#allocation5 + $0x10] sm:$0xff] }
  0xa6   : > { %9447 = vmatprep.subr.mxu1 %v450_v17 }
  0xa7   : > { %9448 = vmatpush3.msra.mxu1 %v450_v17  ;;  %v1194_v17 = vld [vmem:[%s12351_s5 + $0x10] sm:$0xff] }
  0xa8   : > { %9450 = vmatmul.mubr.msk.f32.vlgmr.msra.gmra.mxu1 %vm463_vm1, %v447_v14  ;;  %v1196_v14 = vld [vmem:[%s12351_s5 + $0x20] sm:$0xff] }
 0x15e   : > { %v546_v18 = vpop.f32.mrf.mxu1 }
 0x15f   : > { %v11152_v19 = vmax.f32 %v546_v18, 0.0  ;;  %v1193_v18 = vld [vmem:[%s12351_s5 + $0x8] sm:$0xff] }
 0x160   : > { %v548_v20 = vpop.f32.mrf.mxu1 }
 0x161   : > { %v633_v21 = vmax.f32 %v548_v20, 0.0  ;;  %704 = vrot.lane.b32.xlu1 %v11152_v19, %s10846_s25  ;;  %v1192_v20 = vld [vmem:[%s12351_s5] sm:$0xff] }
 0x162   : > { %v552_v22 = vpop.f32.mrf.mxu1 }
 0x163   : > { %712 = vrot.lane.b32.xlu0 %v633_v21, %s10847_s14  ;;  %v11158_v23 = vmax.f32 %v552_v22, 0.0  ;;  %v10853_v22 = vmov 1983009808  }
 0x164   : > { %v554_v24 = vpop.f32.mrf.mxu1 }
 0x165   : > { %683 = vrot.lane.b32.xlu1 %v11152_v19, %s10848_s12  ;;  %v636_v25 = vmax.f32 %v554_v24, 0.0  ;;  %v869_v24 = vlaneseq }
 0x167   : > { %670 = vrot.lane.b32.xlu0 %v633_v21, %s10846_s25 }
 0x168   : > { %v9451_v26 = vpop.f32.mrf.mxu1 }
 0x169   : > { %706 = vrot.lane.b32.xlu1 %v11158_v23, %s10846_s25  ;;  %v637_v27 = vmax.f32 %v9451_v26, 0.0  ;;  %v870_v26 = vshrl.u32 %v869_v24, 7 }
 0x16a   : > { %v623_v28 = vpop.f32.mrf.mxu1 }
 0x16b   : > { %691 = vrot.lane.b32.xlu0 %v633_v21, %s10849_s27  ;;  %v634_v29 = vmax.f32 %v623_v28, 0.0 }
 0x16d   : > { %685 = vrot.lane.b32.xlu1 %v11158_v23, %s10848_s12 }
 0x16f   : > { %642 = vrot.lane.b32.xlu0 %v633_v21, %s10848_s12 }
 0x171   : > { %661 = vrot.lane.b32.xlu1 %v11158_v23, %s10850_s16 }
 0x173   : > { %716 = vrot.lane.b32.xlu0 %v636_v25, %s10847_s14 }
 0x175   : > { %674 = vrot.lane.b32.xlu1 %v636_v25, %s10846_s25 }
 0x177   : > { %695 = vrot.lane.b32.xlu0 %v636_v25, %s10849_s27 }
 0x179   : > { %659 = vrot.lane.b32.xlu1 %v633_v21, %s10850_s16  ;;  %v1191_v21 = vld [vmem:[#allocation7] sm:$0x3] }
 0x17b   : > { %646 = vrot.lane.b32.xlu0 %v636_v25, %s10848_s12 }
 0x17d   : > { %697 = vrot.lane.b32.xlu1 %v637_v27, %s10849_s27 }
 0x17f   : > { %663 = vrot.lane.b32.xlu0 %v636_v25, %s10850_s16 }
 0x181   : > { %714 = vrot.lane.b32.xlu1 %v634_v29, %s10847_s14 }
 0x183   : > { %718 = vrot.lane.b32.xlu0 %v637_v27, %s10847_s14 }
 0x185   : > { %693 = vrot.lane.b32.xlu1 %v634_v29, %s10849_s27 }
 0x187   : > { %657 = vrot.lane.b32.xlu0 %v11152_v19, %s10850_s16 }
 0x189   : > { %672 = vrot.lane.b32.xlu1 %v634_v29, %s10846_s25 }
 0x18b   : > { %676 = vrot.lane.b32.xlu0 %v637_v27, %s10846_s25 }
 0x18d   : > { %644 = vrot.lane.b32.xlu1 %v634_v29, %s10848_s12 }
 0x18f   : > { %648 = vrot.lane.b32.xlu0 %v637_v27, %s10848_s12 }
 0x191   : > { %740 = vperm.xlu1 %9586, %v730_v31  }
 0x193   : > { %735 = vperm.xlu0 %9585, %v729_v30  }
 0x195   : > { %745 = vperm.xlu1 %9586, %v731_v33  }
 0x197   : > { %750 = vperm.xlu0 %9585, %v732_v34  }
 0x1d3   : > { %v705_v35 = vpop.permute.xlu1 %704 }
 0x1d5   : > { %v713_v36 = vpop.permute.xlu0 %712 }
 0x1d7   : > { %v684_v37 = vpop.permute.xlu1 %683 }
 0x1d9   : > { %v671_v38 = vpop.permute.xlu0 %670 }
 0x1da   : > { %v708_v58 = vsel %vm678_vm3, %v705_v35, %v671_v38 }
 0x1db   : > { %v707_v39 = vpop.permute.xlu1 %706 }
 0x1dd   : > { %v692_v40 = vpop.permute.xlu0 %691 }
 0x1df   : > { %v686_v41 = vpop.permute.xlu1 %685 }
 0x1e1   : > { %v643_v42 = vpop.permute.xlu0 %642 }
 0x1e2   : > { %v687_v0 = vsel %vm650_vm5, %v684_v37, %v643_v42 }
 0x1e3   : > { %v662_v43 = vpop.permute.xlu1 %661 }
 0x1e5   : > { %v717_v44 = vpop.permute.xlu0 %716 }
 0x1e7   : > { %v675_v45 = vpop.permute.xlu1 %674 }
 0x1e8   : > { %v709_v55 = vsel %vm678_vm3, %v707_v39, %v675_v45 }
 0x1e9   : > { %v696_v46 = vpop.permute.xlu0 %695 }
 0x1eb   : > { %v660_v47 = vpop.permute.xlu1 %659 }
 0x1ed   : > { %v647_v48 = vpop.permute.xlu0 %646 }
 0x1ee   : > { %v688_v61 = vsel %vm650_vm5, %v686_v41, %v647_v48 }
 0x1ef   : > { %v698_v49 = vpop.permute.xlu1 %697 }
 0x1f0   : > { %v701_v59 = vsel %vm699_vm4, %v696_v46, %v698_v49 }
 0x1f1   : > { %v664_v50 = vpop.permute.xlu0 %663 }
 0x1f2   : > { %v667_v2 = vsel %vm665_vm6, %v662_v43, %v664_v50 }
 0x1f3   : > { %v715_v51 = vpop.permute.xlu1 %714 }
 0x1f4   : > { %v721_v56 = vsel %vm720_vm2, %v713_v36, %v715_v51 }
 0x1f5   : > { %v719_v52 = vpop.permute.xlu0 %718 }
 0x1f6   : > { %v722_v53 = vsel %vm720_vm2, %v717_v44, %v719_v52 }
 0x1f7   : > { %782 = vmatprep.subr.mxu0 %v722_v53  ;;  %v694_v54 = vpop.permute.xlu1 %693 }
 0x1f8   : > { %783 = vmatpush1.msra.mxu0 %v709_v55  ;;  %v700_v62 = vsel %vm699_vm4, %v692_v40, %v694_v54 }
 0x1f9   : > { %v658_v57 = vpop.permute.xlu0 %657  ;;  %784 = vmatprep.subr.mxu0 %v721_v56 }
 0x1fa   : > { %785 = vmatpush1.msra.mxu0 %v708_v58  ;;  %v666_v7 = vsel %vm665_vm6, %v658_v57, %v660_v47 }
 0x1fb   : > { %786 = vmatprep.subr.mxu0 %v701_v59  ;;  %v673_v60 = vpop.permute.xlu1 %672 }
 0x1fc   : > { %787 = vmatpush1.msra.mxu0 %v688_v61  ;;  %v679_v3 = vsel %vm678_vm3, %v671_v38, %v673_v60 }
 0x1fd   : > { %v677_v63 = vpop.permute.xlu0 %676  ;;  %788 = vmatprep.subr.mxu0 %v700_v62 }
 0x1fe   : > { %789 = vmatpush1.msra.mxu0 %v687_v0  ;;  %v680_v1 = vsel %vm678_vm3, %v675_v45, %v677_v63 }
 0x1ff   : > { %790 = vmatprep.subr.mxu0 %v680_v1  ;;  %v645_v4 = vpop.permute.xlu1 %644 }
 0x200   : > { %791 = vmatpush1.msra.mxu0 %v667_v2  ;;  %v651_v9 = vsel %vm650_vm5, %v643_v42, %v645_v4 }
 0x201   : > { %v649_v6 = vpop.permute.xlu0 %648  ;;  %792 = vmatprep.subr.mxu0 %v679_v3 }
 0x202   : > { %793 = vmatpush1.msra.mxu0 %v666_v7  ;;  %v652_v8 = vsel %vm650_vm5, %v647_v48, %v649_v6 }
 0x203   : > { %794 = vmatprep.subr.mxu0 %v652_v8 }
 0x204   : > { %795 = vmatpush1.msra.mxu0 %v11158_v23  ;;  %v867_v23 = vunpack.c.l.s4 %v10853_v22 }
 0x205   : > { %796 = vmatprep.subr.mxu0 %v651_v9 }
 0x206   : > { %797 = vmatpush1.msra.mxu0 %v11152_v19  ;;  %v728_v19 = vld [vmem:[#allocation5 + $0x18] sm:$0xff]  ;;  %v868_v25 = vunpack.c.0.s8 %v867_v23 }
 0x207   : > { %8242 = vmatmul.mubr.msk.f32.vlgmr.msra.gmra.mxu0 %vm753_vm7, %v725_v10  ;;  %9452 = vmatprep.subr.mxu0 %v10845_v5 }
 0x208   : > { %836 = vmatprep.mubr.f32.mxu0 %v10845_v5  ;;  %9453 = vmatpush3.msk.msra.mxu0 %vm1210_vm8, %v1198_v11  ;;  %v11232_v30 = vsub.s32 %v868_v25, %v870_v26 }
 0x209   : > { %9454 = vmatprep.subr.mxu0 %v10845_v5 }
 0x20a   : > { %9455 = vmatpush3.msra.mxu0 %v1197_v12 }
 0x20b   : > { %8243 = vmatmul.mubr.msk.f32.gmra.mxu0 %vm753_vm7, %v726_v13  ;;  %9456 = vmatprep.subr.mxu0 %v10845_v5 }
 0x20c   : > { %842 = vmatprep.mubr.f32.mxu0 %v10845_v5  ;;  %9457 = vmatpush3.msra.mxu0 %v1196_v14  ;;  %v741_v32 = vpop.permute.xlu1 %740 }
 0x20d   : > { %9458 = vmatprep.subr.mxu0 %v10845_v5 }
 0x20e   : > { %9459 = vmatpush3.msra.mxu0 %v1195_v15  ;;  %v736_v27 = vpop.permute.xlu0 %735 }
 0x20f   : > { %8244 = vmatmul.mubr.msk.f32.gmra.mxu0 %vm753_vm7, %v727_v16  ;;  %9460 = vmatprep.subr.mxu0 %v10845_v5 }
 0x210   : > { %848 = vmatprep.mubr.f32.mxu0 %v10845_v5  ;;  %9461 = vmatpush3.msra.mxu0 %v1194_v17  ;;  %v746_v48 = vpop.permute.xlu1 %745 }
 0x211   : > { %9462 = vmatprep.subr.mxu0 %v10845_v5 }
 0x212   : > { %9463 = vmatpush3.msra.mxu0 %v1193_v18  ;;  %v11241_v8 = vpop.permute.xlu0 %750 }
 0x213   : > { %8245 = vmatmul.mubr.msk.f32.gmra.mxu0 %vm753_vm7, %v728_v19  ;;  %9464 = vmatprep.subr.mxu0 %v10845_v5 }
 0x214   : > { %9465 = vmatpush3.msra.mxu0 %v1192_v20  ;;  %9466 = vmatprep.mubr.msk.f32.mxu0 %vm10852_vm9, %v10845_v5 }
 0x217   : > { %9467 = vmatmul.mubr.msk.f32.vlgmr.msra.gmra.mxu0 %vm1206_vm10, %v1191_v21 }
 0x2c7   : > { %v832_v28 = vpop.f32.mrf.mxu0 }
 0x2c8   : > { %v833_v29 = vadd.f32 %v832_v28, %v736_v27 }
 0x2c9   : > { %v834_v31 = vpop.f32.mrf.mxu0 }
 0x2ca   : > { %v855_v33 = vmax.f32 %v833_v29, 0.0  ;;  %v835_v34 = vadd.f32 %v834_v31, %v736_v27 }
 0x2cb   : > { %v838_v35 = vpop.f32.mrf.mxu0 }
 0x2cc   : > { %863 = vst [vmem:[#allocation2] sm:$0x1] %v855_v33  ;;  %v872_v5 = vrot.slane %v855_v33, %v11232_v30  ;;  %v903_v36 = vcombine.high %v855_v33, %v855_v33  ;;  %v856_v37 = vmax.f32 %v835_v34, 0.0  ;;  %v839_v38 = vadd.f32 %v838_v35, %v741_v32 }
 0x2cd   : > { %v840_v39 = vpop.f32.mrf.mxu0 }
 0x2ce   : > { %v8246_v40 = vrot.slane %v872_v5, 9  ;;  %v889_v41 = vcombine.high %v872_v5, %v872_v5  ;;  %v910_v42 = vrot.slane %v903_v36, %v11232_v30  ;;  %8250 = vst.sshfl [vmem:[#allocation2 + $0x8] sm:$0x1 pattern:$0x76325410] %v903_v36  ;;  %v884_v43 = vrot.slane %v856_v37, %v11232_v30 }
 0x2cf   : > { %864 = vst [vmem:[#allocation2 + $0x1] sm:$0x1] %v856_v37  ;;  %v913_v44 = vcombine.high %v856_v37, %v856_v37  ;;  %v857_v45 = vmax.f32 %v839_v38, 0.0  ;;  %v841_v46 = vadd.f32 %v840_v39, %v741_v32  ;;  %v844_v47 = vpop.f32.mrf.mxu0 }
 0x2d0   : > { %876 = vst [vmem:[#allocation2 + $0x2] sm:$0x1] %v8246_v40  ;;  %891 = vst [vmem:[#allocation2 + $0x4] sm:$0x1] %v889_v41  ;;  %v8248_v49 = vrot.slane %v889_v41, 9  ;;  %v8252_v50 = vrot.slane %v910_v42, 9  ;;  %v931_v51 = vcombine.high %v910_v42, %v910_v42  ;;  %v892_v53 = vcombine.high %v884_v43, %v884_v43 }
 0x2d1   : > { %v8247_v52 = vrot.slane %v884_v43, 9  ;;  %v920_v54 = vrot.slane %v913_v44, %v11232_v30  ;;  %8251 = vst.sshfl [vmem:[#allocation2 + $0x9] sm:$0x1 pattern:$0x76325410] %v913_v44  ;;  %v954_v55 = vrot.slane %v857_v45, %v11232_v30  ;;  %v985_v56 = vcombine.high %v857_v45, %v857_v45  ;;  %v846_v57 = vpop.f32.mrf.mxu0 }
 0x2d2   : > { %945 = vst [vmem:[#allocation2 + $0x10] sm:$0x1] %v857_v45  ;;  %898 = vst [vmem:[#allocation2 + $0x6] sm:$0x1] %v8248_v49  ;;  %v8254_v58 = vrot.slane %v931_v51, 9  ;;  %v858_v59 = vmax.f32 %v841_v46, 0.0  ;;  %v845_v60 = vadd.f32 %v844_v47, %v746_v48  ;;  %v847_v61 = vadd.f32 %v846_v57, %v746_v48 }
 0x2d3   : > { %926 = vst [vmem:[#allocation2 + $0xa] sm:$0x1] %v8252_v50  ;;  %933 = vst [vmem:[#allocation2 + $0xc] sm:$0x1] %v931_v51  ;;  %v8249_v62 = vrot.slane %v892_v53, 9  ;;  %v8253_v63 = vrot.slane %v920_v54, 9  ;;  %v934_v0 = vcombine.high %v920_v54, %v920_v54  ;;  %v850_v2 = vpop.f32.mrf.mxu0  ;;  %v971_v3 = vcombine.high %v954_v55, %v954_v55 }
 0x2d4   : > { %888 = vst [vmem:[#allocation2 + $0x3] sm:$0x1] %v8247_v52  ;;  %894 = vst [vmem:[#allocation2 + $0x5] sm:$0x1] %v892_v53  ;;  %v8256_v1 = vrot.slane %v954_v55, 9  ;;  %v992_v4 = vrot.slane %v985_v56, %v11232_v30  ;;  %v966_v6 = vrot.slane %v858_v59, %v11232_v30  ;;  %v995_v7 = vcombine.high %v858_v59, %v858_v59 }
 0x2d5   : > { %8260 = vst.sshfl [vmem:[#allocation2 + $0x18] sm:$0x1 pattern:$0x76325410] %v985_v56  ;;  %940 = vst [vmem:[#allocation2 + $0xe] sm:$0x1] %v8254_v58  ;;  %v851_v12 = vadd.f32 %v850_v2, %v11241_v8  ;;  %v11244_v13 = vpop.f32.mrf.mxu0 }
 0x2d6   : > { %946 = vst [vmem:[#allocation2 + $0x11] sm:$0x1] %v858_v59  ;;  %902 = vst [vmem:[#allocation2 + $0x7] sm:$0x1] %v8249_v62  ;;  %v8255_v9 = vrot.slane %v934_v0, 9  ;;  %v859_v10 = vmax.f32 %v845_v60, 0.0  ;;  %v1013_v16 = vcombine.high %v992_v4, %v992_v4  ;;  %v974_v18 = vcombine.high %v966_v6, %v966_v6 }
 0x2d7   : > { %930 = vst [vmem:[#allocation2 + $0xb] sm:$0x1] %v8253_v63  ;;  %936 = vst [vmem:[#allocation2 + $0xd] sm:$0x1] %v934_v0  ;;  %v860_v11 = vmax.f32 %v847_v61, 0.0  ;;  %v8258_v14 = vrot.slane %v971_v3, 9  ;;  %v1002_v19 = vrot.slane %v995_v7, %v11232_v30  ;;  %v1280_v22 = vpop.f32.mrf.mxu0  ;;  %v853_v51 = vadd.f32 %v11244_v13, %v11241_v8 }
 0x2d8   : > { %958 = vst [vmem:[#allocation2 + $0x12] sm:$0x1] %v8256_v1  ;;  %973 = vst [vmem:[#allocation2 + $0x14] sm:$0x1] %v971_v3  ;;  %v8262_v15 = vrot.slane %v992_v4, 9  ;;  %v8257_v17 = vrot.slane %v966_v6, 9  ;;  %v1036_v20 = vrot.slane %v859_v10, %v11232_v30  ;;  %v1067_v21 = vcombine.high %v859_v10, %v859_v10 }
 0x2d9   : > { %8261 = vst.sshfl [vmem:[#allocation2 + $0x19] sm:$0x1 pattern:$0x76325410] %v995_v7  ;;  %944 = vst [vmem:[#allocation2 + $0xf] sm:$0x1] %v8255_v9  ;;  %v1048_v24 = vrot.slane %v860_v11, %v11232_v30  ;;  %v1077_v25 = vcombine.high %v860_v11, %v860_v11  ;;  %v1016_v29 = vcombine.high %v1002_v19, %v1002_v19  ;;  %v9468_v32 = vpop.f32.mrf.mxu0 }
 0x2da   : > { %1027 = vst [vmem:[#allocation2 + $0x20] sm:$0x1] %v859_v10  ;;  %1028 = vst [vmem:[#allocation2 + $0x21] sm:$0x1] %v860_v11  ;;  %v8264_v23 = vrot.slane %v1013_v16, 9  ;;  %v861_v26 = vmax.f32 %v851_v12, 0.0  ;;  %v1053_v33 = vcombine.high %v1036_v20, %v1036_v20  ;;  %v1074_v34 = vrot.slane %v1067_v21, %v11232_v30 }
 0x2db   : > { %980 = vst [vmem:[#allocation2 + $0x16] sm:$0x1] %v8258_v14  ;;  %1008 = vst [vmem:[#allocation2 + $0x1a] sm:$0x1] %v8262_v15  ;;  %v8259_v27 = vrot.slane %v974_v18, 9  ;;  %v8263_v28 = vrot.slane %v1002_v19, 9  ;;  %v1056_v5 = vcombine.high %v1048_v24, %v1048_v24  ;;  %v1084_v37 = vrot.slane %v1077_v25, %v11232_v30 }
 0x2dc   : > { %1015 = vst [vmem:[#allocation2 + $0x1c] sm:$0x1] %v1013_v16  ;;  %970 = vst [vmem:[#allocation2 + $0x13] sm:$0x1] %v8257_v17  ;;  %v8266_v31 = vrot.slane %v1036_v20, 9  ;;  %v8267_v35 = vrot.slane %v1048_v24, 9  ;;  %v1118_v38 = vrot.slane %v861_v26, %v11232_v30  ;;  %v1149_v39 = vcombine.high %v861_v26, %v861_v26 }
 0x2dd   : > { %976 = vst [vmem:[#allocation2 + $0x15] sm:$0x1] %v974_v18  ;;  %8270 = vst.sshfl [vmem:[#allocation2 + $0x28] sm:$0x1 pattern:$0x76325410] %v1067_v21  ;;  %v1095_v43 = vcombine.high %v1074_v34, %v1074_v34  ;;  %v1098_v46 = vcombine.high %v1084_v37, %v1084_v37 }
 0x2de   : > { %1022 = vst [vmem:[#allocation2 + $0x1e] sm:$0x1] %v8264_v23  ;;  %8271 = vst.sshfl [vmem:[#allocation2 + $0x29] sm:$0x1 pattern:$0x76325410] %v1077_v25  ;;  %v1135_v48 = vcombine.high %v1118_v38, %v1118_v38  ;;  %v1156_v50 = vrot.slane %v1149_v39, %v11232_v30 }
 0x2df   : > { %1109 = vst [vmem:[#allocation2 + $0x30] sm:$0x1] %v861_v26  ;;  %984 = vst [vmem:[#allocation2 + $0x17] sm:$0x1] %v8259_v27  ;;  %v8265_v36 = vrot.slane %v1016_v29, 9  ;;  %v8268_v41 = vrot.slane %v1053_v33, 9 }
 0x2e0   : > { %1012 = vst [vmem:[#allocation2 + $0x1b] sm:$0x1] %v8263_v28  ;;  %1018 = vst [vmem:[#allocation2 + $0x1d] sm:$0x1] %v1016_v29  ;;  %v8286_v40 = vld [vmem:[#allocation8] ss:$0 sm:$0xff]  ;;  %v1177_v56 = vcombine.high %v1156_v50, %v1156_v50 }
 0x2e1   : > { %1040 = vst [vmem:[#allocation2 + $0x22] sm:$0x1] %v8266_v31  ;;  %1055 = vst [vmem:[#allocation2 + $0x24] sm:$0x1] %v1053_v33  ;;  %v8272_v42 = vrot.slane %v1074_v34, 9  ;;  %v8269_v44 = vrot.slane %v1056_v5, 9  ;;  %v1281_v52 = vadd.f32 %v8286_v40, %v1280_v22 }
 0x2e2   : > { %1052 = vst [vmem:[#allocation2 + $0x23] sm:$0x1] %v8267_v35  ;;  %1058 = vst [vmem:[#allocation2 + $0x25] sm:$0x1] %v1056_v5  ;;  %v8273_v45 = vrot.slane %v1084_v37, 9  ;;  %v8276_v47 = vrot.slane %v1118_v38, 9 }
 0x2e3   : > { %1026 = vst [vmem:[#allocation2 + $0x1f] sm:$0x1] %v8265_v36  ;;  %8280 = vst.sshfl [vmem:[#allocation2 + $0x38] sm:$0x1 pattern:$0x76325410] %v1149_v39 }
 0x2e4   : > { %1062 = vst [vmem:[#allocation2 + $0x26] sm:$0x1] %v8268_v41  ;;  %1090 = vst [vmem:[#allocation2 + $0x2a] sm:$0x1] %v8272_v42  ;;  %v8274_v49 = vrot.slane %v1095_v43, 9  ;;  %v8275_v53 = vrot.slane %v1098_v46, 9 }
 0x2e5   : > { %1097 = vst [vmem:[#allocation2 + $0x2c] sm:$0x1] %v1095_v43  ;;  %1066 = vst [vmem:[#allocation2 + $0x27] sm:$0x1] %v8269_v44  ;;  %v8278_v54 = vrot.slane %v1135_v48, 9  ;;  %v8282_v55 = vrot.slane %v1156_v50, 9 }
 0x2e6   : > { %1094 = vst [vmem:[#allocation2 + $0x2b] sm:$0x1] %v8273_v45  ;;  %1100 = vst [vmem:[#allocation2 + $0x2d] sm:$0x1] %v1098_v46  ;;  %v862_v57 = vmax.f32 %v853_v51, 0.0  ;;  %v1284_v58 = vmax.f32 %v1281_v52, 0.0 }
 0x2e7   : > { %1122 = vst [vmem:[#allocation2 + $0x32] sm:$0x1] %v8276_v47  ;;  %1137 = vst [vmem:[#allocation2 + $0x34] sm:$0x1] %v1135_v48  ;;  %v8284_v59 = vrot.slane %v1177_v56, 9 }
 0x2e8   : > { %1104 = vst [vmem:[#allocation2 + $0x2e] sm:$0x1] %v8274_v49  ;;  %1108 = vst [vmem:[#allocation2 + $0x2f] sm:$0x1] %v8275_v53  ;;  %v1130_v60 = vrot.slane %v862_v57, %v11232_v30  ;;  %v1159_v61 = vcombine.high %v862_v57, %v862_v57 }
 0x2e9   : > { %1144 = vst [vmem:[#allocation2 + $0x36] sm:$0x1] %v8278_v54  ;;  %1172 = vst [vmem:[#allocation2 + $0x3a] sm:$0x1] %v8282_v55 }
 0x2ea   : > { %1179 = vst [vmem:[#allocation2 + $0x3c] sm:$0x1] %v1177_v56  ;;  %1110 = vst [vmem:[#allocation2 + $0x31] sm:$0x1] %v862_v57  ;;  %v8277_v62 = vrot.slane %v1130_v60, 9  ;;  %v1138_v63 = vcombine.high %v1130_v60, %v1130_v60  ;;  %v1166_v0 = vrot.slane %v1159_v61, %v11232_v30 }
 0x2eb   : > { %1286 = vst.msk [vmem:[#allocation2 + $0x40] sm:$0x3] %vm1285_vm11, %v1284_v58  ;;  %1186 = vst [vmem:[#allocation2 + $0x3e] sm:$0x1] %v8284_v59 }
 0x2ec   : > { %8281 = vst.sshfl [vmem:[#allocation2 + $0x39] sm:$0x1 pattern:$0x76325410] %v1159_v61  ;;  %1134 = vst [vmem:[#allocation2 + $0x33] sm:$0x1] %v8277_v62  ;;  %v1180_v3 = vcombine.high %v1166_v0, %v1166_v0 }
 0x2ed   : > { %1140 = vst [vmem:[#allocation2 + $0x35] sm:$0x1] %v1138_v63  ;;  %v8279_v1 = vrot.slane %v1138_v63, 9  ;;  %v8283_v2 = vrot.slane %v1166_v0, 9 }
 0x2ee   : > { %1182 = vst [vmem:[#allocation2 + $0x3d] sm:$0x1] %v1180_v3  ;;  %v8285_v4 = vrot.slane %v1180_v3, 9 }
 0x2ef   : > { %1148 = vst [vmem:[#allocation2 + $0x37] sm:$0x1] %v8279_v1  ;;  %1176 = vst [vmem:[#allocation2 + $0x3b] sm:$0x1] %v8283_v2 }
 0x2f0   : > { %1190 = vst [vmem:[#allocation2 + $0x3f] sm:$0x1] %v8285_v4 }
 0x2f1 PF: > { %v9587_v30 = vld [vmem:[%s11079_s17 + $0xac] ss:$12 sps:$4 sm:$0xff]   ;;  %v9591_v7 = vld [vmem:[%s11079_s17 + $0xa8] ss:$12 sps:$4 sm:$0xff]   ;;  %v9597_v11 = vld [vmem:[%s11079_s17 + $0x90] ss:$12 sps:$4 sm:$0xff]   ;;  %v1309_v43 = vlaneseq }
 0x2f2   : > { %v9589_v6 = vld [vmem:[%s11079_s17 + $0x22c] ss:$12 sps:$4 sm:$0xff]   ;;  %6695 = vmatprep.subr.bf16.mxu0 %v9587_v30  ;;  %v9592_v8 = vld [vmem:[%s11079_s17 + $0x228] ss:$12 sps:$4 sm:$0xff]   ;;  %v9598_v12 = vld [vmem:[%s11079_s17 + $0x210] ss:$12 sps:$4 sm:$0xff]  }
 0x2f3   : > { %6736 = vmatprep.subr.bf16.mxu1 %v9589_v6  ;;  %v9593_v9 = vld [vmem:[%s11079_s17 + $0x94] ss:$12 sps:$4 sm:$0xff]   ;;  %6696 = vmatpush1.bf16.msra.mxu0 %v9591_v7  ;;  %v9599_v13 = vld [vmem:[%s11079_s17 + $0x7c] ss:$12 sps:$4 sm:$0xff]   ;;  %v9603_v15 = vld [vmem:[%s11079_s17 + $0x78] ss:$12 sps:$4 sm:$0xff]  }
 0x2f4   : > { %6737 = vmatpush1.bf16.msra.mxu1 %v9592_v8  ;;  %v9595_v10 = vld [vmem:[%s11079_s17 + $0x214] ss:$12 sps:$4 sm:$0xff]   ;;  %6697 = vmatprep.subr.bf16.mxu0 %v9593_v9  ;;  %v9601_v14 = vld [vmem:[%s11079_s17 + $0x1fc] ss:$12 sps:$4 sm:$0xff]   ;;  %v9604_v16 = vld [vmem:[%s11079_s17 + $0x1f8] ss:$12 sps:$4 sm:$0xff]  }
 0x2f5   : > { %6738 = vmatprep.subr.bf16.mxu1 %v9595_v10  ;;  %v9605_v17 = vld [vmem:[%s11079_s17 + $0x64] ss:$12 sps:$4 sm:$0xff]   ;;  %v9609_v19 = vld [vmem:[%s11079_s17 + $0x60] ss:$12 sps:$4 sm:$0xff]   ;;  %v9615_v23 = vld [vmem:[%s11079_s17 + $0x48] ss:$12 sps:$4 sm:$0xff]  }
 0x2f6   : > { %v9607_v18 = vld [vmem:[%s11079_s17 + $0x1e4] ss:$12 sps:$4 sm:$0xff]   ;;  %v9610_v20 = vld [vmem:[%s11079_s17 + $0x1e0] ss:$12 sps:$4 sm:$0xff]   ;;  %v9616_v24 = vld [vmem:[%s11079_s17 + $0x1c8] ss:$12 sps:$4 sm:$0xff]  }
 0x2f7   : > { %6698 = vmatpush1.bf16.msra.mxu0 %v9597_v11  ;;  %v9611_v21 = vld [vmem:[%s11079_s17 + $0x4c] ss:$12 sps:$4 sm:$0xff]   ;;  %v9617_v25 = vld [vmem:[%s11079_s17 + $0x34] ss:$12 sps:$4 sm:$0xff]   ;;  %v9621_v27 = vld [vmem:[%s11079_s17 + $0x30] ss:$12 sps:$4 sm:$0xff]  }
 0x2f8   : > { %6739 = vmatpush1.bf16.msra.mxu1 %v9598_v12  ;;  %6699 = vmatprep.subr.bf16.mxu0 %v9599_v13  ;;  %v9613_v22 = vld [vmem:[%s11079_s17 + $0x1cc] ss:$12 sps:$4 sm:$0xff]   ;;  %v9619_v26 = vld [vmem:[%s11079_s17 + $0x1b4] ss:$12 sps:$4 sm:$0xff]   ;;  %v9622_v28 = vld [vmem:[%s11079_s17 + $0x1b0] ss:$12 sps:$4 sm:$0xff]  }
 0x2f9   : > { %6740 = vmatprep.subr.bf16.mxu1 %v9601_v14  ;;  %v9623_v29 = vld [vmem:[%s11079_s17 + $0x1c] ss:$12 sps:$4 sm:$0xff]   ;;  %v9627_v32 = vld [vmem:[%s11079_s17 + $0x18] ss:$12 sps:$4 sm:$0xff]   ;;  %v9633_v5 = vld [vmem:[%s11079_s17] ss:$12 sps:$4 sm:$0xff]  }
 0x2fa   : > { %v9625_v31 = vld [vmem:[%s11079_s17 + $0x19c] ss:$12 sps:$4 sm:$0xff]   ;;  %v9628_v33 = vld [vmem:[%s11079_s17 + $0x198] ss:$12 sps:$4 sm:$0xff]   ;;  %v9634_v36 = vld [vmem:[%s11079_s17 + $0x180] ss:$12 sps:$4 sm:$0xff]  }
 0x2fb   : > { %6700 = vmatpush1.bf16.msra.mxu0 %v9603_v15  ;;  %v9629_v34 = vld [vmem:[%s11079_s17 + $0x4] ss:$12 sps:$4 sm:$0xff]   ;;  %v9635_v37 = vld [vmem:[%s11079_s17 + $0x16c] ss:$12 sps:$4 sm:$0xff]   ;;  %v9639_v39 = vld [vmem:[%s11079_s17 + $0x168] ss:$12 sps:$4 sm:$0xff]  }
 0x2fc   : > { %6741 = vmatpush1.bf16.msra.mxu1 %v9604_v16  ;;  %6701 = vmatprep.subr.bf16.mxu0 %v9605_v17  ;;  %v9631_v35 = vld [vmem:[%s11079_s17 + $0x184] ss:$12 sps:$4 sm:$0xff]   ;;  %v9637_v38 = vld [vmem:[%s11079_s17 + $0x2ec] ss:$12 sps:$4 sm:$0xff]   ;;  %v9640_v40 = vld [vmem:[%s11079_s17 + $0x2e8] ss:$12 sps:$4 sm:$0xff]  }
 0x2fd   : > { %6742 = vmatprep.subr.bf16.mxu1 %v9607_v18  ;;  %v10854_v41 = vmov 1983009808   ;;  %v9641_v44 = vld [vmem:[%s11079_s17 + $0x154] ss:$12 sps:$4 sm:$0xff]   ;;  %v9645_v46 = vld [vmem:[%s11079_s17 + $0x150] ss:$12 sps:$4 sm:$0xff]  }
 0x2fe   : > { %v1307_v42 = vunpack.c.l.s4 %v10854_v41  ;;  %v9643_v45 = vld [vmem:[%s11079_s17 + $0x2d4] ss:$12 sps:$4 sm:$0xff]   ;;  %v11296_v48 = vshrl.u32 %v1309_v43, 7  ;;  %v9646_v49 = vld [vmem:[%s11079_s17 + $0x2d0] ss:$12 sps:$4 sm:$0xff]   ;;  %vm6685_vm12 = vcmask 1043456  }
 0x2ff   : > { %6702 = vmatpush1.bf16.msra.mxu0 %v9609_v19  ;;  %v9647_v50 = vld [vmem:[%s11079_s17 + $0x13c] ss:$12 sps:$4 sm:$0xff]   ;;  %v9651_v52 = vld [vmem:[%s11079_s17 + $0x138] ss:$12 sps:$4 sm:$0xff]   ;;  %v9657_v58 = vld [vmem:[%s11079_s17 + $0x120] ss:$12 sps:$4 sm:$0xff]  }
 0x300   : > { %6743 = vmatpush1.bf16.msra.mxu1 %v9610_v20  ;;  %6703 = vmatprep.subr.bf16.mxu0 %v9611_v21  ;;  %v1308_v47 = vunpack.c.0.s8 %v1307_v42  ;;  %v9649_v51 = vld [vmem:[%s11079_s17 + $0x2bc] ss:$12 sps:$4 sm:$0xff]   ;;  %v9652_v53 = vld [vmem:[%s11079_s17 + $0x2b8] ss:$12 sps:$4 sm:$0xff]   ;;  %v9658_v61 = vld [vmem:[%s11079_s17 + $0x2a0] ss:$12 sps:$4 sm:$0xff]  }
 0x301   : > { %6744 = vmatprep.subr.bf16.mxu1 %v9613_v22  ;;  %v9653_v55 = vld [vmem:[%s11079_s17 + $0x124] ss:$12 sps:$4 sm:$0xff]   ;;  %v9659_v62 = vld [vmem:[%s11079_s17 + $0x10c] ss:$12 sps:$4 sm:$0xff]   ;;  %v9663_v2 = vld [vmem:[%s11079_s17 + $0x108] ss:$12 sps:$4 sm:$0xff]  }
 0x302   : > { %v11304_v54 = vsub.s32 %v1308_v47, %v11296_v48  ;;  %v9655_v56 = vld [vmem:[%s11079_s17 + $0x2a4] ss:$12 sps:$4 sm:$0xff]   ;;  %v9661_v63 = vld [vmem:[%s11079_s17 + $0x28c] ss:$12 sps:$4 sm:$0xff]   ;;  %v9664_v30 = vld [vmem:[%s11079_s17 + $0x288] ss:$12 sps:$4 sm:$0xff]  }
 0x303   : > { %6704 = vmatpush1.bf16.msra.mxu0 %v9615_v23  ;;  %v1287_v57 = vld [vmem:[#allocation2] sm:$0xff]  ;;  %v9665_v6 = vld [vmem:[%s11079_s17 + $0xf4] ss:$12 sps:$4 sm:$0xff]   ;;  %vm6681_vm13 = vcmask 195584   ;;  %vm10857_vm14 = vmmov 0  }
 0x304   : > { %6745 = vmatpush1.bf16.msra.mxu1 %v9616_v24  ;;  %6705 = vmatprep.subr.bf16.mxu0 %v9617_v25  ;;  %v1312_v59 = vrot.slane %v1287_v57, %v11304_v54  ;;  %v1305_v60 = vcombine.high %v1287_v57, %v1287_v57  ;;  %v9667_v7 = vld [vmem:[%s11079_s17 + $0x274] ss:$12 sps:$4 sm:$0xff]   ;;  %v9669_v9 = vld [vmem:[%s11079_s17 + $0xf0] ss:$12 sps:$4 sm:$0xff]   ;;  %v9675_v13 = vld [vmem:[%s11079_s17 + $0xd8] ss:$12 sps:$4 sm:$0xff]  }
 0x305   : > { %6746 = vmatprep.subr.bf16.mxu1 %v9619_v26  ;;  %v9670_v10 = vld [vmem:[%s11079_s17 + $0x270] ss:$12 sps:$4 sm:$0xff]   ;;  %v9676_v14 = vld [vmem:[%s11079_s17 + $0x258] ss:$12 sps:$4 sm:$0xff]   ;;  %v9681_v17 = vld [vmem:[%s11079_s17 + $0xc0] ss:$12 sps:$4 sm:$0xff]  }
 0x306   : > { %v1320_v0 = vcombine.high %v1312_v59, %v1312_v59  ;;  %v1319_v1 = vrot.slane %v1305_v60, %v11304_v54  ;;  %v9671_v11 = vld [vmem:[%s11079_s17 + $0xdc] ss:$12 sps:$4 sm:$0xff]   ;;  %v9677_v15 = vld [vmem:[%s11079_s17 + $0xc4] ss:$12 sps:$4 sm:$0xff]   ;;  %v9682_v18 = vld [vmem:[%s11079_s17 + $0x240] ss:$12 sps:$4 sm:$0xff]   ;;  %v11336_v21 = vpack.c.bf16 %v1312_v59, %v1312_v59 }
 0x307   : > { %6706 = vmatpush1.bf16.msra.mxu0 %v9621_v27  ;;  %v9673_v12 = vld [vmem:[%s11079_s17 + $0x25c] ss:$12 sps:$4 sm:$0xff]   ;;  %v9679_v16 = vld [vmem:[%s11079_s17 + $0x244] ss:$12 sps:$4 sm:$0xff]   ;;  %v9686_v19 = vld [vmem:[%s11079_s17 + $0x3ac] ss:$12 sps:$4 sm:$0xff]  }
 0x308   : > { %6747 = vmatpush1.bf16.msra.mxu1 %v9622_v28  ;;  %6707 = vmatprep.subr.bf16.mxu0 %v9623_v29  ;;  %v11315_v3 = vpack.c.bf16 %v1320_v0, %v1320_v0  ;;  %v1321_v4 = vcombine.high %v1319_v1, %v1319_v1  ;;  %v9689_v20 = vld [vmem:[%s11079_s17 + $0x52c] ss:$12 sps:$4 sm:$0xff]   ;;  %v11338_v22 = vpack.c.bf16 %v1319_v1, %v1319_v1  ;;  %v9684_v23 = vld [vmem:[%s11079_s17 + $0x3a8] ss:$12 sps:$4 sm:$0xff]   ;;  %v9690_v27 = vld [vmem:[%s11079_s17 + $0x390] ss:$12 sps:$4 sm:$0xff]  }
 0x309   : > { %6748 = vmatprep.subr.bf16.mxu1 %v9625_v31  ;;  %v9687_v24 = vld [vmem:[%s11079_s17 + $0x528] ss:$12 sps:$4 sm:$0xff]   ;;  %v9693_v28 = vld [vmem:[%s11079_s17 + $0x510] ss:$12 sps:$4 sm:$0xff]   ;;  %v9726_v60 = vld [vmem:[%s11079_s17 + $0x300] ss:$12 sps:$4 sm:$0xff]  }
 0x30a   : > { %v11320_v8 = vpack.c.bf16 %v1321_v4, %v1321_v4  ;;  %6727 = vmatprep.mubr.bf16.mxu0 %v11315_v3  ;;  %v9692_v25 = vld [vmem:[%s11079_s17 + $0x394] ss:$12 sps:$4 sm:$0xff]   ;;  %v9698_v29 = vld [vmem:[%s11079_s17 + $0x37c] ss:$12 sps:$4 sm:$0xff]   ;;  %v9731_v57 = vld [vmem:[%s11079_s17 + $0x484] ss:$12 sps:$4 sm:$0xff]  }
 0x30b   : > { %6708 = vmatpush1.bf16.msra.mxu0 %v9627_v32  ;;  %v9695_v26 = vld [vmem:[%s11079_s17 + $0x514] ss:$12 sps:$4 sm:$0xff]   ;;  %v9701_v31 = vld [vmem:[%s11079_s17 + $0x4fc] ss:$12 sps:$4 sm:$0xff]   ;;  %v9696_v32 = vld [vmem:[%s11079_s17 + $0x378] ss:$12 sps:$4 sm:$0xff]  }
 0x30c   : > { %6749 = vmatpush1.bf16.msra.mxu1 %v9628_v33  ;;  %6709 = vmatprep.subr.bf16.mxu0 %v9629_v34  ;;  %v9699_v33 = vld [vmem:[%s11079_s17 + $0x4f8] ss:$12 sps:$4 sm:$0xff]   ;;  %v9716_v41 = vld [vmem:[%s11079_s17 + $0x334] ss:$12 sps:$4 sm:$0xff]   ;;  %v9714_v43 = vld [vmem:[%s11079_s17 + $0x330] ss:$12 sps:$4 sm:$0xff]  }
 0x30d   : > { %6750 = vmatprep.subr.bf16.mxu1 %v9631_v35  ;;  %6768 = vmatprep.mubr.bf16.mxu1 %v11320_v8  ;;  %v9704_v34 = vld [vmem:[%s11079_s17 + $0x364] ss:$12 sps:$4 sm:$0xff]   ;;  %v9719_v42 = vld [vmem:[%s11079_s17 + $0x4b4] ss:$12 sps:$4 sm:$0xff]   ;;  %v9737_v0 = vld [vmem:[%s11079_s17 + $0x5ec] ss:$12 sps:$4 sm:$0xff]  }
 0x30e   : > { %v9707_v35 = vld [vmem:[%s11079_s17 + $0x4e4] ss:$12 sps:$4 sm:$0xff]   ;;  %v9732_v1 = vld [vmem:[%s11079_s17 + $0x468] ss:$12 sps:$4 sm:$0xff]  }
 0x30f   : > { %6710 = vmatpush1.bf16.msra.mxu0 %v9633_v5  ;;  %v9702_v5 = vld [vmem:[%s11079_s17 + $0x360] ss:$12 sps:$4 sm:$0xff]  }
 0x310   : > { %6751 = vmatpush1.bf16.msra.mxu1 %v9634_v36  ;;  %6711 = vmatprep.subr.bf16.mxu0 %v9635_v37  ;;  %v9705_v36 = vld [vmem:[%s11079_s17 + $0x4e0] ss:$12 sps:$4 sm:$0xff]  }
 0x311   : > { %6752 = vmatprep.subr.bf16.mxu1 %v9637_v38  ;;  %v9710_v37 = vld [vmem:[%s11079_s17 + $0x34c] ss:$12 sps:$4 sm:$0xff]   ;;  %v9740_v4 = vld [vmem:[%s11079_s17 + $0x454] ss:$12 sps:$4 sm:$0xff]  }
 0x312   : > { %v9713_v38 = vld [vmem:[%s11079_s17 + $0x4cc] ss:$12 sps:$4 sm:$0xff]  }
 0x313   : > { %6712 = vmatpush2.bf16.msra.mxu0 %v9639_v39  ;;  %v9708_v39 = vld [vmem:[%s11079_s17 + $0x348] ss:$12 sps:$4 sm:$0xff]  }
 0x314   : > { %6753 = vmatpush2.bf16.msra.mxu1 %v9640_v40  ;;  %6713 = vmatprep.subr.bf16.mxu0 %v9641_v44  ;;  %v9711_v40 = vld [vmem:[%s11079_s17 + $0x4c8] ss:$12 sps:$4 sm:$0xff]   ;;  %v9717_v44 = vld [vmem:[%s11079_s17 + $0x4b0] ss:$12 sps:$4 sm:$0xff]  }
 0x315   : > { %6754 = vmatprep.subr.bf16.mxu1 %v9643_v45  ;;  %v9722_v45 = vld [vmem:[%s11079_s17 + $0x31c] ss:$12 sps:$4 sm:$0xff]   ;;  %v1288_v47 = vld [vmem:[#allocation2 + $0x8] sm:$0xff] }
 0x317   : > { %6714 = vmatpush2.bf16.msra.mxu0 %v9645_v46  ;;  %v9725_v46 = vld [vmem:[%s11079_s17 + $0x49c] ss:$12 sps:$4 sm:$0xff]  }
 0x318   : > { %6755 = vmatpush2.bf16.msra.mxu1 %v9646_v49  ;;  %6715 = vmatprep.subr.bf16.mxu0 %v9647_v50  ;;  %v11367_v49 = vrot.slane %v1288_v47, %v11304_v54  ;;  %v1322_v50 = vcombine.high %v1288_v47, %v1288_v47 }
 0x319   : > { %6756 = vmatprep.subr.bf16.mxu1 %v9649_v51  ;;  %v9720_v51 = vld [vmem:[%s11079_s17 + $0x318] ss:$12 sps:$4 sm:$0xff]  }
 0x31b   : > { %6716 = vmatpush2.bf16.msra.mxu0 %v9651_v52  ;;  %v9723_v52 = vld [vmem:[%s11079_s17 + $0x498] ss:$12 sps:$4 sm:$0xff]  }
 0x31c   : > { %6757 = vmatpush2.bf16.msra.mxu1 %v9652_v53  ;;  %6717 = vmatprep.subr.bf16.mxu0 %v9653_v55  ;;  %v1337_v53 = vcombine.high %v11367_v49, %v11367_v49  ;;  %v11374_v55 = vrot.slane %v1322_v50, %v11304_v54  ;;  %v9790_v50 = vld [vmem:[%s11079_s17 + $0x810] ss:$12 sps:$4 sm:$0xff]  }
 0x31d   : > { %6758 = vmatprep.subr.bf16.mxu1 %v9655_v56  ;;  %v9728_v56 = vld [vmem:[%s11079_s17 + $0x304] ss:$12 sps:$4 sm:$0xff]  }
 0x31e   : > { %v1338_v59 = vcombine.high %v11374_v55, %v11374_v55 }
 0x31f   : > { %6718 = vmatpush2.bf16.msra.mxu0 %v9657_v58  ;;  %v11378_v58 = vpack.c.bf16 %v1337_v53, %v1337_v53 }
 0x320   : > { %6759 = vmatpush2.bf16.msra.mxu1 %v9658_v61  ;;  %6719 = vmatprep.subr.bf16.mxu0 %v9659_v62  ;;  %v9729_v61 = vld [vmem:[%s11079_s17 + $0x480] ss:$12 sps:$4 sm:$0xff]   ;;  %v11384_v62 = vpack.c.bf16 %v1338_v59, %v1338_v59  ;;  %v9796_v59 = vld [vmem:[%s11079_s17 + $0x7f8] ss:$12 sps:$4 sm:$0xff]  }
 0x321   : > { %6760 = vmatprep.subr.bf16.mxu1 %v9661_v63  ;;  %v9734_v63 = vld [vmem:[%s11079_s17 + $0x46c] ss:$12 sps:$4 sm:$0xff]  }
 0x323   : > { %6720 = vmatpush2.bf16.msra.mxu0 %v9663_v2  ;;  %v9735_v2 = vld [vmem:[%s11079_s17 + $0x5e8] ss:$12 sps:$4 sm:$0xff]  }
 0x324   : > { %6761 = vmatpush2.bf16.msra.mxu1 %v9664_v30  ;;  %6721 = vmatprep.subr.bf16.mxu0 %v9665_v6  ;;  %v9743_v30 = vld [vmem:[%s11079_s17 + $0x5d4] ss:$12 sps:$4 sm:$0xff]   ;;  %v9738_v6 = vld [vmem:[%s11079_s17 + $0x450] ss:$12 sps:$4 sm:$0xff]  }
 0x325   : > { %6762 = vmatprep.subr.bf16.mxu1 %v9667_v7  ;;  %v9741_v7 = vld [vmem:[%s11079_s17 + $0x5d0] ss:$12 sps:$4 sm:$0xff]  }
 0x327   : > { %6722 = vmatpush2.bf16.msra.mxu0 %v9669_v9  ;;  %v9746_v9 = vld [vmem:[%s11079_s17 + $0x43c] ss:$12 sps:$4 sm:$0xff]  }
 0x328   : > { %6763 = vmatpush2.bf16.msra.mxu1 %v9670_v10  ;;  %6723 = vmatprep.subr.bf16.mxu0 %v9671_v11  ;;  %v9749_v10 = vld [vmem:[%s11079_s17 + $0x5bc] ss:$12 sps:$4 sm:$0xff]   ;;  %v9744_v11 = vld [vmem:[%s11079_s17 + $0x438] ss:$12 sps:$4 sm:$0xff]  }
 0x329   : > { %6764 = vmatprep.subr.bf16.mxu1 %v9673_v12  ;;  %v9747_v12 = vld [vmem:[%s11079_s17 + $0x5b8] ss:$12 sps:$4 sm:$0xff]  }
 0x32b   : > { %6724 = vmatpush2.bf16.msra.mxu0 %v9675_v13  ;;  %v9752_v13 = vld [vmem:[%s11079_s17 + $0x424] ss:$12 sps:$4 sm:$0xff]  }
 0x32c   : > { %6765 = vmatpush2.bf16.msra.mxu1 %v9676_v14  ;;  %6725 = vmatprep.subr.bf16.mxu0 %v9677_v15  ;;  %v9755_v14 = vld [vmem:[%s11079_s17 + $0x5a4] ss:$12 sps:$4 sm:$0xff]   ;;  %v9750_v15 = vld [vmem:[%s11079_s17 + $0x420] ss:$12 sps:$4 sm:$0xff]  }
 0x32d   : > { %6766 = vmatprep.subr.bf16.mxu1 %v9679_v16  ;;  %v9753_v16 = vld [vmem:[%s11079_s17 + $0x5a0] ss:$12 sps:$4 sm:$0xff]  }
 0x32f   : > { %6726 = vmatpush2.bf16.msra.mxu0 %v9681_v17  ;;  %v9758_v17 = vld [vmem:[%s11079_s17 + $0x40c] ss:$12 sps:$4 sm:$0xff]  }
 0x330   : > { %6767 = vmatpush2.bf16.msra.mxu1 %v9682_v18  ;;  %6777 = vmatprep.subr.bf16.mxu0 %v9686_v19  ;;  %v9761_v18 = vld [vmem:[%s11079_s17 + $0x58c] ss:$12 sps:$4 sm:$0xff]   ;;  %v9756_v19 = vld [vmem:[%s11079_s17 + $0x408] ss:$12 sps:$4 sm:$0xff]  }
 0x331   : > { %6818 = vmatprep.subr.bf16.mxu1 %v9689_v20  ;;  %v9759_v20 = vld [vmem:[%s11079_s17 + $0x588] ss:$12 sps:$4 sm:$0xff]  }
 0x332   : > { %6728 = vmatmul.mubr.bf16.vlgmr.msra.gmra.mxu0 %v11336_v21 }
 0x333   : > { %6769 = vmatmul.mubr.bf16.vlgmr.msra.gmra.mxu1 %v11338_v22  ;;  %6778 = vmatpush1.bf16.msra.mxu0 %v9684_v23  ;;  %v9764_v23 = vld [vmem:[%s11079_s17 + $0x3f4] ss:$12 sps:$4 sm:$0xff]  }
 0x334   : > { %6819 = vmatpush1.bf16.msra.mxu1 %v9687_v24  ;;  %6779 = vmatprep.subr.bf16.mxu0 %v9692_v25  ;;  %v9767_v24 = vld [vmem:[%s11079_s17 + $0x574] ss:$12 sps:$4 sm:$0xff]   ;;  %v9762_v25 = vld [vmem:[%s11079_s17 + $0x3f0] ss:$12 sps:$4 sm:$0xff]  }
 0x335   : > { %6820 = vmatprep.subr.bf16.mxu1 %v9695_v26  ;;  %6809 = vmatprep.mubr.bf16.mxu0 %v11378_v58  ;;  %v9765_v26 = vld [vmem:[%s11079_s17 + $0x570] ss:$12 sps:$4 sm:$0xff]  }
 0x336   : > { %6850 = vmatprep.mubr.bf16.mxu1 %v11384_v62 }
 0x337   : > { %6780 = vmatpush1.bf16.msra.mxu0 %v9690_v27  ;;  %v9770_v27 = vld [vmem:[%s11079_s17 + $0x3dc] ss:$12 sps:$4 sm:$0xff]  }
 0x338   : > { %6821 = vmatpush1.bf16.msra.mxu1 %v9693_v28  ;;  %6781 = vmatprep.subr.bf16.mxu0 %v9698_v29  ;;  %v9773_v28 = vld [vmem:[%s11079_s17 + $0x55c] ss:$12 sps:$4 sm:$0xff]   ;;  %v9768_v29 = vld [vmem:[%s11079_s17 + $0x3d8] ss:$12 sps:$4 sm:$0xff]  }
 0x339   : > { %6822 = vmatprep.subr.bf16.mxu1 %v9701_v31  ;;  %v9771_v31 = vld [vmem:[%s11079_s17 + $0x558] ss:$12 sps:$4 sm:$0xff]  }
 0x33b   : > { %6782 = vmatpush1.bf16.msra.mxu0 %v9696_v32  ;;  %v9776_v32 = vld [vmem:[%s11079_s17 + $0x3c4] ss:$12 sps:$4 sm:$0xff]  }
 0x33c   : > { %6823 = vmatpush1.bf16.msra.mxu1 %v9699_v33  ;;  %6783 = vmatprep.subr.bf16.mxu0 %v9704_v34  ;;  %v9779_v33 = vld [vmem:[%s11079_s17 + $0x544] ss:$12 sps:$4 sm:$0xff]   ;;  %v9774_v34 = vld [vmem:[%s11079_s17 + $0x3c0] ss:$12 sps:$4 sm:$0xff]  }
 0x33d   : > { %6824 = vmatprep.subr.bf16.mxu1 %v9707_v35  ;;  %v9777_v35 = vld [vmem:[%s11079_s17 + $0x540] ss:$12 sps:$4 sm:$0xff]  }
 0x33f   : > { %6784 = vmatpush1.bf16.msra.mxu0 %v9702_v5  ;;  %v9783_v5 = vld [vmem:[%s11079_s17 + $0x6ac] ss:$12 sps:$4 sm:$0xff]  }
 0x340   : > { %6825 = vmatpush1.bf16.msra.mxu1 %v9705_v36  ;;  %6785 = vmatprep.subr.bf16.mxu0 %v9710_v37  ;;  %v9786_v36 = vld [vmem:[%s11079_s17 + $0x82c] ss:$12 sps:$4 sm:$0xff]   ;;  %v11424_v37 = vpack.c.bf16 %v11367_v49, %v11367_v49 }
 0x341   : > { %6826 = vmatprep.subr.bf16.mxu1 %v9713_v38  ;;  %v11428_v38 = vpack.c.bf16 %v11374_v55, %v11374_v55 }
 0x343   : > { %6786 = vmatpush1.bf16.msra.mxu0 %v9708_v39  ;;  %v9781_v39 = vld [vmem:[%s11079_s17 + $0x6a8] ss:$12 sps:$4 sm:$0xff]  }
 0x344   : > { %6827 = vmatpush1.bf16.msra.mxu1 %v9711_v40  ;;  %6787 = vmatprep.subr.bf16.mxu0 %v9716_v41  ;;  %v9784_v40 = vld [vmem:[%s11079_s17 + $0x828] ss:$12 sps:$4 sm:$0xff]  }
 0x345   : > { %6828 = vmatprep.subr.bf16.mxu1 %v9719_v42  ;;  %v9789_v41 = vld [vmem:[%s11079_s17 + $0x694] ss:$12 sps:$4 sm:$0xff]  }
 0x346   : > { %v1289_v42 = vld [vmem:[#allocation2 + $0x10] sm:$0xff] }
 0x347   : > { %6788 = vmatpush1.bf16.msra.mxu0 %v9714_v43  ;;  %v9792_v43 = vld [vmem:[%s11079_s17 + $0x814] ss:$12 sps:$4 sm:$0xff]  }
 0x348   : > { %6829 = vmatpush1.bf16.msra.mxu1 %v9717_v44  ;;  %6789 = vmatprep.subr.bf16.mxu0 %v9722_v45  ;;  %v11435_v44 = vrot.slane %v1289_v42, %v11304_v54  ;;  %v1339_v45 = vcombine.high %v1289_v42, %v1289_v42  ;;  %v9856_v42 = vld [vmem:[%s11079_s17 + $0x888] ss:$12 sps:$4 sm:$0xff]  }
 0x349   : > { %6830 = vmatprep.subr.bf16.mxu1 %v9725_v46  ;;  %v9787_v46 = vld [vmem:[%s11079_s17 + $0x690] ss:$12 sps:$4 sm:$0xff]  }
 0x34a   : > { %v1354_v47 = vcombine.high %v11435_v44, %v11435_v44  ;;  %v11443_v49 = vrot.slane %v1339_v45, %v11304_v54  ;;  %v9864_v45 = vld [vmem:[%s11079_s17 + $0x874] ss:$12 sps:$4 sm:$0xff]  }
 0x34b   : > { %6790 = vmatpush1.bf16.msra.mxu0 %v9720_v51  ;;  %v9795_v51 = vld [vmem:[%s11079_s17 + $0x67c] ss:$12 sps:$4 sm:$0xff]  }
 0x34c   : > { %6831 = vmatpush1.bf16.msra.mxu1 %v9723_v52  ;;  %6791 = vmatprep.subr.bf16.mxu0 %v9728_v56  ;;  %v9798_v52 = vld [vmem:[%s11079_s17 + $0x7fc] ss:$12 sps:$4 sm:$0xff]   ;;  %v11448_v53 = vpack.c.bf16 %v1354_v47, %v1354_v47  ;;  %v1355_v55 = vcombine.high %v11443_v49, %v11443_v49  ;;  %v9793_v56 = vld [vmem:[%s11079_s17 + $0x678] ss:$12 sps:$4 sm:$0xff]  }
 0x34d   : > { %6832 = vmatprep.subr.bf16.mxu1 %v9731_v57  ;;  %v1290_v47 = vld [vmem:[#allocation2 + $0x18] sm:$0xff] }
 0x34e   : > { %v11454_v57 = vpack.c.bf16 %v1355_v55, %v1355_v55  ;;  %v1356_v55 = vcombine.high %v1290_v47, %v1290_v47 }
 0x34f   : > { %6792 = vmatpush1.bf16.msra.mxu0 %v9726_v60  ;;  %v9801_v60 = vld [vmem:[%s11079_s17 + $0x664] ss:$12 sps:$4 sm:$0xff]  }
 0x350   : > { %6833 = vmatpush1.bf16.msra.mxu1 %v9729_v61  ;;  %6793 = vmatprep.subr.bf16.mxu0 %v9734_v63  ;;  %v9804_v61 = vld [vmem:[%s11079_s17 + $0x7e4] ss:$12 sps:$4 sm:$0xff]   ;;  %v9799_v63 = vld [vmem:[%s11079_s17 + $0x660] ss:$12 sps:$4 sm:$0xff]  }
 0x351   : > { %6834 = vmatprep.subr.bf16.mxu1 %v9737_v0  ;;  %v9802_v0 = vld [vmem:[%s11079_s17 + $0x7e0] ss:$12 sps:$4 sm:$0xff]  }
 0x353   : > { %6794 = vmatpush2.bf16.msra.mxu0 %v9732_v1  ;;  %v9807_v1 = vld [vmem:[%s11079_s17 + $0x64c] ss:$12 sps:$4 sm:$0xff]  }
 0x354   : > { %6835 = vmatpush2.bf16.msra.mxu1 %v9735_v2  ;;  %6795 = vmatprep.subr.bf16.mxu0 %v9740_v4  ;;  %v9810_v2 = vld [vmem:[%s11079_s17 + $0x7cc] ss:$12 sps:$4 sm:$0xff]   ;;  %v9805_v4 = vld [vmem:[%s11079_s17 + $0x648] ss:$12 sps:$4 sm:$0xff]  }
 0x355   : > { %6836 = vmatprep.subr.bf16.mxu1 %v9743_v30  ;;  %v9808_v30 = vld [vmem:[%s11079_s17 + $0x7c8] ss:$12 sps:$4 sm:$0xff]  }
 0x357   : > { %6796 = vmatpush2.bf16.msra.mxu0 %v9738_v6  ;;  %v9813_v6 = vld [vmem:[%s11079_s17 + $0x634] ss:$12 sps:$4 sm:$0xff]  }
 0x358   : > { %6837 = vmatpush2.bf16.msra.mxu1 %v9741_v7  ;;  %6797 = vmatprep.subr.bf16.mxu0 %v9746_v9  ;;  %v9816_v7 = vld [vmem:[%s11079_s17 + $0x7b4] ss:$12 sps:$4 sm:$0xff]   ;;  %v9811_v9 = vld [vmem:[%s11079_s17 + $0x630] ss:$12 sps:$4 sm:$0xff]  }
 0x359   : > { %6838 = vmatprep.subr.bf16.mxu1 %v9749_v10  ;;  %v9814_v10 = vld [vmem:[%s11079_s17 + $0x7b0] ss:$12 sps:$4 sm:$0xff]  }
 0x35b   : > { %6798 = vmatpush2.bf16.msra.mxu0 %v9744_v11  ;;  %v9819_v11 = vld [vmem:[%s11079_s17 + $0x61c] ss:$12 sps:$4 sm:$0xff]  }
 0x35c   : > { %6839 = vmatpush2.bf16.msra.mxu1 %v9747_v12  ;;  %6799 = vmatprep.subr.bf16.mxu0 %v9752_v13  ;;  %v9822_v12 = vld [vmem:[%s11079_s17 + $0x79c] ss:$12 sps:$4 sm:$0xff]   ;;  %v9817_v13 = vld [vmem:[%s11079_s17 + $0x618] ss:$12 sps:$4 sm:$0xff]  }
 0x35d   : > { %6840 = vmatprep.subr.bf16.mxu1 %v9755_v14  ;;  %v9820_v14 = vld [vmem:[%s11079_s17 + $0x798] ss:$12 sps:$4 sm:$0xff]  }
 0x35f   : > { %6800 = vmatpush2.bf16.msra.mxu0 %v9750_v15  ;;  %v9825_v15 = vld [vmem:[%s11079_s17 + $0x604] ss:$12 sps:$4 sm:$0xff]  }
 0x360   : > { %6841 = vmatpush2.bf16.msra.mxu1 %v9753_v16  ;;  %6801 = vmatprep.subr.bf16.mxu0 %v9758_v17  ;;  %v9828_v16 = vld [vmem:[%s11079_s17 + $0x784] ss:$12 sps:$4 sm:$0xff]   ;;  %v9823_v17 = vld [vmem:[%s11079_s17 + $0x600] ss:$12 sps:$4 sm:$0xff]  }
 0x361   : > { %6842 = vmatprep.subr.bf16.mxu1 %v9761_v18  ;;  %v9826_v18 = vld [vmem:[%s11079_s17 + $0x780] ss:$12 sps:$4 sm:$0xff]  }
 0x363   : > { %6802 = vmatpush2.bf16.msra.mxu0 %v9756_v19  ;;  %v9831_v19 = vld [vmem:[%s11079_s17 + $0x76c] ss:$12 sps:$4 sm:$0xff]  }
 0x364   : > { %6843 = vmatpush2.bf16.msra.mxu1 %v9759_v20  ;;  %6803 = vmatprep.subr.bf16.mxu0 %v9764_v23  ;;  %v9834_v20 = vld [vmem:[%s11079_s17 + $0x8ec] ss:$12 sps:$4 sm:$0xff]   ;;  %v9829_v23 = vld [vmem:[%s11079_s17 + $0x768] ss:$12 sps:$4 sm:$0xff]  }
 0x365   : > { %6844 = vmatprep.subr.bf16.mxu1 %v9767_v24  ;;  %v9832_v24 = vld [vmem:[%s11079_s17 + $0x8e8] ss:$12 sps:$4 sm:$0xff]  }
 0x367   : > { %6804 = vmatpush2.bf16.msra.mxu0 %v9762_v25  ;;  %v9837_v25 = vld [vmem:[%s11079_s17 + $0x754] ss:$12 sps:$4 sm:$0xff]  }
 0x368   : > { %6845 = vmatpush2.bf16.msra.mxu1 %v9765_v26  ;;  %6805 = vmatprep.subr.bf16.mxu0 %v9770_v27  ;;  %v9840_v26 = vld [vmem:[%s11079_s17 + $0x8d4] ss:$12 sps:$4 sm:$0xff]   ;;  %v9835_v27 = vld [vmem:[%s11079_s17 + $0x750] ss:$12 sps:$4 sm:$0xff]  }
 0x369   : > { %6846 = vmatprep.subr.bf16.mxu1 %v9773_v28  ;;  %v9838_v28 = vld [vmem:[%s11079_s17 + $0x8d0] ss:$12 sps:$4 sm:$0xff]  }
 0x36b   : > { %6806 = vmatpush2.bf16.msra.mxu0 %v9768_v29  ;;  %v9843_v29 = vld [vmem:[%s11079_s17 + $0x73c] ss:$12 sps:$4 sm:$0xff]  }
 0x36c   : > { %6847 = vmatpush2.bf16.msra.mxu1 %v9771_v31  ;;  %6807 = vmatprep.subr.bf16.mxu0 %v9776_v32  ;;  %v9846_v31 = vld [vmem:[%s11079_s17 + $0x8bc] ss:$12 sps:$4 sm:$0xff]   ;;  %v9841_v32 = vld [vmem:[%s11079_s17 + $0x738] ss:$12 sps:$4 sm:$0xff]  }
 0x36d   : > { %6848 = vmatprep.subr.bf16.mxu1 %v9779_v33  ;;  %v9844_v33 = vld [vmem:[%s11079_s17 + $0x8b8] ss:$12 sps:$4 sm:$0xff]  }
 0x36f   : > { %6808 = vmatpush2.bf16.msra.mxu0 %v9774_v34  ;;  %v9849_v34 = vld [vmem:[%s11079_s17 + $0x724] ss:$12 sps:$4 sm:$0xff]  }
 0x370   : > { %6849 = vmatpush2.bf16.msra.mxu1 %v9777_v35  ;;  %6859 = vmatprep.subr.bf16.mxu0 %v9783_v5  ;;  %v9852_v35 = vld [vmem:[%s11079_s17 + $0x8a4] ss:$12 sps:$4 sm:$0xff]   ;;  %v9847_v5 = vld [vmem:[%s11079_s17 + $0x720] ss:$12 sps:$4 sm:$0xff]  }
 0x371   : > { %6900 = vmatprep.subr.bf16.mxu1 %v9786_v36  ;;  %v9850_v36 = vld [vmem:[%s11079_s17 + $0x8a0] ss:$12 sps:$4 sm:$0xff]  }
 0x372   : > { %6810 = vmatmul.mubr.bf16.vlgmr.msra.gmra.mxu0 %v11424_v37 }
 0x373   : > { %6851 = vmatmul.mubr.bf16.vlgmr.msra.gmra.mxu1 %v11428_v38  ;;  %6860 = vmatpush1.bf16.msra.mxu0 %v9781_v39  ;;  %v9855_v39 = vld [vmem:[%s11079_s17 + $0x70c] ss:$12 sps:$4 sm:$0xff]  }
 0x374   : > { %6901 = vmatpush1.bf16.msra.mxu1 %v9784_v40  ;;  %6861 = vmatprep.subr.bf16.mxu0 %v9789_v41  ;;  %v9858_v40 = vld [vmem:[%s11079_s17 + $0x88c] ss:$12 sps:$4 sm:$0xff]   ;;  %v9853_v41 = vld [vmem:[%s11079_s17 + $0x708] ss:$12 sps:$4 sm:$0xff]  }
 0x375   : > { %6902 = vmatprep.subr.bf16.mxu1 %v9792_v43  ;;  %6891 = vmatprep.mubr.bf16.mxu0 %v11448_v53  ;;  %v9861_v43 = vld [vmem:[%s11079_s17 + $0x6f4] ss:$12 sps:$4 sm:$0xff]  }
 0x376   : > { %6932 = vmatprep.mubr.bf16.mxu1 %v11454_v57 }
 0x377   : > { %6862 = vmatpush1.bf16.msra.mxu0 %v9787_v46  ;;  %v9859_v46 = vld [vmem:[%s11079_s17 + $0x6f0] ss:$12 sps:$4 sm:$0xff]  }
 0x378   : > { %6903 = vmatpush1.bf16.msra.mxu1 %v9790_v50  ;;  %6863 = vmatprep.subr.bf16.mxu0 %v9795_v51  ;;  %v9862_v50 = vld [vmem:[%s11079_s17 + $0x870] ss:$12 sps:$4 sm:$0xff]  }
 0x379   : > { %6904 = vmatprep.subr.bf16.mxu1 %v9798_v52  ;;  %v9867_v51 = vld [vmem:[%s11079_s17 + $0x6dc] ss:$12 sps:$4 sm:$0xff]  }
 0x37a   : > { %v9870_v52 = vld [vmem:[%s11079_s17 + $0x85c] ss:$12 sps:$4 sm:$0xff]  }
 0x37b   : > { %6864 = vmatpush1.bf16.msra.mxu0 %v9793_v56  ;;  %v9865_v56 = vld [vmem:[%s11079_s17 + $0x6d8] ss:$12 sps:$4 sm:$0xff]  }
 0x37c   : > { %6905 = vmatpush1.bf16.msra.mxu1 %v9796_v59  ;;  %6865 = vmatprep.subr.bf16.mxu0 %v9801_v60  ;;  %v9868_v59 = vld [vmem:[%s11079_s17 + $0x858] ss:$12 sps:$4 sm:$0xff]  }
 0x37d   : > { %6906 = vmatprep.subr.bf16.mxu1 %v9804_v61  ;;  %v9873_v60 = vld [vmem:[%s11079_s17 + $0x6c4] ss:$12 sps:$4 sm:$0xff]  }
 0x37e   : > { %v9876_v61 = vld [vmem:[%s11079_s17 + $0x844] ss:$12 sps:$4 sm:$0xff]  }
 0x37f   : > { %6866 = vmatpush1.bf16.msra.mxu0 %v9799_v63  ;;  %v11509_v63 = vrot.slane %v1290_v47, %v11304_v54  ;;  %v9931_v47 = vld [vmem:[%s11079_s17 + $0xbec] ss:$12 sps:$4 sm:$0xff]  }
 0x380   : > { %6907 = vmatpush1.bf16.msra.mxu1 %v9802_v0  ;;  %6867 = vmatprep.subr.bf16.mxu0 %v9807_v1  ;;  %v11512_v0 = vrot.slane %v1356_v55, %v11304_v54  ;;  %v9871_v1 = vld [vmem:[%s11079_s17 + $0x6c0] ss:$12 sps:$4 sm:$0xff]  }
 0x381   : > { %6908 = vmatprep.subr.bf16.mxu1 %v9810_v2  ;;  %v9874_v2 = vld [vmem:[%s11079_s17 + $0x840] ss:$12 sps:$4 sm:$0xff]  }
 0x382   : > { %v9937_v55 = vld [vmem:[%s11079_s17 + $0xbd4] ss:$12 sps:$4 sm:$0xff]  }
 0x383   : > { %6868 = vmatpush1.bf16.msra.mxu0 %v9805_v4  ;;  %v9880_v4 = vld [vmem:[%s11079_s17 + $0x9ac] ss:$12 sps:$4 sm:$0xff]  }
 0x384   : > { %6909 = vmatpush1.bf16.msra.mxu1 %v9808_v30  ;;  %6869 = vmatprep.subr.bf16.mxu0 %v9813_v6  ;;  %v9883_v30 = vld [vmem:[%s11079_s17 + $0xb2c] ss:$12 sps:$4 sm:$0xff]   ;;  %v1371_v6 = vcombine.high %v11509_v63, %v11509_v63 }
 0x385   : > { %6910 = vmatprep.subr.bf16.mxu1 %v9816_v7  ;;  %v1372_v7 = vcombine.high %v11512_v0, %v11512_v0 }
 0x387   : > { %6870 = vmatpush1.bf16.msra.mxu0 %v9811_v9  ;;  %v11524_v9 = vpack.c.bf16 %v11435_v44, %v11435_v44  ;;  %v11536_v44 = vpack.c.bf16 %v1372_v7, %v1372_v7  ;;  %v9947_v7 = vld [vmem:[%s11079_s17 + $0xba0] ss:$12 sps:$4 sm:$0xff]  }
 0x388   : > { %6911 = vmatpush1.bf16.msra.mxu1 %v9814_v10  ;;  %6871 = vmatprep.subr.bf16.mxu0 %v9819_v11  ;;  %v11528_v10 = vpack.c.bf16 %v11443_v49, %v11443_v49  ;;  %v9878_v11 = vld [vmem:[%s11079_s17 + $0x9a8] ss:$12 sps:$4 sm:$0xff]   ;;  %v9884_v49 = vld [vmem:[%s11079_s17 + $0x990] ss:$12 sps:$4 sm:$0xff]  }
 0x389   : > { %6912 = vmatprep.subr.bf16.mxu1 %v9822_v12  ;;  %v9881_v12 = vld [vmem:[%s11079_s17 + $0xb28] ss:$12 sps:$4 sm:$0xff]  }
 0x38b   : > { %6872 = vmatpush1.bf16.msra.mxu0 %v9817_v13  ;;  %v9886_v13 = vld [vmem:[%s11079_s17 + $0x994] ss:$12 sps:$4 sm:$0xff]  }
 0x38c   : > { %6913 = vmatpush1.bf16.msra.mxu1 %v9820_v14  ;;  %6873 = vmatprep.subr.bf16.mxu0 %v9825_v15  ;;  %v9889_v14 = vld [vmem:[%s11079_s17 + $0xb14] ss:$12 sps:$4 sm:$0xff]   ;;  %v11534_v15 = vpack.c.bf16 %v1371_v6, %v1371_v6 }
 0x38d   : > { %6914 = vmatprep.subr.bf16.mxu1 %v9828_v16  ;;  %v9887_v16 = vld [vmem:[%s11079_s17 + $0xb10] ss:$12 sps:$4 sm:$0xff]   ;;  %v9944_v6 = vld [vmem:[%s11079_s17 + $0xa20] ss:$12 sps:$4 sm:$0xff]  }
 0x38f   : > { %6874 = vmatpush1.bf16.msra.mxu0 %v9823_v17  ;;  %v9892_v17 = vld [vmem:[%s11079_s17 + $0x97c] ss:$12 sps:$4 sm:$0xff]  }
 0x390   : > { %6915 = vmatpush1.bf16.msra.mxu1 %v9826_v18  ;;  %6875 = vmatprep.subr.bf16.mxu0 %v9831_v19  ;;  %v9895_v18 = vld [vmem:[%s11079_s17 + $0xafc] ss:$12 sps:$4 sm:$0xff]   ;;  %v9890_v19 = vld [vmem:[%s11079_s17 + $0x978] ss:$12 sps:$4 sm:$0xff]  }
 0x391   : > { %6916 = vmatprep.subr.bf16.mxu1 %v9834_v20  ;;  %v9893_v20 = vld [vmem:[%s11079_s17 + $0xaf8] ss:$12 sps:$4 sm:$0xff]  }
 0x393   : > { %6876 = vmatpush2.bf16.msra.mxu0 %v9829_v23  ;;  %v9898_v23 = vld [vmem:[%s11079_s17 + $0x964] ss:$12 sps:$4 sm:$0xff]  }
 0x394   : > { %6917 = vmatpush2.bf16.msra.mxu1 %v9832_v24  ;;  %6877 = vmatprep.subr.bf16.mxu0 %v9837_v25  ;;  %v9901_v24 = vld [vmem:[%s11079_s17 + $0xae4] ss:$12 sps:$4 sm:$0xff]   ;;  %v9896_v25 = vld [vmem:[%s11079_s17 + $0x960] ss:$12 sps:$4 sm:$0xff]  }
 0x395   : > { %6918 = vmatprep.subr.bf16.mxu1 %v9840_v26  ;;  %v9899_v26 = vld [vmem:[%s11079_s17 + $0xae0] ss:$12 sps:$4 sm:$0xff]  }
 0x397   : > { %6878 = vmatpush2.bf16.msra.mxu0 %v9835_v27  ;;  %v9904_v27 = vld [vmem:[%s11079_s17 + $0x94c] ss:$12 sps:$4 sm:$0xff]  }
 0x398   : > { %6919 = vmatpush2.bf16.msra.mxu1 %v9838_v28  ;;  %6879 = vmatprep.subr.bf16.mxu0 %v9843_v29  ;;  %v9907_v28 = vld [vmem:[%s11079_s17 + $0xacc] ss:$12 sps:$4 sm:$0xff]   ;;  %v9902_v29 = vld [vmem:[%s11079_s17 + $0x948] ss:$12 sps:$4 sm:$0xff]  }
 0x399   : > { %6920 = vmatprep.subr.bf16.mxu1 %v9846_v31  ;;  %v9905_v31 = vld [vmem:[%s11079_s17 + $0xac8] ss:$12 sps:$4 sm:$0xff]  }
 0x39b   : > { %6880 = vmatpush2.bf16.msra.mxu0 %v9841_v32  ;;  %v9910_v32 = vld [vmem:[%s11079_s17 + $0x934] ss:$12 sps:$4 sm:$0xff]  }
 0x39c   : > { %6921 = vmatpush2.bf16.msra.mxu1 %v9844_v33  ;;  %6881 = vmatprep.subr.bf16.mxu0 %v9849_v34  ;;  %v9913_v33 = vld [vmem:[%s11079_s17 + $0xab4] ss:$12 sps:$4 sm:$0xff]   ;;  %v9908_v34 = vld [vmem:[%s11079_s17 + $0x930] ss:$12 sps:$4 sm:$0xff]  }
 0x39d   : > { %6922 = vmatprep.subr.bf16.mxu1 %v9852_v35  ;;  %v9911_v35 = vld [vmem:[%s11079_s17 + $0xab0] ss:$12 sps:$4 sm:$0xff]  }
 0x39f   : > { %6882 = vmatpush2.bf16.msra.mxu0 %v9847_v5  ;;  %v9916_v5 = vld [vmem:[%s11079_s17 + $0x91c] ss:$12 sps:$4 sm:$0xff]  }
 0x3a0   : > { %6923 = vmatpush2.bf16.msra.mxu1 %v9850_v36  ;;  %6883 = vmatprep.subr.bf16.mxu0 %v9855_v39  ;;  %v9919_v36 = vld [vmem:[%s11079_s17 + $0xa9c] ss:$12 sps:$4 sm:$0xff]   ;;  %v9914_v39 = vld [vmem:[%s11079_s17 + $0x918] ss:$12 sps:$4 sm:$0xff]  }
 0x3a1   : > { %6924 = vmatprep.subr.bf16.mxu1 %v9858_v40  ;;  %v9917_v40 = vld [vmem:[%s11079_s17 + $0xa98] ss:$12 sps:$4 sm:$0xff]  }
 0x3a3   : > { %6884 = vmatpush2.bf16.msra.mxu0 %v9853_v41  ;;  %v9922_v41 = vld [vmem:[%s11079_s17 + $0x904] ss:$12 sps:$4 sm:$0xff]  }
 0x3a4   : > { %6925 = vmatpush2.bf16.msra.mxu1 %v9856_v42  ;;  %6885 = vmatprep.subr.bf16.mxu0 %v9861_v43  ;;  %v9925_v42 = vld [vmem:[%s11079_s17 + $0xa84] ss:$12 sps:$4 sm:$0xff]   ;;  %v9920_v43 = vld [vmem:[%s11079_s17 + $0x900] ss:$12 sps:$4 sm:$0xff]  }
 0x3a5   : > { %6926 = vmatprep.subr.bf16.mxu1 %v9864_v45  ;;  %v9923_v45 = vld [vmem:[%s11079_s17 + $0xa80] ss:$12 sps:$4 sm:$0xff]  }
 0x3a7   : > { %6886 = vmatpush2.bf16.msra.mxu0 %v9859_v46  ;;  %v9928_v46 = vld [vmem:[%s11079_s17 + $0xa6c] ss:$12 sps:$4 sm:$0xff]  }
 0x3a8   : > { %6927 = vmatpush2.bf16.msra.mxu1 %v9862_v50  ;;  %6887 = vmatprep.subr.bf16.mxu0 %v9867_v51  ;;  %v9926_v50 = vld [vmem:[%s11079_s17 + $0xa68] ss:$12 sps:$4 sm:$0xff]  }
 0x3a9   : > { %6928 = vmatprep.subr.bf16.mxu1 %v9870_v52  ;;  %v9929_v51 = vld [vmem:[%s11079_s17 + $0xbe8] ss:$12 sps:$4 sm:$0xff]  }
 0x3aa   : > { %v9934_v52 = vld [vmem:[%s11079_s17 + $0xa54] ss:$12 sps:$4 sm:$0xff]  }
 0x3ab   : > { %6888 = vmatpush2.bf16.msra.mxu0 %v9865_v56  ;;  %v9932_v56 = vld [vmem:[%s11079_s17 + $0xa50] ss:$12 sps:$4 sm:$0xff]  }
 0x3ac   : > { %6929 = vmatpush2.bf16.msra.mxu1 %v9868_v59  ;;  %6889 = vmatprep.subr.bf16.mxu0 %v9873_v60  ;;  %v9935_v59 = vld [vmem:[%s11079_s17 + $0xbd0] ss:$12 sps:$4 sm:$0xff]  }
 0x3ad   : > { %6930 = vmatprep.subr.bf16.mxu1 %v9876_v61  ;;  %v9940_v60 = vld [vmem:[%s11079_s17 + $0xa3c] ss:$12 sps:$4 sm:$0xff]  }
 0x3ae   : > { %v9943_v61 = vld [vmem:[%s11079_s17 + $0xbbc] ss:$12 sps:$4 sm:$0xff]  }
 0x3af   : > { %6890 = vmatpush2.bf16.msra.mxu0 %v9871_v1  ;;  %v9938_v1 = vld [vmem:[%s11079_s17 + $0xa38] ss:$12 sps:$4 sm:$0xff]  }
 0x3b0   : > { %6931 = vmatpush2.bf16.msra.mxu1 %v9874_v2  ;;  %6941 = vmatprep.subr.bf16.mxu0 %v9880_v4  ;;  %v9941_v2 = vld [vmem:[%s11079_s17 + $0xbb8] ss:$12 sps:$4 sm:$0xff]  }
 0x3b1   : > { %6982 = vmatprep.subr.bf16.mxu1 %v9883_v30  ;;  %v9946_v4 = vld [vmem:[%s11079_s17 + $0xa24] ss:$12 sps:$4 sm:$0xff]  }
 0x3b2   : > { %6892 = vmatmul.mubr.bf16.vlgmr.msra.gmra.mxu0 %v11524_v9  ;;  %v9949_v30 = vld [vmem:[%s11079_s17 + $0xba4] ss:$12 sps:$4 sm:$0xff]  }
 0x3b3   : > { %6933 = vmatmul.mubr.bf16.vlgmr.msra.gmra.mxu1 %v11528_v10  ;;  %6942 = vmatpush1.bf16.msra.mxu0 %v9878_v11  ;;  %v9952_v11 = vld [vmem:[%s11079_s17 + $0xa0c] ss:$12 sps:$4 sm:$0xff]  }
 0x3b4   : > { %6983 = vmatpush1.bf16.msra.mxu1 %v9881_v12  ;;  %6943 = vmatprep.subr.bf16.mxu0 %v9886_v13  ;;  %v9955_v12 = vld [vmem:[%s11079_s17 + $0xb8c] ss:$12 sps:$4 sm:$0xff]   ;;  %v9950_v13 = vld [vmem:[%s11079_s17 + $0xa08] ss:$12 sps:$4 sm:$0xff]  }
 0x3b5   : > { %6984 = vmatprep.subr.bf16.mxu1 %v9889_v14  ;;  %6973 = vmatprep.mubr.bf16.mxu0 %v11534_v15  ;;  %v9953_v14 = vld [vmem:[%s11079_s17 + $0xb88] ss:$12 sps:$4 sm:$0xff]  }
 0x3b6   : > { %7014 = vmatprep.mubr.bf16.mxu1 %v11536_v44 }
 0x3b7   : > { %6944 = vmatpush1.bf16.msra.mxu0 %v9884_v49  ;;  %v9958_v49 = vld [vmem:[%s11079_s17 + $0x9f4] ss:$12 sps:$4 sm:$0xff]  }
 0x3b8   : > { %6985 = vmatpush1.bf16.msra.mxu1 %v9887_v16  ;;  %6945 = vmatprep.subr.bf16.mxu0 %v9892_v17  ;;  %v9961_v16 = vld [vmem:[%s11079_s17 + $0xb74] ss:$12 sps:$4 sm:$0xff]   ;;  %v1291_v17 = vld [vmem:[#allocation2 + $0x20] sm:$0xff] }
 0x3b9   : > { %6986 = vmatprep.subr.bf16.mxu1 %v9895_v18  ;;  %v9956_v18 = vld [vmem:[%s11079_s17 + $0x9f0] ss:$12 sps:$4 sm:$0xff]  }
 0x3bb   : > { %6946 = vmatpush1.bf16.msra.mxu0 %v9890_v19  ;;  %v9959_v19 = vld [vmem:[%s11079_s17 + $0xb70] ss:$12 sps:$4 sm:$0xff]  }
 0x3bc   : > { %6987 = vmatpush1.bf16.msra.mxu1 %v9893_v20  ;;  %6947 = vmatprep.subr.bf16.mxu0 %v9898_v23  ;;  %v9964_v20 = vld [vmem:[%s11079_s17 + $0x9dc] ss:$12 sps:$4 sm:$0xff]  }
 0x3bd   : > { %6988 = vmatprep.subr.bf16.mxu1 %v9901_v24  ;;  %v9967_v23 = vld [vmem:[%s11079_s17 + $0xb5c] ss:$12 sps:$4 sm:$0xff]   ;;  %v1373_v24 = vcombine.high %v1291_v17, %v1291_v17 }
 0x3bf   : > { %6948 = vmatpush1.bf16.msra.mxu0 %v9896_v25  ;;  %v9962_v25 = vld [vmem:[%s11079_s17 + $0x9d8] ss:$12 sps:$4 sm:$0xff]  }
 0x3c0   : > { %6989 = vmatpush1.bf16.msra.mxu1 %v9899_v26  ;;  %6949 = vmatprep.subr.bf16.mxu0 %v9904_v27  ;;  %v9965_v26 = vld [vmem:[%s11079_s17 + $0xb58] ss:$12 sps:$4 sm:$0xff]  }
 0x3c1   : > { %6990 = vmatprep.subr.bf16.mxu1 %v9907_v28  ;;  %v9970_v27 = vld [vmem:[%s11079_s17 + $0x9c4] ss:$12 sps:$4 sm:$0xff]  }
 0x3c2   : > { %v9973_v28 = vld [vmem:[%s11079_s17 + $0xb44] ss:$12 sps:$4 sm:$0xff]  }
 0x3c3   : > { %6950 = vmatpush1.bf16.msra.mxu0 %v9902_v29  ;;  %v11599_v29 = vrot.slane %v1291_v17, %v11304_v54 }
 0x3c4   : > { %6991 = vmatpush1.bf16.msra.mxu1 %v9905_v31  ;;  %6951 = vmatprep.subr.bf16.mxu0 %v9910_v32  ;;  %v11602_v31 = vrot.slane %v1373_v24, %v11304_v54  ;;  %v9968_v32 = vld [vmem:[%s11079_s17 + $0x9c0] ss:$12 sps:$4 sm:$0xff]  }
 0x3c5   : > { %6992 = vmatprep.subr.bf16.mxu1 %v9913_v33  ;;  %v9971_v33 = vld [vmem:[%s11079_s17 + $0xb40] ss:$12 sps:$4 sm:$0xff]  }
 0x3c6   : > { %v10001_v24 = vld [vmem:[%s11079_s17 + $0xc4c] ss:$12 sps:$4 sm:$0xff]  }
 0x3c7   : > { %6952 = vmatpush1.bf16.msra.mxu0 %v9908_v34  ;;  %v2544_v34 = vld [vmem:[%s395_s21] sm:$0x7] }
 0x3c8   : > { %6993 = vmatpush1.bf16.msra.mxu1 %v9911_v35  ;;  %6953 = vmatprep.subr.bf16.mxu0 %v9916_v5  ;;  %v2548_v35 = vsub.s32 0, %v11296_v48  ;;  %v9977_v5 = vld [vmem:[%s11079_s17 + $0xcac] ss:$12 sps:$4 sm:$0xff]  }
 0x3c9   : > { %6994 = vmatprep.subr.bf16.mxu1 %v9919_v36  ;;  %v9980_v36 = vld [vmem:[%s11079_s17 + $0xe2c] ss:$12 sps:$4 sm:$0xff]  }
 0x3cb   : > { %6954 = vmatpush1.bf16.msra.mxu0 %v9914_v39  ;;  %v2552_v39 = vsub.s32 1, %v11296_v48 }
 0x3cc   : > { %6995 = vmatpush1.bf16.msra.mxu1 %v9917_v40  ;;  %6955 = vmatprep.subr.bf16.mxu0 %v9922_v41  ;;  %v1388_v40 = vcombine.high %v11599_v29, %v11599_v29  ;;  %v1389_v41 = vcombine.high %v11602_v31, %v11602_v31 }
 0x3cd   : > { %6996 = vmatprep.subr.bf16.mxu1 %v9925_v42  ;;  %v11618_v42 = vpack.c.bf16 %v11509_v63, %v11509_v63 }
 0x3ce   : > { %v11630_v63 = vpack.c.bf16 %v1389_v41, %v1389_v41  ;;  %v10022_v41 = vld [vmem:[%s11079_s17 + $0xd84] ss:$12 sps:$4 sm:$0xff]  }
 0x3cf   : > { %6956 = vmatpush1.bf16.msra.mxu0 %v9920_v43  ;;  %v11622_v43 = vpack.c.bf16 %v11512_v0, %v11512_v0 }
 0x3d0   : > { %6997 = vmatpush1.bf16.msra.mxu1 %v9923_v45  ;;  %6957 = vmatprep.subr.bf16.mxu0 %v9928_v46  ;;  %v2549_v45 = vrot.slane %v2544_v34, %v2548_v35  ;;  %v9975_v46 = vld [vmem:[%s11079_s17 + $0xca8] ss:$12 sps:$4 sm:$0xff]  }
 0x3d1   : > { %6998 = vmatprep.subr.bf16.mxu1 %v9931_v47  ;;  %v9978_v47 = vld [vmem:[%s11079_s17 + $0xe28] ss:$12 sps:$4 sm:$0xff]  }
 0x3d2   : > { %v10013_v35 = vld [vmem:[%s11079_s17 + $0xc1c] ss:$12 sps:$4 sm:$0xff]  }
 0x3d3   : > { %6958 = vmatpush2.bf16.msra.mxu0 %v9926_v50  ;;  %v9983_v50 = vld [vmem:[%s11079_s17 + $0xc94] ss:$12 sps:$4 sm:$0xff]  }
 0x3d4   : > { %6999 = vmatpush2.bf16.msra.mxu1 %v9929_v51  ;;  %6959 = vmatprep.subr.bf16.mxu0 %v9934_v52  ;;  %v9986_v51 = vld [vmem:[%s11079_s17 + $0xe14] ss:$12 sps:$4 sm:$0xff]   ;;  %v2553_v52 = vrot.slane %v2544_v34, %v2552_v39  ;;  %v10008_v34 = vld [vmem:[%s11079_s17 + $0xdb0] ss:$12 sps:$4 sm:$0xff]   ;;  %v10014_v39 = vld [vmem:[%s11079_s17 + $0xd98] ss:$12 sps:$4 sm:$0xff]  }
 0x3d5   : > { %7000 = vmatprep.subr.bf16.mxu1 %v9937_v55  ;;  %v11628_v55 = vpack.c.bf16 %v1388_v40, %v1388_v40  ;;  %v10019_v40 = vld [vmem:[%s11079_s17 + $0xc04] ss:$12 sps:$4 sm:$0xff]  }
 0x3d7   : > { %6960 = vmatpush2.bf16.msra.mxu0 %v9932_v56 }
 0x3d8   : > { %7001 = vmatpush2.bf16.msra.mxu1 %v9935_v59  ;;  %6961 = vmatprep.subr.bf16.mxu0 %v9940_v60  ;;  %v9981_v59 = vld [vmem:[%s11079_s17 + $0xc90] ss:$12 sps:$4 sm:$0xff]  }
 0x3d9   : > { %7002 = vmatprep.subr.bf16.mxu1 %v9943_v61  ;;  %v9984_v61 = vld [vmem:[%s11079_s17 + $0xe10] ss:$12 sps:$4 sm:$0xff]  }
 0x3db   : > { %6962 = vmatpush2.bf16.msra.mxu0 %v9938_v1  ;;  %v9989_v1 = vld [vmem:[%s11079_s17 + $0xc7c] ss:$12 sps:$4 sm:$0xff]  }
 0x3dc   : > { %7003 = vmatpush2.bf16.msra.mxu1 %v9941_v2  ;;  %6963 = vmatprep.subr.bf16.mxu0 %v9946_v4 }
 0x3dd   : > { %7004 = vmatprep.subr.bf16.mxu1 %v9949_v30  ;;  %v9992_v30 = vld [vmem:[%s11079_s17 + $0xdfc] ss:$12 sps:$4 sm:$0xff]  }
 0x3df   : > { %6964 = vmatpush2.bf16.msra.mxu0 %v9944_v6 }
 0x3e0   : > { %7005 = vmatpush2.bf16.msra.mxu1 %v9947_v7  ;;  %6965 = vmatprep.subr.bf16.mxu0 %v9952_v11 }
 0x3e1   : > { %7006 = vmatprep.subr.bf16.mxu1 %v9955_v12 }
 0x3e3   : > { %6966 = vmatpush2.bf16.msra.mxu0 %v9950_v13  ;;  %v9987_v13 = vld [vmem:[%s11079_s17 + $0xc78] ss:$12 sps:$4 sm:$0xff]  }
 0x3e4   : > { %7007 = vmatpush2.bf16.msra.mxu1 %v9953_v14  ;;  %6967 = vmatprep.subr.bf16.mxu0 %v9958_v49  ;;  %v9990_v14 = vld [vmem:[%s11079_s17 + $0xdf8] ss:$12 sps:$4 sm:$0xff]  }
 0x3e5   : > { %7008 = vmatprep.subr.bf16.mxu1 %v9961_v16 }
 0x3e7   : > { %6968 = vmatpush2.bf16.msra.mxu0 %v9956_v18  ;;  %v9995_v18 = vld [vmem:[%s11079_s17 + $0xc64] ss:$12 sps:$4 sm:$0xff]  }
 0x3e8   : > { %7009 = vmatpush2.bf16.msra.mxu1 %v9959_v19  ;;  %6969 = vmatprep.subr.bf16.mxu0 %v9964_v20  ;;  %v9998_v19 = vld [vmem:[%s11079_s17 + $0xde4] ss:$12 sps:$4 sm:$0xff]   ;;  %v9993_v20 = vld [vmem:[%s11079_s17 + $0xc60] ss:$12 sps:$4 sm:$0xff]  }
 0x3e9   : > { %7010 = vmatprep.subr.bf16.mxu1 %v9967_v23  ;;  %v9996_v23 = vld [vmem:[%s11079_s17 + $0xde0] ss:$12 sps:$4 sm:$0xff]  }
 0x3eb   : > { %6970 = vmatpush2.bf16.msra.mxu0 %v9962_v25  ;;  %v10004_v25 = vld [vmem:[%s11079_s17 + $0xdcc] ss:$12 sps:$4 sm:$0xff]  }
 0x3ec   : > { %7011 = vmatpush2.bf16.msra.mxu1 %v9965_v26  ;;  %6971 = vmatprep.subr.bf16.mxu0 %v9970_v27  ;;  %v9999_v26 = vld [vmem:[%s11079_s17 + $0xc48] ss:$12 sps:$4 sm:$0xff]  }
 0x3ed   : > { %7012 = vmatprep.subr.bf16.mxu1 %v9973_v28  ;;  %v10002_v27 = vld [vmem:[%s11079_s17 + $0xdc8] ss:$12 sps:$4 sm:$0xff]  }
 0x3ee   : > { %v10007_v28 = vld [vmem:[%s11079_s17 + $0xc34] ss:$12 sps:$4 sm:$0xff]  }
 0x3ef   : > { %6972 = vmatpush2.bf16.msra.mxu0 %v9968_v32  ;;  %v10010_v32 = vld [vmem:[%s11079_s17 + $0xdb4] ss:$12 sps:$4 sm:$0xff]  }
 0x3f0   : > { %7013 = vmatpush2.bf16.msra.mxu1 %v9971_v33  ;;  %7023 = vmatprep.subr.bf16.mxu0 %v9977_v5  ;;  %v10005_v33 = vld [vmem:[%s11079_s17 + $0xc30] ss:$12 sps:$4 sm:$0xff]  }
 0x3f1   : > { %7064 = vmatprep.subr.bf16.mxu1 %v9980_v36  ;;  %v10016_v5 = vld [vmem:[%s11079_s17 + $0xd9c] ss:$12 sps:$4 sm:$0xff]   ;;  %v10011_v36 = vld [vmem:[%s11079_s17 + $0xc18] ss:$12 sps:$4 sm:$0xff]  }
 0x3f2   : > { %v6729_v0 = vpop.f32.mrf.mxu0  ;;  %6974 = vmatmul.mubr.bf16.vlgmr.msra.gmra.mxu0 %v11618_v42 }
 0x3f3   : > { %v6770_v56 = vpop.f32.mrf.mxu1  ;;  %7015 = vmatmul.mubr.bf16.vlgmr.msra.gmra.mxu1 %v11622_v43  ;;  %v6730_v60 = vadd.f32 %v6729_v0, %v2549_v45  ;;  %7024 = vmatpush1.bf16.msra.mxu0 %v9975_v46  ;;  %v10017_v45 = vld [vmem:[%s11079_s17 + $0xc00] ss:$12 sps:$4 sm:$0xff]  }
 0x3f4   : > { %7065 = vmatpush1.bf16.msra.mxu1 %v9978_v47  ;;  %v6731_v2 = vpop.f32.mrf.mxu0  ;;  %7025 = vmatprep.subr.bf16.mxu0 %v9983_v50  ;;  %v10020_v46 = vld [vmem:[%s11079_s17 + $0xd80] ss:$12 sps:$4 sm:$0xff]  }
 0x3f5   : > { %v6772_v4 = vpop.f32.mrf.mxu1  ;;  %7066 = vmatprep.subr.bf16.mxu1 %v9986_v51  ;;  %v11638_v6 = vadd.f32 %v6770_v56, %v6730_v60  ;;  %v6732_v7 = vadd.f32 %v6731_v2, %v2553_v52  ;;  %7055 = vmatprep.mubr.bf16.mxu0 %v11628_v55  ;;  %v10025_v47 = vld [vmem:[%s11079_s17 + $0xd6c] ss:$12 sps:$4 sm:$0xff]   ;;  %v10023_v51 = vld [vmem:[%s11079_s17 + $0xd68] ss:$12 sps:$4 sm:$0xff]   ;;  %v10032_v60 = vld [vmem:[%s11079_s17 + $0xed0] ss:$12 sps:$4 sm:$0xff]  }
 0x3f6   : > { %7096 = vmatprep.mubr.bf16.mxu1 %v11630_v63  ;;  %v6733_v11 = vpop.f32.mrf.mxu0  ;;  %v10028_v50 = vld [vmem:[%s11079_s17 + $0xeec] ss:$12 sps:$4 sm:$0xff]   ;;  %v10026_v52 = vld [vmem:[%s11079_s17 + $0xee8] ss:$12 sps:$4 sm:$0xff]  }
 0x3f7   : > { %v6774_v12 = vpop.f32.mrf.mxu1  ;;  %v11644_v49 = vadd.f32 %v6772_v4, %v6732_v7  ;;  %7026 = vmatpush1.bf16.msra.mxu0 %v9981_v59  ;;  %v10031_v0 = vld [vmem:[%s11079_s17 + $0xd54] ss:$12 sps:$4 sm:$0xff]   ;;  %v10029_v59 = vld [vmem:[%s11079_s17 + $0xd50] ss:$12 sps:$4 sm:$0xff]   ;;  %v10035_v2 = vld [vmem:[%s11079_s17 + $0xd38] ss:$12 sps:$4 sm:$0xff]  }
 0x3f8   : > { %7067 = vmatpush1.bf16.msra.mxu1 %v9984_v61  ;;  %v6734_v16 = vpop.f32.mrf.mxu0  ;;  %7027 = vmatprep.subr.bf16.mxu0 %v9989_v1  ;;  %v10034_v56 = vld [vmem:[%s11079_s17 + $0xed4] ss:$12 sps:$4 sm:$0xff]   ;;  %v10037_v61 = vld [vmem:[%s11079_s17 + $0xd3c] ss:$12 sps:$4 sm:$0xff]   ;;  %v10038_v4 = vld [vmem:[%s11079_s17 + $0xeb8] ss:$12 sps:$4 sm:$0xff]  }
 0x3f9   : > { %v6775_v17 = vpop.f32.mrf.mxu1  ;;  %7068 = vmatprep.subr.bf16.mxu1 %v9992_v30  ;;  %v10040_v1 = vld [vmem:[%s11079_s17 + $0xebc] ss:$12 sps:$4 sm:$0xff]   ;;  %v10043_v30 = vld [vmem:[%s11079_s17 + $0xd24] ss:$12 sps:$4 sm:$0xff]   ;;  %v10041_v11 = vld [vmem:[%s11079_s17 + $0xd20] ss:$12 sps:$4 sm:$0xff]  }
 0x3fa   : > { %v10046_v7 = vld [vmem:[%s11079_s17 + $0xea4] ss:$12 sps:$4 sm:$0xff]   ;;  %v10044_v12 = vld [vmem:[%s11079_s17 + $0xea0] ss:$12 sps:$4 sm:$0xff]   ;;  %v10047_v16 = vld [vmem:[%s11079_s17 + $0xd08] ss:$12 sps:$4 sm:$0xff]  }
 0x3fb   : > { %7028 = vmatpush1.bf16.msra.mxu0 %v9987_v13  ;;  %v10049_v13 = vld [vmem:[%s11079_s17 + $0xd0c] ss:$12 sps:$4 sm:$0xff]   ;;  %v10050_v17 = vld [vmem:[%s11079_s17 + $0xe88] ss:$12 sps:$4 sm:$0xff]  }
 0x3fc   : > { %7069 = vmatpush1.bf16.msra.mxu1 %v9990_v14  ;;  %7029 = vmatprep.subr.bf16.mxu0 %v9995_v18  ;;  %v10052_v14 = vld [vmem:[%s11079_s17 + $0xe8c] ss:$12 sps:$4 sm:$0xff]   ;;  %v10055_v18 = vld [vmem:[%s11079_s17 + $0xcf4] ss:$12 sps:$4 sm:$0xff]  }
 0x3fd   : > { %7070 = vmatprep.subr.bf16.mxu1 %v9998_v19  ;;  %v10058_v19 = vld [vmem:[%s11079_s17 + $0xe74] ss:$12 sps:$4 sm:$0xff]  }
 0x3ff   : > { %7030 = vmatpush1.bf16.msra.mxu0 %v9993_v20  ;;  %v1292_v20 = vld [vmem:[#allocation2 + $0x28] sm:$0xff] }
 0x400   : > { %7071 = vmatpush1.bf16.msra.mxu1 %v9996_v23  ;;  %7031 = vmatprep.subr.bf16.mxu0 %v10001_v24  ;;  %v10053_v23 = vld [vmem:[%s11079_s17 + $0xcf0] ss:$12 sps:$4 sm:$0xff]  }
 0x401   : > { %7072 = vmatprep.subr.bf16.mxu1 %v10004_v25  ;;  %v10056_v24 = vld [vmem:[%s11079_s17 + $0xe70] ss:$12 sps:$4 sm:$0xff]  }
 0x402   : > { %v10061_v25 = vld [vmem:[%s11079_s17 + $0xcdc] ss:$12 sps:$4 sm:$0xff]  }
 0x403   : > { %7032 = vmatpush1.bf16.msra.mxu0 %v9999_v26  ;;  %v10064_v26 = vld [vmem:[%s11079_s17 + $0xe5c] ss:$12 sps:$4 sm:$0xff]  }
 0x404   : > { %7073 = vmatpush1.bf16.msra.mxu1 %v10002_v27  ;;  %7033 = vmatprep.subr.bf16.mxu0 %v10007_v28  ;;  %v1390_v27 = vcombine.high %v1292_v20, %v1292_v20  ;;  %v10059_v28 = vld [vmem:[%s11079_s17 + $0xcd8] ss:$12 sps:$4 sm:$0xff]  }
 0x405   : > { %7074 = vmatprep.subr.bf16.mxu1 %v10010_v32  ;;  %v10062_v32 = vld [vmem:[%s11079_s17 + $0xe58] ss:$12 sps:$4 sm:$0xff]  }
 0x407   : > { %7034 = vmatpush1.bf16.msra.mxu0 %v10005_v33  ;;  %v10067_v33 = vld [vmem:[%s11079_s17 + $0xcc4] ss:$12 sps:$4 sm:$0xff]  }
 0x408   : > { %7075 = vmatpush1.bf16.msra.mxu1 %v10008_v34  ;;  %7035 = vmatprep.subr.bf16.mxu0 %v10013_v35  ;;  %v10070_v34 = vld [vmem:[%s11079_s17 + $0xe44] ss:$12 sps:$4 sm:$0xff]   ;;  %v11697_v35 = vrot.slane %v1292_v20, %v11304_v54 }
 0x409   : > { %7076 = vmatprep.subr.bf16.mxu1 %v10016_v5  ;;  %v11700_v5 = vrot.slane %v1390_v27, %v11304_v54  ;;  %v10101_v27 = vld [vmem:[%s11079_s17 + $0x10cc] ss:$12 sps:$4 sm:$0xff]  }
 0x40b   : > { %7036 = vmatpush1.bf16.msra.mxu0 %v10011_v36  ;;  %v10065_v36 = vld [vmem:[%s11079_s17 + $0xcc0] ss:$12 sps:$4 sm:$0xff]  }
 0x40c   : > { %7077 = vmatpush1.bf16.msra.mxu1 %v10014_v39  ;;  %7037 = vmatprep.subr.bf16.mxu0 %v10019_v40  ;;  %v10068_v39 = vld [vmem:[%s11079_s17 + $0xe40] ss:$12 sps:$4 sm:$0xff]  }
 0x40d   : > { %7078 = vmatprep.subr.bf16.mxu1 %v10022_v41  ;;  %v10074_v40 = vld [vmem:[%s11079_s17 + $0xfac] ss:$12 sps:$4 sm:$0xff]  }
 0x40e   : > { %v10077_v41 = vld [vmem:[%s11079_s17 + $0x112c] ss:$12 sps:$4 sm:$0xff]  }
 0x40f   : > { %7038 = vmatpush1.bf16.msra.mxu0 %v10017_v45  ;;  %v10072_v45 = vld [vmem:[%s11079_s17 + $0xfa8] ss:$12 sps:$4 sm:$0xff]  }
 0x410   : > { %7079 = vmatpush1.bf16.msra.mxu1 %v10020_v46  ;;  %7039 = vmatprep.subr.bf16.mxu0 %v10025_v47  ;;  %v10075_v46 = vld [vmem:[%s11079_s17 + $0x1128] ss:$12 sps:$4 sm:$0xff]   ;;  %v1405_v47 = vcombine.high %v11697_v35, %v11697_v35 }
 0x411   : > { %7080 = vmatprep.subr.bf16.mxu1 %v10028_v50  ;;  %v1406_v50 = vcombine.high %v11700_v5, %v11700_v5 }
 0x413   : > { %7040 = vmatpush2.bf16.msra.mxu0 %v10023_v51  ;;  %v11714_v51 = vpack.c.bf16 %v11599_v29, %v11599_v29 }
 0x414   : > { %7081 = vmatpush2.bf16.msra.mxu1 %v10026_v52  ;;  %7041 = vmatprep.subr.bf16.mxu0 %v10031_v0  ;;  %v11718_v52 = vpack.c.bf16 %v11602_v31, %v11602_v31  ;;  %v10080_v0 = vld [vmem:[%s11079_s17 + $0xf94] ss:$12 sps:$4 sm:$0xff]  }
 0x415   : > { %7082 = vmatprep.subr.bf16.mxu1 %v10034_v56  ;;  %v10083_v56 = vld [vmem:[%s11079_s17 + $0x1114] ss:$12 sps:$4 sm:$0xff]  }
 0x417   : > { %7042 = vmatpush2.bf16.msra.mxu0 %v10029_v59  ;;  %v10078_v59 = vld [vmem:[%s11079_s17 + $0xf90] ss:$12 sps:$4 sm:$0xff]  }
 0x418   : > { %7083 = vmatpush2.bf16.msra.mxu1 %v10032_v60  ;;  %7043 = vmatprep.subr.bf16.mxu0 %v10037_v61  ;;  %v10081_v60 = vld [vmem:[%s11079_s17 + $0x1110] ss:$12 sps:$4 sm:$0xff]   ;;  %v11724_v61 = vpack.c.bf16 %v1405_v47, %v1405_v47 }
 0x419   : > { %7084 = vmatprep.subr.bf16.mxu1 %v10040_v1  ;;  %v11726_v1 = vpack.c.bf16 %v1406_v50, %v1406_v50  ;;  %v10116_v47 = vld [vmem:[%s11079_s17 + $0xf04] ss:$12 sps:$4 sm:$0xff]  }
 0x41a   : > { %v10119_v50 = vld [vmem:[%s11079_s17 + $0x1084] ss:$12 sps:$4 sm:$0xff]  }
 0x41b   : > { %7044 = vmatpush2.bf16.msra.mxu0 %v10035_v2 }
 0x41c   : > { %7085 = vmatpush2.bf16.msra.mxu1 %v10038_v4  ;;  %7045 = vmatprep.subr.bf16.mxu0 %v10043_v30 }
 0x41d   : > { %7086 = vmatprep.subr.bf16.mxu1 %v10046_v7  ;;  %v10086_v7 = vld [vmem:[%s11079_s17 + $0xf7c] ss:$12 sps:$4 sm:$0xff]  }
 0x41f   : > { %7046 = vmatpush2.bf16.msra.mxu0 %v10041_v11  ;;  %v10089_v11 = vld [vmem:[%s11079_s17 + $0x10fc] ss:$12 sps:$4 sm:$0xff]  }
 0x420   : > { %7087 = vmatpush2.bf16.msra.mxu1 %v10044_v12  ;;  %7047 = vmatprep.subr.bf16.mxu0 %v10049_v13 }
 0x421   : > { %7088 = vmatprep.subr.bf16.mxu1 %v10052_v14  ;;  %v10084_v14 = vld [vmem:[%s11079_s17 + $0xf78] ss:$12 sps:$4 sm:$0xff]  }
 0x423   : > { %7048 = vmatpush2.bf16.msra.mxu0 %v10047_v16  ;;  %v10087_v16 = vld [vmem:[%s11079_s17 + $0x10f8] ss:$12 sps:$4 sm:$0xff]  }
 0x424   : > { %7089 = vmatpush2.bf16.msra.mxu1 %v10050_v17  ;;  %7049 = vmatprep.subr.bf16.mxu0 %v10055_v18 }
 0x425   : > { %7090 = vmatprep.subr.bf16.mxu1 %v10058_v19 }
 0x427   : > { %7050 = vmatpush2.bf16.msra.mxu0 %v10053_v23  ;;  %v10095_v23 = vld [vmem:[%s11079_s17 + $0x10e4] ss:$12 sps:$4 sm:$0xff]  }
 0x428   : > { %7091 = vmatpush2.bf16.msra.mxu1 %v10056_v24  ;;  %7051 = vmatprep.subr.bf16.mxu0 %v10061_v25  ;;  %v10090_v24 = vld [vmem:[%s11079_s17 + $0xf60] ss:$12 sps:$4 sm:$0xff]  }
 0x429   : > { %7092 = vmatprep.subr.bf16.mxu1 %v10064_v26  ;;  %v10093_v25 = vld [vmem:[%s11079_s17 + $0x10e0] ss:$12 sps:$4 sm:$0xff]  }
 0x42a   : > { %v10098_v26 = vld [vmem:[%s11079_s17 + $0xf4c] ss:$12 sps:$4 sm:$0xff]  }
 0x42b   : > { %7052 = vmatpush2.bf16.msra.mxu0 %v10059_v28  ;;  %v10096_v28 = vld [vmem:[%s11079_s17 + $0xf48] ss:$12 sps:$4 sm:$0xff]  }
 0x42c   : > { %7093 = vmatpush2.bf16.msra.mxu1 %v10062_v32  ;;  %7053 = vmatprep.subr.bf16.mxu0 %v10067_v33  ;;  %v10099_v32 = vld [vmem:[%s11079_s17 + $0x10c8] ss:$12 sps:$4 sm:$0xff]  }
 0x42d   : > { %7094 = vmatprep.subr.bf16.mxu1 %v10070_v34  ;;  %v10104_v33 = vld [vmem:[%s11079_s17 + $0xf34] ss:$12 sps:$4 sm:$0xff]  }
 0x42e   : > { %v10107_v34 = vld [vmem:[%s11079_s17 + $0x10b4] ss:$12 sps:$4 sm:$0xff]  }
 0x42f   : > { %7054 = vmatpush2.bf16.msra.mxu0 %v10065_v36  ;;  %v10102_v36 = vld [vmem:[%s11079_s17 + $0xf30] ss:$12 sps:$4 sm:$0xff]  }
 0x430   : > { %7095 = vmatpush2.bf16.msra.mxu1 %v10068_v39  ;;  %7105 = vmatprep.subr.bf16.mxu0 %v10074_v40  ;;  %v10105_v39 = vld [vmem:[%s11079_s17 + $0x10b0] ss:$12 sps:$4 sm:$0xff]  }
 0x431   : > { %7146 = vmatprep.subr.bf16.mxu1 %v10077_v41  ;;  %v10110_v40 = vld [vmem:[%s11079_s17 + $0xf1c] ss:$12 sps:$4 sm:$0xff]  }
 0x432   : > { %v6811_v29 = vpop.f32.mrf.mxu0  ;;  %7056 = vmatmul.mubr.bf16.vlgmr.msra.gmra.mxu0 %v11714_v51  ;;  %v10113_v41 = vld [vmem:[%s11079_s17 + $0x109c] ss:$12 sps:$4 sm:$0xff]  }
 0x433   : > { %v6852_v2 = vpop.f32.mrf.mxu1  ;;  %7097 = vmatmul.mubr.bf16.vlgmr.msra.gmra.mxu1 %v11718_v52  ;;  %v6812_v31 = vadd.f32 %v6811_v29, %v11638_v6  ;;  %7106 = vmatpush1.bf16.msra.mxu0 %v10072_v45  ;;  %v10108_v45 = vld [vmem:[%s11079_s17 + $0xf18] ss:$12 sps:$4 sm:$0xff]   ;;  %v10120_v29 = vld [vmem:[%s11079_s17 + $0x1068] ss:$12 sps:$4 sm:$0xff]  }
 0x434   : > { %7147 = vmatpush1.bf16.msra.mxu1 %v10075_v46  ;;  %v6813_v4 = vpop.f32.mrf.mxu0  ;;  %7107 = vmatprep.subr.bf16.mxu0 %v10080_v0  ;;  %v10111_v46 = vld [vmem:[%s11079_s17 + $0x1098] ss:$12 sps:$4 sm:$0xff]   ;;  %v10114_v0 = vld [vmem:[%s11079_s17 + $0xf00] ss:$12 sps:$4 sm:$0xff]  }
 0x435   : > { %v6854_v30 = vpop.f32.mrf.mxu1  ;;  %7148 = vmatprep.subr.bf16.mxu1 %v10083_v56  ;;  %v11733_v12 = vadd.f32 %v6852_v2, %v6812_v31  ;;  %v6814_v13 = vadd.f32 %v6813_v4, %v11644_v49  ;;  %7137 = vmatprep.mubr.bf16.mxu0 %v11724_v61  ;;  %v10092_v49 = vld [vmem:[%s11079_s17 + $0xf64] ss:$12 sps:$4 sm:$0xff]   ;;  %v10117_v56 = vld [vmem:[%s11079_s17 + $0x1080] ss:$12 sps:$4 sm:$0xff]   ;;  %v10123_v2 = vld [vmem:[%s11079_s17 + $0x11e8] ss:$12 sps:$4 sm:$0xff]  }
 0x436   : > { %7178 = vmatprep.mubr.bf16.mxu1 %v11726_v1  ;;  %v6815_v6 = vpop.f32.mrf.mxu0  ;;  %v10128_v31 = vld [vmem:[%s11079_s17 + $0x1054] ss:$12 sps:$4 sm:$0xff]  }
 0x437   : > { %v6856_v17 = vpop.f32.mrf.mxu1  ;;  %v11740_v18 = vadd.f32 %v6854_v30, %v6814_v13  ;;  %7108 = vmatpush1.bf16.msra.mxu0 %v10078_v59  ;;  %v10122_v59 = vld [vmem:[%s11079_s17 + $0x106c] ss:$12 sps:$4 sm:$0xff]   ;;  %v10131_v4 = vld [vmem:[%s11079_s17 + $0x11d4] ss:$12 sps:$4 sm:$0xff]   ;;  %v10126_v30 = vld [vmem:[%s11079_s17 + $0x1050] ss:$12 sps:$4 sm:$0xff]  }
 0x438   : > { %7149 = vmatpush1.bf16.msra.mxu1 %v10081_v60  ;;  %v6816_v19 = vpop.f32.mrf.mxu0  ;;  %7109 = vmatprep.subr.bf16.mxu0 %v10086_v7  ;;  %v10125_v60 = vld [vmem:[%s11079_s17 + $0x11ec] ss:$12 sps:$4 sm:$0xff]   ;;  %v10129_v7 = vld [vmem:[%s11079_s17 + $0x11d0] ss:$12 sps:$4 sm:$0xff]  }
 0x439   : > { %v6857_v20 = vpop.f32.mrf.mxu1  ;;  %7150 = vmatprep.subr.bf16.mxu1 %v10089_v11  ;;  %v10134_v11 = vld [vmem:[%s11079_s17 + $0x103c] ss:$12 sps:$4 sm:$0xff]   ;;  %v10140_v6 = vld [vmem:[%s11079_s17 + $0x1024] ss:$12 sps:$4 sm:$0xff]   ;;  %v10138_v19 = vld [vmem:[%s11079_s17 + $0x1020] ss:$12 sps:$4 sm:$0xff]  }
 0x43a   : > { %v10137_v13 = vld [vmem:[%s11079_s17 + $0x11bc] ss:$12 sps:$4 sm:$0xff]   ;;  %v10143_v17 = vld [vmem:[%s11079_s17 + $0x11a4] ss:$12 sps:$4 sm:$0xff]   ;;  %v10141_v20 = vld [vmem:[%s11079_s17 + $0x11a0] ss:$12 sps:$4 sm:$0xff]  }
 0x43b   : > { %7110 = vmatpush1.bf16.msra.mxu0 %v10084_v14  ;;  %v10132_v14 = vld [vmem:[%s11079_s17 + $0x1038] ss:$12 sps:$4 sm:$0xff]  }
 0x43c   : > { %7151 = vmatpush1.bf16.msra.mxu1 %v10087_v16  ;;  %7111 = vmatprep.subr.bf16.mxu0 %v10092_v49  ;;  %v10135_v16 = vld [vmem:[%s11079_s17 + $0x11b8] ss:$12 sps:$4 sm:$0xff]  }
 0x43d   : > { %7152 = vmatprep.subr.bf16.mxu1 %v10095_v23  ;;  %v10146_v49 = vld [vmem:[%s11079_s17 + $0x100c] ss:$12 sps:$4 sm:$0xff]  }
 0x43e   : > { %v10149_v23 = vld [vmem:[%s11079_s17 + $0x118c] ss:$12 sps:$4 sm:$0xff]  }
 0x43f   : > { %7112 = vmatpush1.bf16.msra.mxu0 %v10090_v24  ;;  %v10144_v24 = vld [vmem:[%s11079_s17 + $0x1008] ss:$12 sps:$4 sm:$0xff]  }
 0x440   : > { %7153 = vmatpush1.bf16.msra.mxu1 %v10093_v25  ;;  %7113 = vmatprep.subr.bf16.mxu0 %v10098_v26  ;;  %v10147_v25 = vld [vmem:[%s11079_s17 + $0x1188] ss:$12 sps:$4 sm:$0xff]  }
 0x441   : > { %7154 = vmatprep.subr.bf16.mxu1 %v10101_v27  ;;  %v10152_v26 = vld [vmem:[%s11079_s17 + $0xff4] ss:$12 sps:$4 sm:$0xff]  }
 0x442   : > { %v10155_v27 = vld [vmem:[%s11079_s17 + $0x1174] ss:$12 sps:$4 sm:$0xff]  }
 0x443   : > { %7114 = vmatpush1.bf16.msra.mxu0 %v10096_v28  ;;  %v1293_v28 = vld [vmem:[#allocation2 + $0x30] sm:$0xff] }
 0x444   : > { %7155 = vmatpush1.bf16.msra.mxu1 %v10099_v32  ;;  %7115 = vmatprep.subr.bf16.mxu0 %v10104_v33  ;;  %v10150_v32 = vld [vmem:[%s11079_s17 + $0xff0] ss:$12 sps:$4 sm:$0xff]  }
 0x445   : > { %7156 = vmatprep.subr.bf16.mxu1 %v10107_v34  ;;  %v10153_v33 = vld [vmem:[%s11079_s17 + $0x1170] ss:$12 sps:$4 sm:$0xff]  }
 0x446   : > { %v10158_v34 = vld [vmem:[%s11079_s17 + $0xfdc] ss:$12 sps:$4 sm:$0xff]  }
 0x447   : > { %7116 = vmatpush1.bf16.msra.mxu0 %v10102_v36  ;;  %v10161_v36 = vld [vmem:[%s11079_s17 + $0x115c] ss:$12 sps:$4 sm:$0xff]  }
 0x448   : > { %7157 = vmatpush1.bf16.msra.mxu1 %v10105_v39  ;;  %7117 = vmatprep.subr.bf16.mxu0 %v10110_v40  ;;  %v1407_v39 = vcombine.high %v1293_v28, %v1293_v28  ;;  %v10156_v40 = vld [vmem:[%s11079_s17 + $0xfd8] ss:$12 sps:$4 sm:$0xff]  }
 0x449   : > { %7158 = vmatprep.subr.bf16.mxu1 %v10113_v41  ;;  %v10159_v41 = vld [vmem:[%s11079_s17 + $0x1158] ss:$12 sps:$4 sm:$0xff]  }
 0x44b   : > { %7118 = vmatpush1.bf16.msra.mxu0 %v10108_v45  ;;  %v10164_v45 = vld [vmem:[%s11079_s17 + $0xfc4] ss:$12 sps:$4 sm:$0xff]  }
 0x44c   : > { %7159 = vmatpush1.bf16.msra.mxu1 %v10111_v46  ;;  %7119 = vmatprep.subr.bf16.mxu0 %v10116_v47  ;;  %v10167_v46 = vld [vmem:[%s11079_s17 + $0x1144] ss:$12 sps:$4 sm:$0xff]   ;;  %v11793_v47 = vrot.slane %v1293_v28, %v11304_v54 }
 0x44d   : > { %7160 = vmatprep.subr.bf16.mxu1 %v10119_v50  ;;  %v11796_v50 = vrot.slane %v1407_v39, %v11304_v54  ;;  %v10192_v39 = vld [vmem:[%s11079_s17 + $0x13e4] ss:$12 sps:$4 sm:$0xff]  }
 0x44f   : > { %7120 = vmatpush1.bf16.msra.mxu0 %v10114_v0  ;;  %v10162_v0 = vld [vmem:[%s11079_s17 + $0xfc0] ss:$12 sps:$4 sm:$0xff]  }
 0x450   : > { %7161 = vmatpush1.bf16.msra.mxu1 %v10117_v56  ;;  %7121 = vmatprep.subr.bf16.mxu0 %v10122_v59  ;;  %v10165_v56 = vld [vmem:[%s11079_s17 + $0x1140] ss:$12 sps:$4 sm:$0xff]  }
 0x451   : > { %7162 = vmatprep.subr.bf16.mxu1 %v10125_v60  ;;  %v10171_v59 = vld [vmem:[%s11079_s17 + $0x12ac] ss:$12 sps:$4 sm:$0xff]  }
 0x452   : > { %v10174_v60 = vld [vmem:[%s11079_s17 + $0x142c] ss:$12 sps:$4 sm:$0xff]  }
 0x453   : > { %7122 = vmatpush2.bf16.msra.mxu0 %v10120_v29  ;;  %v10169_v29 = vld [vmem:[%s11079_s17 + $0x12a8] ss:$12 sps:$4 sm:$0xff]  }
 0x454   : > { %7163 = vmatpush2.bf16.msra.mxu1 %v10123_v2  ;;  %7123 = vmatprep.subr.bf16.mxu0 %v10128_v31  ;;  %v10172_v2 = vld [vmem:[%s11079_s17 + $0x1428] ss:$12 sps:$4 sm:$0xff]   ;;  %v1422_v31 = vcombine.high %v11793_v47, %v11793_v47 }
 0x455   : > { %7164 = vmatprep.subr.bf16.mxu1 %v10131_v4  ;;  %v1423_v4 = vcombine.high %v11796_v50, %v11796_v50 }
 0x457   : > { %7124 = vmatpush2.bf16.msra.mxu0 %v10126_v30  ;;  %v11810_v30 = vpack.c.bf16 %v11697_v35, %v11697_v35 }
 0x458   : > { %7165 = vmatpush2.bf16.msra.mxu1 %v10129_v7  ;;  %7125 = vmatprep.subr.bf16.mxu0 %v10134_v11  ;;  %v11814_v7 = vpack.c.bf16 %v11700_v5, %v11700_v5  ;;  %v10177_v11 = vld [vmem:[%s11079_s17 + $0x1294] ss:$12 sps:$4 sm:$0xff]  }
 0x459   : > { %7166 = vmatprep.subr.bf16.mxu1 %v10137_v13  ;;  %v10180_v13 = vld [vmem:[%s11079_s17 + $0x1414] ss:$12 sps:$4 sm:$0xff]  }
 0x45b   : > { %7126 = vmatpush2.bf16.msra.mxu0 %v10132_v14  ;;  %v10175_v14 = vld [vmem:[%s11079_s17 + $0x1290] ss:$12 sps:$4 sm:$0xff]  }
 0x45c   : > { %7167 = vmatpush2.bf16.msra.mxu1 %v10135_v16  ;;  %7127 = vmatprep.subr.bf16.mxu0 %v10140_v6  ;;  %v11819_v16 = vpack.c.bf16 %v1422_v31, %v1422_v31  ;;  %v11821_v6 = vpack.c.bf16 %v1423_v4, %v1423_v4  ;;  %v10207_v31 = vld [vmem:[%s11079_s17 + $0x121c] ss:$12 sps:$4 sm:$0xff]  }
 0x45d   : > { %7168 = vmatprep.subr.bf16.mxu1 %v10143_v17  ;;  %v10210_v4 = vld [vmem:[%s11079_s17 + $0x139c] ss:$12 sps:$4 sm:$0xff]  }
 0x45f   : > { %7128 = vmatpush2.bf16.msra.mxu0 %v10138_v19  ;;  %v10178_v19 = vld [vmem:[%s11079_s17 + $0x1410] ss:$12 sps:$4 sm:$0xff]  }
 0x460   : > { %7169 = vmatpush2.bf16.msra.mxu1 %v10141_v20  ;;  %7129 = vmatprep.subr.bf16.mxu0 %v10146_v49 }
 0x461   : > { %7170 = vmatprep.subr.bf16.mxu1 %v10149_v23  ;;  %v10183_v23 = vld [vmem:[%s11079_s17 + $0x127c] ss:$12 sps:$4 sm:$0xff]  }
 0x463   : > { %7130 = vmatpush2.bf16.msra.mxu0 %v10144_v24  ;;  %v10186_v24 = vld [vmem:[%s11079_s17 + $0x13fc] ss:$12 sps:$4 sm:$0xff]  }
 0x464   : > { %7171 = vmatpush2.bf16.msra.mxu1 %v10147_v25  ;;  %7131 = vmatprep.subr.bf16.mxu0 %v10152_v26 }
 0x465   : > { %7172 = vmatprep.subr.bf16.mxu1 %v10155_v27 }
 0x467   : > { %7132 = vmatpush2.bf16.msra.mxu0 %v10150_v32  ;;  %v10181_v32 = vld [vmem:[%s11079_s17 + $0x1278] ss:$12 sps:$4 sm:$0xff]  }
 0x468   : > { %7173 = vmatpush2.bf16.msra.mxu1 %v10153_v33  ;;  %7133 = vmatprep.subr.bf16.mxu0 %v10158_v34  ;;  %v10184_v33 = vld [vmem:[%s11079_s17 + $0x13f8] ss:$12 sps:$4 sm:$0xff]  }
 0x469   : > { %7174 = vmatprep.subr.bf16.mxu1 %v10161_v36 }
 0x46b   : > { %7134 = vmatpush2.bf16.msra.mxu0 %v10156_v40  ;;  %v10187_v40 = vld [vmem:[%s11079_s17 + $0x1260] ss:$12 sps:$4 sm:$0xff]  }
 0x46c   : > { %7175 = vmatpush2.bf16.msra.mxu1 %v10159_v41  ;;  %7135 = vmatprep.subr.bf16.mxu0 %v10164_v45  ;;  %v10190_v41 = vld [vmem:[%s11079_s17 + $0x13e0] ss:$12 sps:$4 sm:$0xff]  }
 0x46d   : > { %7176 = vmatprep.subr.bf16.mxu1 %v10167_v46  ;;  %v10195_v45 = vld [vmem:[%s11079_s17 + $0x124c] ss:$12 sps:$4 sm:$0xff]  }
 0x46e   : > { %v10198_v46 = vld [vmem:[%s11079_s17 + $0x13cc] ss:$12 sps:$4 sm:$0xff]  }
 0x46f   : > { %7136 = vmatpush2.bf16.msra.mxu0 %v10162_v0  ;;  %v10193_v0 = vld [vmem:[%s11079_s17 + $0x1248] ss:$12 sps:$4 sm:$0xff]  }
 0x470   : > { %7177 = vmatpush2.bf16.msra.mxu1 %v10165_v56  ;;  %7187 = vmatprep.subr.bf16.mxu0 %v10171_v59  ;;  %v10196_v56 = vld [vmem:[%s11079_s17 + $0x13c8] ss:$12 sps:$4 sm:$0xff]  }
 0x471   : > { %7228 = vmatprep.subr.bf16.mxu1 %v10174_v60  ;;  %v10201_v59 = vld [vmem:[%s11079_s17 + $0x1234] ss:$12 sps:$4 sm:$0xff]  }
 0x472   : > { %v6893_v35 = vpop.f32.mrf.mxu0  ;;  %7138 = vmatmul.mubr.bf16.vlgmr.msra.gmra.mxu0 %v11810_v30  ;;  %v10204_v60 = vld [vmem:[%s11079_s17 + $0x13b4] ss:$12 sps:$4 sm:$0xff]  }
 0x473   : > { %v6934_v17 = vpop.f32.mrf.mxu1  ;;  %7179 = vmatmul.mubr.bf16.vlgmr.msra.gmra.mxu1 %v11814_v7  ;;  %v6894_v5 = vadd.f32 %v6893_v35, %v11733_v12  ;;  %7188 = vmatpush1.bf16.msra.mxu0 %v10169_v29  ;;  %v10199_v29 = vld [vmem:[%s11079_s17 + $0x1230] ss:$12 sps:$4 sm:$0xff]  }
 0x474   : > { %7229 = vmatpush1.bf16.msra.mxu1 %v10172_v2  ;;  %v6895_v20 = vpop.f32.mrf.mxu0  ;;  %7189 = vmatprep.subr.bf16.mxu0 %v10177_v11  ;;  %v10202_v2 = vld [vmem:[%s11079_s17 + $0x13b0] ss:$12 sps:$4 sm:$0xff]   ;;  %v10205_v11 = vld [vmem:[%s11079_s17 + $0x1218] ss:$12 sps:$4 sm:$0xff]  }
 0x475   : > { %v6936_v49 = vpop.f32.mrf.mxu1  ;;  %7230 = vmatprep.subr.bf16.mxu1 %v10180_v13  ;;  %v11829_v25 = vadd.f32 %v6934_v17, %v6894_v5  ;;  %v6896_v26 = vadd.f32 %v6895_v20, %v11740_v18  ;;  %7219 = vmatprep.mubr.bf16.mxu0 %v11819_v16  ;;  %v10189_v18 = vld [vmem:[%s11079_s17 + $0x1264] ss:$12 sps:$4 sm:$0xff]   ;;  %v10211_v17 = vld [vmem:[%s11079_s17 + $0x1200] ss:$12 sps:$4 sm:$0xff]  }
 0x476   : > { %7260 = vmatprep.mubr.bf16.mxu1 %v11821_v6  ;;  %v6897_v12 = vpop.f32.mrf.mxu0  ;;  %v10208_v13 = vld [vmem:[%s11079_s17 + $0x1398] ss:$12 sps:$4 sm:$0xff]   ;;  %v10214_v5 = vld [vmem:[%s11079_s17 + $0x1380] ss:$12 sps:$4 sm:$0xff]  }
 0x477   : > { %v6938_v27 = vpop.f32.mrf.mxu1  ;;  %v11834_v28 = vadd.f32 %v6936_v49, %v6896_v26  ;;  %7190 = vmatpush1.bf16.msra.mxu0 %v10175_v14  ;;  %v10213_v14 = vld [vmem:[%s11079_s17 + $0x1204] ss:$12 sps:$4 sm:$0xff]   ;;  %v10222_v20 = vld [vmem:[%s11079_s17 + $0x14ec] ss:$12 sps:$4 sm:$0xff]   ;;  %v10217_v49 = vld [vmem:[%s11079_s17 + $0x1368] ss:$12 sps:$4 sm:$0xff]  }
 0x478   : > { %7231 = vmatpush1.bf16.msra.mxu1 %v10178_v19  ;;  %v6898_v34 = vpop.f32.mrf.mxu0  ;;  %7191 = vmatprep.subr.bf16.mxu0 %v10183_v23  ;;  %v10216_v35 = vld [vmem:[%s11079_s17 + $0x1384] ss:$12 sps:$4 sm:$0xff]   ;;  %v10219_v19 = vld [vmem:[%s11079_s17 + $0x136c] ss:$12 sps:$4 sm:$0xff]   ;;  %v10220_v23 = vld [vmem:[%s11079_s17 + $0x14e8] ss:$12 sps:$4 sm:$0xff]  }
 0x479   : > { %v6939_v36 = vpop.f32.mrf.mxu1  ;;  %7232 = vmatprep.subr.bf16.mxu1 %v10186_v24  ;;  %v10225_v24 = vld [vmem:[%s11079_s17 + $0x1354] ss:$12 sps:$4 sm:$0xff]   ;;  %v10223_v12 = vld [vmem:[%s11079_s17 + $0x1350] ss:$12 sps:$4 sm:$0xff]   ;;  %v10229_v34 = vld [vmem:[%s11079_s17 + $0x1338] ss:$12 sps:$4 sm:$0xff]  }
 0x47a   : > { %v10228_v26 = vld [vmem:[%s11079_s17 + $0x14d4] ss:$12 sps:$4 sm:$0xff]   ;;  %v10226_v27 = vld [vmem:[%s11079_s17 + $0x14d0] ss:$12 sps:$4 sm:$0xff]   ;;  %v10232_v36 = vld [vmem:[%s11079_s17 + $0x14b8] ss:$12 sps:$4 sm:$0xff]  }
 0x47b   : > { %7192 = vmatpush1.bf16.msra.mxu0 %v10181_v32  ;;  %v10231_v32 = vld [vmem:[%s11079_s17 + $0x133c] ss:$12 sps:$4 sm:$0xff]  }
 0x47c   : > { %7233 = vmatpush1.bf16.msra.mxu1 %v10184_v33  ;;  %7193 = vmatprep.subr.bf16.mxu0 %v10189_v18  ;;  %v10234_v33 = vld [vmem:[%s11079_s17 + $0x14bc] ss:$12 sps:$4 sm:$0xff]   ;;  %v10237_v18 = vld [vmem:[%s11079_s17 + $0x1324] ss:$12 sps:$4 sm:$0xff]  }
 0x47d   : > { %7234 = vmatprep.subr.bf16.mxu1 %v10192_v39  ;;  %v10240_v39 = vld [vmem:[%s11079_s17 + $0x14a4] ss:$12 sps:$4 sm:$0xff]  }
 0x47f   : > { %7194 = vmatpush1.bf16.msra.mxu0 %v10187_v40  ;;  %v10235_v40 = vld [vmem:[%s11079_s17 + $0x1320] ss:$12 sps:$4 sm:$0xff]  }
 0x480   : > { %7235 = vmatpush1.bf16.msra.mxu1 %v10190_v41  ;;  %7195 = vmatprep.subr.bf16.mxu0 %v10195_v45  ;;  %v10238_v41 = vld [vmem:[%s11079_s17 + $0x14a0] ss:$12 sps:$4 sm:$0xff]  }
 0x481   : > { %7236 = vmatprep.subr.bf16.mxu1 %v10198_v46  ;;  %v10243_v45 = vld [vmem:[%s11079_s17 + $0x130c] ss:$12 sps:$4 sm:$0xff]  }
 0x482   : > { %v10246_v46 = vld [vmem:[%s11079_s17 + $0x148c] ss:$12 sps:$4 sm:$0xff]  }
 0x483   : > { %7196 = vmatpush1.bf16.msra.mxu0 %v10193_v0  ;;  %v10241_v0 = vld [vmem:[%s11079_s17 + $0x1308] ss:$12 sps:$4 sm:$0xff]  }
 0x484   : > { %7237 = vmatpush1.bf16.msra.mxu1 %v10196_v56  ;;  %7197 = vmatprep.subr.bf16.mxu0 %v10201_v59  ;;  %v10244_v56 = vld [vmem:[%s11079_s17 + $0x1488] ss:$12 sps:$4 sm:$0xff]  }
 0x485   : > { %7238 = vmatprep.subr.bf16.mxu1 %v10204_v60  ;;  %v10249_v59 = vld [vmem:[%s11079_s17 + $0x12f4] ss:$12 sps:$4 sm:$0xff]  }
 0x486   : > { %v10252_v60 = vld [vmem:[%s11079_s17 + $0x1474] ss:$12 sps:$4 sm:$0xff]  }
 0x487   : > { %7198 = vmatpush1.bf16.msra.mxu0 %v10199_v29  ;;  %v10247_v29 = vld [vmem:[%s11079_s17 + $0x12f0] ss:$12 sps:$4 sm:$0xff]  }
 0x488   : > { %7239 = vmatpush1.bf16.msra.mxu1 %v10202_v2  ;;  %7199 = vmatprep.subr.bf16.mxu0 %v10207_v31  ;;  %v1294_v2 = vld [vmem:[#allocation2 + $0x38] sm:$0xff] }
 0x489   : > { %7240 = vmatprep.subr.bf16.mxu1 %v10210_v4  ;;  %v10250_v31 = vld [vmem:[%s11079_s17 + $0x1470] ss:$12 sps:$4 sm:$0xff]  }
 0x48a   : > { %v10255_v4 = vld [vmem:[%s11079_s17 + $0x12dc] ss:$12 sps:$4 sm:$0xff]  }
 0x48b   : > { %7200 = vmatpush1.bf16.msra.mxu0 %v10205_v11  ;;  %v10258_v11 = vld [vmem:[%s11079_s17 + $0x145c] ss:$12 sps:$4 sm:$0xff]  }
 0x48c   : > { %7241 = vmatpush1.bf16.msra.mxu1 %v10208_v13  ;;  %7201 = vmatprep.subr.bf16.mxu0 %v10213_v14  ;;  %v10253_v13 = vld [vmem:[%s11079_s17 + $0x12d8] ss:$12 sps:$4 sm:$0xff]   ;;  %v1424_v14 = vcombine.high %v1294_v2, %v1294_v2 }
 0x48d   : > { %7242 = vmatprep.subr.bf16.mxu1 %v10216_v35  ;;  %v10256_v35 = vld [vmem:[%s11079_s17 + $0x1458] ss:$12 sps:$4 sm:$0xff]  }
 0x48f   : > { %7202 = vmatpush1.bf16.msra.mxu0 %v10211_v17  ;;  %v10261_v17 = vld [vmem:[%s11079_s17 + $0x12c4] ss:$12 sps:$4 sm:$0xff]  }
 0x490   : > { %7243 = vmatpush1.bf16.msra.mxu1 %v10214_v5  ;;  %7203 = vmatprep.subr.bf16.mxu0 %v10219_v19  ;;  %v10264_v5 = vld [vmem:[%s11079_s17 + $0x1444] ss:$12 sps:$4 sm:$0xff]   ;;  %v10259_v19 = vld [vmem:[%s11079_s17 + $0x12c0] ss:$12 sps:$4 sm:$0xff]  }
 0x491   : > { %7244 = vmatprep.subr.bf16.mxu1 %v10222_v20  ;;  %v11890_v20 = vrot.slane %v1294_v2, %v11304_v54 }
 0x493   : > { %7204 = vmatpush2.bf16.msra.mxu0 %v10217_v49  ;;  %v11893_v49 = vrot.slane %v1424_v14, %v11304_v54 }
 0x494   : > { %7245 = vmatpush2.bf16.msra.mxu1 %v10220_v23  ;;  %7205 = vmatprep.subr.bf16.mxu0 %v10225_v24  ;;  %v10262_v23 = vld [vmem:[%s11079_s17 + $0x1440] ss:$12 sps:$4 sm:$0xff]  }
 0x495   : > { %7246 = vmatprep.subr.bf16.mxu1 %v10228_v26  ;;  %v10268_v24 = vld [vmem:[%s11079_s17 + $0x15ac] ss:$12 sps:$4 sm:$0xff]  }
 0x496   : > { %v10271_v26 = vld [vmem:[%s11079_s17 + $0x172c] ss:$12 sps:$4 sm:$0xff]  }
 0x497   : > { %7206 = vmatpush2.bf16.msra.mxu0 %v10223_v12  ;;  %v10266_v12 = vld [vmem:[%s11079_s17 + $0x15a8] ss:$12 sps:$4 sm:$0xff]  }
 0x498   : > { %7247 = vmatpush2.bf16.msra.mxu1 %v10226_v27  ;;  %7207 = vmatprep.subr.bf16.mxu0 %v10231_v32  ;;  %v10269_v27 = vld [vmem:[%s11079_s17 + $0x1728] ss:$12 sps:$4 sm:$0xff]   ;;  %v1439_v32 = vcombine.high %v11890_v20, %v11890_v20 }
 0x499   : > { %7248 = vmatprep.subr.bf16.mxu1 %v10234_v33  ;;  %v1440_v33 = vcombine.high %v11893_v49, %v11893_v49 }
 0x49b   : > { %7208 = vmatpush2.bf16.msra.mxu0 %v10229_v34  ;;  %v11906_v34 = vpack.c.bf16 %v11793_v47, %v11793_v47 }
 0x49c   : > { %7249 = vmatpush2.bf16.msra.mxu1 %v10232_v36  ;;  %7209 = vmatprep.subr.bf16.mxu0 %v10237_v18  ;;  %v11910_v36 = vpack.c.bf16 %v11796_v50, %v11796_v50  ;;  %v10274_v18 = vld [vmem:[%s11079_s17 + $0x1594] ss:$12 sps:$4 sm:$0xff]  }
 0x49d   : > { %7250 = vmatprep.subr.bf16.mxu1 %v10240_v39  ;;  %v10277_v39 = vld [vmem:[%s11079_s17 + $0x1714] ss:$12 sps:$4 sm:$0xff]  }
 0x49f   : > { %7210 = vmatpush2.bf16.msra.mxu0 %v10235_v40  ;;  %v10272_v40 = vld [vmem:[%s11079_s17 + $0x1590] ss:$12 sps:$4 sm:$0xff]  }
 0x4a0   : > { %7251 = vmatpush2.bf16.msra.mxu1 %v10238_v41  ;;  %7211 = vmatprep.subr.bf16.mxu0 %v10243_v45  ;;  %v10275_v41 = vld [vmem:[%s11079_s17 + $0x1710] ss:$12 sps:$4 sm:$0xff]   ;;  %v11916_v45 = vpack.c.bf16 %v1439_v32, %v1439_v32  ;;  %v10298_v32 = vld [vmem:[%s11079_s17 + $0x1534] ss:$12 sps:$4 sm:$0xff]  }
 0x4a1   : > { %7252 = vmatprep.subr.bf16.mxu1 %v10246_v46  ;;  %v11918_v46 = vpack.c.bf16 %v1440_v33, %v1440_v33  ;;  %v10301_v33 = vld [vmem:[%s11079_s17 + $0x16b4] ss:$12 sps:$4 sm:$0xff]  }
 0x4a3   : > { %7212 = vmatpush2.bf16.msra.mxu0 %v10241_v0 }
 0x4a4   : > { %7253 = vmatpush2.bf16.msra.mxu1 %v10244_v56  ;;  %7213 = vmatprep.subr.bf16.mxu0 %v10249_v59 }
 0x4a5   : > { %7254 = vmatprep.subr.bf16.mxu1 %v10252_v60  ;;  %v10280_v60 = vld [vmem:[%s11079_s17 + $0x157c] ss:$12 sps:$4 sm:$0xff]  }
 0x4a7   : > { %7214 = vmatpush2.bf16.msra.mxu0 %v10247_v29  ;;  %v10283_v29 = vld [vmem:[%s11079_s17 + $0x16fc] ss:$12 sps:$4 sm:$0xff]  }
 0x4a8   : > { %7255 = vmatpush2.bf16.msra.mxu1 %v10250_v31  ;;  %7215 = vmatprep.subr.bf16.mxu0 %v10255_v4  ;;  %v10278_v4 = vld [vmem:[%s11079_s17 + $0x1578] ss:$12 sps:$4 sm:$0xff]  }
 0x4a9   : > { %7256 = vmatprep.subr.bf16.mxu1 %v10258_v11  ;;  %v10281_v11 = vld [vmem:[%s11079_s17 + $0x16f8] ss:$12 sps:$4 sm:$0xff]  }
 0x4ab   : > { %7216 = vmatpush2.bf16.msra.mxu0 %v10253_v13 }
 0x4ac   : > { %7257 = vmatpush2.bf16.msra.mxu1 %v10256_v35  ;;  %7217 = vmatprep.subr.bf16.mxu0 %v10261_v17 }
 0x4ad   : > { %7258 = vmatprep.subr.bf16.mxu1 %v10264_v5  ;;  %v10289_v5 = vld [vmem:[%s11079_s17 + $0x16e4] ss:$12 sps:$4 sm:$0xff]  }
 0x4af   : > { %7218 = vmatpush2.bf16.msra.mxu0 %v10259_v19  ;;  %v10284_v19 = vld [vmem:[%s11079_s17 + $0x1560] ss:$12 sps:$4 sm:$0xff]  }
 0x4b0   : > { %7259 = vmatpush2.bf16.msra.mxu1 %v10262_v23  ;;  %7269 = vmatprep.subr.bf16.mxu0 %v10268_v24  ;;  %v10287_v23 = vld [vmem:[%s11079_s17 + $0x16e0] ss:$12 sps:$4 sm:$0xff]  }
 0x4b1   : > { %7310 = vmatprep.subr.bf16.mxu1 %v10271_v26  ;;  %v10292_v24 = vld [vmem:[%s11079_s17 + $0x154c] ss:$12 sps:$4 sm:$0xff]  }
 0x4b2   : > { %v6975_v47 = vpop.f32.mrf.mxu0  ;;  %7220 = vmatmul.mubr.bf16.vlgmr.msra.gmra.mxu0 %v11906_v34  ;;  %v10295_v26 = vld [vmem:[%s11079_s17 + $0x16cc] ss:$12 sps:$4 sm:$0xff]  }
 0x4b3   : > { %v7016_v0 = vpop.f32.mrf.mxu1  ;;  %7261 = vmatmul.mubr.bf16.vlgmr.msra.gmra.mxu1 %v11910_v36  ;;  %v6976_v50 = vadd.f32 %v6975_v47, %v11829_v25  ;;  %7270 = vmatpush1.bf16.msra.mxu0 %v10266_v12  ;;  %v10290_v12 = vld [vmem:[%s11079_s17 + $0x1548] ss:$12 sps:$4 sm:$0xff]   ;;  %v10302_v47 = vld [vmem:[%s11079_s17 + $0x1518] ss:$12 sps:$4 sm:$0xff]  }
 0x4b4   : > { %7311 = vmatpush1.bf16.msra.mxu1 %v10269_v27  ;;  %v6977_v56 = vpop.f32.mrf.mxu0  ;;  %7271 = vmatprep.subr.bf16.mxu0 %v10274_v18  ;;  %v10293_v27 = vld [vmem:[%s11079_s17 + $0x16c8] ss:$12 sps:$4 sm:$0xff]   ;;  %v10296_v18 = vld [vmem:[%s11079_s17 + $0x1530] ss:$12 sps:$4 sm:$0xff]  }
 0x4b5   : > { %v7018_v59 = vpop.f32.mrf.mxu1  ;;  %7312 = vmatprep.subr.bf16.mxu1 %v10277_v39  ;;  %v11925_v2 = vadd.f32 %v7016_v0, %v6976_v50  ;;  %v6978_v31 = vadd.f32 %v6977_v56, %v11834_v28  ;;  %7301 = vmatprep.mubr.bf16.mxu0 %v11916_v45  ;;  %v10286_v28 = vld [vmem:[%s11079_s17 + $0x1564] ss:$12 sps:$4 sm:$0xff]  }
 0x4b6   : > { %7342 = vmatprep.mubr.bf16.mxu1 %v11918_v46  ;;  %v6979_v25 = vpop.f32.mrf.mxu0  ;;  %v10299_v39 = vld [vmem:[%s11079_s17 + $0x16b0] ss:$12 sps:$4 sm:$0xff]   ;;  %v10305_v0 = vld [vmem:[%s11079_s17 + $0x1698] ss:$12 sps:$4 sm:$0xff]  }
 0x4b7   : > { %v7020_v13 = vpop.f32.mrf.mxu1  ;;  %v11932_v14 = vadd.f32 %v7018_v59, %v6978_v31  ;;  %7272 = vmatpush1.bf16.msra.mxu0 %v10272_v40  ;;  %v10304_v40 = vld [vmem:[%s11079_s17 + $0x151c] ss:$12 sps:$4 sm:$0xff]   ;;  %v10310_v50 = vld [vmem:[%s11079_s17 + $0x1504] ss:$12 sps:$4 sm:$0xff]   ;;  %v10308_v59 = vld [vmem:[%s11079_s17 + $0x1500] ss:$12 sps:$4 sm:$0xff]  }
 0x4b8   : > { %7313 = vmatpush1.bf16.msra.mxu1 %v10275_v41  ;;  %v6980_v35 = vpop.f32.mrf.mxu0  ;;  %7273 = vmatprep.subr.bf16.mxu0 %v10280_v60  ;;  %v10307_v41 = vld [vmem:[%s11079_s17 + $0x169c] ss:$12 sps:$4 sm:$0xff]   ;;  %v10313_v56 = vld [vmem:[%s11079_s17 + $0x1684] ss:$12 sps:$4 sm:$0xff]   ;;  %v10311_v60 = vld [vmem:[%s11079_s17 + $0x1680] ss:$12 sps:$4 sm:$0xff]  }
 0x4b9   : > { %v7021_v17 = vpop.f32.mrf.mxu1  ;;  %7314 = vmatprep.subr.bf16.mxu1 %v10283_v29  ;;  %v10316_v29 = vld [vmem:[%s11079_s17 + $0x166c] ss:$12 sps:$4 sm:$0xff]   ;;  %v10322_v25 = vld [vmem:[%s11079_s17 + $0x1654] ss:$12 sps:$4 sm:$0xff]   ;;  %v10320_v35 = vld [vmem:[%s11079_s17 + $0x1650] ss:$12 sps:$4 sm:$0xff]  }
 0x4ba   : > { %v10319_v31 = vld [vmem:[%s11079_s17 + $0x17ec] ss:$12 sps:$4 sm:$0xff]   ;;  %v10325_v13 = vld [vmem:[%s11079_s17 + $0x17d4] ss:$12 sps:$4 sm:$0xff]   ;;  %v10323_v17 = vld [vmem:[%s11079_s17 + $0x17d0] ss:$12 sps:$4 sm:$0xff]  }
 0x4bb   : > { %7274 = vmatpush1.bf16.msra.mxu0 %v10278_v4  ;;  %v10314_v4 = vld [vmem:[%s11079_s17 + $0x1668] ss:$12 sps:$4 sm:$0xff]  }
 0x4bc   : > { %7315 = vmatpush1.bf16.msra.mxu1 %v10281_v11  ;;  %7275 = vmatprep.subr.bf16.mxu0 %v10286_v28  ;;  %v10317_v11 = vld [vmem:[%s11079_s17 + $0x17e8] ss:$12 sps:$4 sm:$0xff]  }
 0x4bd   : > { %7316 = vmatprep.subr.bf16.mxu1 %v10289_v5  ;;  %v10328_v28 = vld [vmem:[%s11079_s17 + $0x163c] ss:$12 sps:$4 sm:$0xff]  }
 0x4be   : > { %v10331_v5 = vld [vmem:[%s11079_s17 + $0x17bc] ss:$12 sps:$4 sm:$0xff]  }
 0x4bf   : > { %7276 = vmatpush1.bf16.msra.mxu0 %v10284_v19  ;;  %v10326_v19 = vld [vmem:[%s11079_s17 + $0x1638] ss:$12 sps:$4 sm:$0xff]  }
 0x4c0   : > { %7317 = vmatpush1.bf16.msra.mxu1 %v10287_v23  ;;  %7277 = vmatprep.subr.bf16.mxu0 %v10292_v24  ;;  %v10329_v23 = vld [vmem:[%s11079_s17 + $0x17b8] ss:$12 sps:$4 sm:$0xff]  }
 0x4c1   : > { %7318 = vmatprep.subr.bf16.mxu1 %v10295_v26  ;;  %v10334_v24 = vld [vmem:[%s11079_s17 + $0x1624] ss:$12 sps:$4 sm:$0xff]  }
 0x4c2   : > { %v10337_v26 = vld [vmem:[%s11079_s17 + $0x17a4] ss:$12 sps:$4 sm:$0xff]  }
 0x4c3   : > { %7278 = vmatpush1.bf16.msra.mxu0 %v10290_v12  ;;  %v10332_v12 = vld [vmem:[%s11079_s17 + $0x1620] ss:$12 sps:$4 sm:$0xff]  }
 0x4c4   : > { %7319 = vmatpush1.bf16.msra.mxu1 %v10293_v27  ;;  %7279 = vmatprep.subr.bf16.mxu0 %v10298_v32  ;;  %v10335_v27 = vld [vmem:[%s11079_s17 + $0x17a0] ss:$12 sps:$4 sm:$0xff]  }
 0x4c5   : > { %7320 = vmatprep.subr.bf16.mxu1 %v10301_v33  ;;  %v10340_v32 = vld [vmem:[%s11079_s17 + $0x160c] ss:$12 sps:$4 sm:$0xff]  }
 0x4c6   : > { %v10343_v33 = vld [vmem:[%s11079_s17 + $0x178c] ss:$12 sps:$4 sm:$0xff]  }
 0x4c7   : > { %7280 = vmatpush1.bf16.msra.mxu0 %v10296_v18  ;;  %v10338_v18 = vld [vmem:[%s11079_s17 + $0x1608] ss:$12 sps:$4 sm:$0xff]  }
 0x4c8   : > { %7321 = vmatpush1.bf16.msra.mxu1 %v10299_v39  ;;  %7281 = vmatprep.subr.bf16.mxu0 %v10304_v40  ;;  %v10341_v39 = vld [vmem:[%s11079_s17 + $0x1788] ss:$12 sps:$4 sm:$0xff]  }
 0x4c9   : > { %7322 = vmatprep.subr.bf16.mxu1 %v10307_v41  ;;  %v10346_v40 = vld [vmem:[%s11079_s17 + $0x15f4] ss:$12 sps:$4 sm:$0xff]  }
 0x4ca   : > { %v10349_v41 = vld [vmem:[%s11079_s17 + $0x1774] ss:$12 sps:$4 sm:$0xff]  }
 0x4cb   : > { %7282 = vmatpush1.bf16.msra.mxu0 %v10302_v47  ;;  %v10344_v47 = vld [vmem:[%s11079_s17 + $0x15f0] ss:$12 sps:$4 sm:$0xff]  }
 0x4cc   : > { %7323 = vmatpush1.bf16.msra.mxu1 %v10305_v0  ;;  %7283 = vmatprep.subr.bf16.mxu0 %v10310_v50  ;;  %v10347_v0 = vld [vmem:[%s11079_s17 + $0x1770] ss:$12 sps:$4 sm:$0xff]  }
 0x4cd   : > { %7324 = vmatprep.subr.bf16.mxu1 %v10313_v56  ;;  %v10352_v50 = vld [vmem:[%s11079_s17 + $0x15dc] ss:$12 sps:$4 sm:$0xff]  }
 0x4ce   : > { %v10355_v56 = vld [vmem:[%s11079_s17 + $0x175c] ss:$12 sps:$4 sm:$0xff]  }
 0x4cf   : > { %7284 = vmatpush1.bf16.msra.mxu0 %v10308_v59  ;;  %v10350_v59 = vld [vmem:[%s11079_s17 + $0x15d8] ss:$12 sps:$4 sm:$0xff]  }
 0x4d0   : > { %7325 = vmatpush1.bf16.msra.mxu1 %v10311_v60  ;;  %7285 = vmatprep.subr.bf16.mxu0 %v10316_v29  ;;  %v2542_v60 = vld [vmem:[%s11079_s17 + $0x1818] sm:$0xff] }
 0x4d1   : > { %7326 = vmatprep.subr.bf16.mxu1 %v10319_v31  ;;  %v10353_v29 = vld [vmem:[%s11079_s17 + $0x1758] ss:$12 sps:$4 sm:$0xff]  }
 0x4d2   : > { %v10358_v31 = vld [vmem:[%s11079_s17 + $0x15c4] ss:$12 sps:$4 sm:$0xff]  }
 0x4d3   : > { %7286 = vmatpush2.bf16.msra.mxu0 %v10314_v4  ;;  %v10361_v4 = vld [vmem:[%s11079_s17 + $0x1744] ss:$12 sps:$4 sm:$0xff]  }
 0x4d4   : > { %7327 = vmatpush2.bf16.msra.mxu1 %v10317_v11  ;;  %7287 = vmatprep.subr.bf16.mxu0 %v10322_v25  ;;  %v10356_v11 = vld [vmem:[%s11079_s17 + $0x15c0] ss:$12 sps:$4 sm:$0xff]   ;;  %v9061_v25 = vcombine.low %v2542_v60, %v2542_v60 }
 0x4d5   : > { %7328 = vmatprep.subr.bf16.mxu1 %v10325_v13  ;;  %v10359_v13 = vld [vmem:[%s11079_s17 + $0x1740] ss:$12 sps:$4 sm:$0xff]  }
 0x4d7   : > { %7288 = vmatpush2.bf16.msra.mxu0 %v10320_v35  ;;  %v9062_v35 = vcombine.high %v2542_v60, %v2542_v60 }
 0x4d8   : > { %7329 = vmatpush2.bf16.msra.mxu1 %v10323_v17  ;;  %7289 = vmatprep.subr.bf16.mxu0 %v10328_v28  ;;  %v10364_v17 = vld [vmem:[%s11079_s17 + $0x170] ss:$12 sps:$4 sm:$0xff]   ;;  %v6687_v28 = vsel %vm6685_vm12, %v9061_v25, 0  ;;  %v10377_v25 = vld [vmem:[%s11079_s17 + $0x2d8] ss:$12 sps:$4 sm:$0xff]  }
 0x4d9   : > { %7330 = vmatprep.subr.bf16.mxu1 %v10331_v5  ;;  %v10366_v5 = vld [vmem:[%s11079_s17 + $0xb0] ss:$12 sps:$4 sm:$0xff]  }
 0x4db   : > { %7290 = vmatpush2.bf16.msra.mxu0 %v10326_v19  ;;  %v11992_v19 = vpack.c.bf16 %v11890_v20, %v11890_v20 }
 0x4dc   : > { %7331 = vmatpush2.bf16.msra.mxu1 %v10329_v23  ;;  %7291 = vmatprep.subr.bf16.mxu0 %v10334_v24  ;;  %v11996_v23 = vpack.c.bf16 %v11893_v49, %v11893_v49  ;;  %v10369_v24 = vld [vmem:[%s11079_s17 + $0x1804] ss:$12 sps:$4 sm:$0xff]  }
 0x4dd   : > { %7332 = vmatprep.subr.bf16.mxu1 %v10337_v26  ;;  %v10370_v26 = vld [vmem:[%s11079_s17 + $0x158] ss:$12 sps:$4 sm:$0xff]  }
 0x4df   : > { %7292 = vmatpush2.bf16.msra.mxu0 %v10332_v12  ;;  %v10367_v12 = vld [vmem:[%s11079_s17 + $0x1800] ss:$12 sps:$4 sm:$0xff]  }
 0x4e0   : > { %7333 = vmatpush2.bf16.msra.mxu1 %v10335_v27  ;;  %7293 = vmatprep.subr.bf16.mxu0 %v10340_v32  ;;  %v10371_v27 = vld [vmem:[%s11079_s17 + $0x98] ss:$12 sps:$4 sm:$0xff]  }
 0x4e1   : > { %7334 = vmatprep.subr.bf16.mxu1 %v10343_v33  ;;  %v8289_v32 = vld.sshfl [vmem:[#allocation2 + $0x40] sm:$0x3 pattern:$0x76325410] }
 0x4e3   : > { %7294 = vmatpush2.bf16.msra.mxu0 %v10338_v18 }
 0x4e4   : > { %7335 = vmatpush2.bf16.msra.mxu1 %v10341_v39  ;;  %7295 = vmatprep.subr.bf16.mxu0 %v10346_v40  ;;  %v10372_v40 = vld [vmem:[%s11079_s17 + $0x140] ss:$12 sps:$4 sm:$0xff]  }
 0x4e5   : > { %7336 = vmatprep.subr.bf16.mxu1 %v10349_v41  ;;  %v10373_v41 = vld [vmem:[%s11079_s17 + $0x2f0] ss:$12 sps:$4 sm:$0xff]  }
 0x4e7   : > { %7296 = vmatpush2.bf16.msra.mxu0 %v10344_v47 }
 0x4e8   : > { %7337 = vmatpush2.bf16.msra.mxu1 %v10347_v0  ;;  %7297 = vmatprep.subr.bf16.mxu0 %v10352_v50  ;;  %v10855_v50 = vmov 0  }
 0x4e9   : > { %7338 = vmatprep.subr.bf16.mxu1 %v10355_v56  ;;  %v10374_v56 = vld [vmem:[%s11079_s17 + $0x80] ss:$12 sps:$4 sm:$0xff]  }
 0x4eb   : > { %7298 = vmatpush2.bf16.msra.mxu0 %v10350_v59  ;;  %v10375_v59 = vld [vmem:[%s11079_s17 + $0x230] ss:$12 sps:$4 sm:$0xff]  }
 0x4ec   : > { %7339 = vmatpush2.bf16.msra.mxu1 %v10353_v29  ;;  %7299 = vmatprep.subr.bf16.mxu0 %v10358_v31  ;;  %v12014_v29 = vpack.c.bf16 %v8289_v32, %v8289_v32  ;;  %v10389_v32 = vld [vmem:[%s11079_s17 + $0x290] ss:$12 sps:$4 sm:$0xff]  }
 0x4ed   : > { %7340 = vmatprep.subr.bf16.mxu1 %v10361_v4 }
 0x4ef   : > { %7300 = vmatpush2.bf16.msra.mxu0 %v10356_v11  ;;  %v10376_v11 = vld [vmem:[%s11079_s17 + $0x128] ss:$12 sps:$4 sm:$0xff]  }
 0x4f0   : > { %7341 = vmatpush2.bf16.msra.mxu1 %v10359_v13  ;;  %9064 = vmatprep.subr.msk.bf16.mxu0 %vm6685_vm12, %v9062_v35  ;;  %v10379_v13 = vld [vmem:[%s11079_s17 + $0x218] ss:$12 sps:$4 sm:$0xff]   ;;  %v10380_v35 = vld [vmem:[%s11079_s17 + $0x110] ss:$12 sps:$4 sm:$0xff]  }
 0x4f1   : > { %9084 = vmatprep.subr.bf16.mxu1 %v10364_v17  ;;  %v10381_v17 = vld [vmem:[%s11079_s17 + $0x2c0] ss:$12 sps:$4 sm:$0xff]  }
 0x4f2   : > { %v7057_v33 = vpop.f32.mrf.mxu0  ;;  %7302 = vmatmul.mubr.bf16.vlgmr.msra.gmra.mxu0 %v11992_v19 }
 0x4f3   : > { %v7098_v20 = vpop.f32.mrf.mxu1  ;;  %7343 = vmatmul.mubr.bf16.vlgmr.msra.gmra.mxu1 %v11996_v23  ;;  %v7058_v49 = vadd.f32 %v7057_v33, %v11925_v2  ;;  %7364 = vmatpush1.bf16.msra.mxu0 %v6687_v28  ;;  %v10382_v28 = vld [vmem:[%s11079_s17 + $0x50] ss:$12 sps:$4 sm:$0xff]   ;;  %v10390_v33 = vld [vmem:[%s11079_s17 + $0x20] ss:$12 sps:$4 sm:$0xff]  }
 0x4f4   : > { %9085 = vmatpush3.bf16.msra.mxu1 %v10366_v5  ;;  %v7059_v18 = vpop.f32.mrf.mxu0  ;;  %7365 = vmatprep.subr.bf16.mxu0 %v10369_v24  ;;  %v10383_v5 = vld [vmem:[%s11079_s17 + $0x200] ss:$12 sps:$4 sm:$0xff]   ;;  %v10384_v24 = vld [vmem:[%s11079_s17 + $0xf8] ss:$12 sps:$4 sm:$0xff]  }
 0x4f5   : > { %v7100_v39 = vpop.f32.mrf.mxu1  ;;  %9086 = vmatprep.subr.bf16.mxu1 %v10370_v26  ;;  %v12008_v47 = vadd.f32 %v7098_v20, %v7058_v49  ;;  %v7060_v0 = vadd.f32 %v7059_v18, %v11932_v14  ;;  %7383 = vmatprep.mubr.bf16.mxu0 %v10855_v50  ;;  %v10385_v26 = vld [vmem:[%s11079_s17 + $0x2a8] ss:$12 sps:$4 sm:$0xff]   ;;  %v10391_v20 = vld [vmem:[%s11079_s17 + $0x1d0] ss:$12 sps:$4 sm:$0xff]   ;;  %v10393_v18 = vld [vmem:[%s11079_s17 + $0x278] ss:$12 sps:$4 sm:$0xff]  }
 0x4f6   : > { %7424 = vmatprep.mubr.bf16.mxu1 %v11315_v3  ;;  %v7061_v2 = vpop.f32.mrf.mxu0  ;;  %v10378_v3 = vld [vmem:[%s11079_s17 + $0x68] ss:$12 sps:$4 sm:$0xff]   ;;  %v10398_v50 = vld [vmem:[%s11079_s17 + $0x1a0] ss:$12 sps:$4 sm:$0xff]  }
 0x4f7   : > { %v7102_v60 = vpop.f32.mrf.mxu1  ;;  %v12016_v31 = vadd.f32 %v7100_v39, %v7060_v0  ;;  %7366 = vmatpush1.bf16.msra.mxu0 %v10367_v12  ;;  %v10386_v12 = vld [vmem:[%s11079_s17 + $0x38] ss:$12 sps:$4 sm:$0xff]   ;;  %v10392_v49 = vld [vmem:[%s11079_s17 + $0xc8] ss:$12 sps:$4 sm:$0xff]   ;;  %v10397_v0 = vld [vmem:[%s11079_s17 + $0x470] ss:$12 sps:$4 sm:$0xff]  }
 0x4f8   : > { %9087 = vmatpush3.bf16.msra.mxu1 %v10371_v27  ;;  %v7062_v14 = vpop.f32.mrf.mxu0  ;;  %9106 = vmatprep.subr.bf16.mxu0 %v10373_v41  ;;  %v10387_v27 = vld [vmem:[%s11079_s17 + $0x1e8] ss:$12 sps:$4 sm:$0xff]   ;;  %v10396_v41 = vld [vmem:[%s11079_s17 + $0x260] ss:$12 sps:$4 sm:$0xff]   ;;  %v10401_v2 = vld [vmem:[%s11079_s17 + $0x458] ss:$12 sps:$4 sm:$0xff]  }
 0x4f9   : > { %v7103_v4 = vpop.f32.mrf.mxu1  ;;  %9088 = vmatprep.subr.bf16.mxu1 %v10372_v40  ;;  %v10394_v39 = vld [vmem:[%s11079_s17 + $0x8] ss:$12 sps:$4 sm:$0xff]   ;;  %v10395_v40 = vld [vmem:[%s11079_s17 + $0x1b8] ss:$12 sps:$4 sm:$0xff]  }
 0x4fa   : > { %9065 = vmatmul.mubr.msk.bf16.vlgmr.msra.gmra.mxu0 %vm6681_vm13, %v12014_v29  ;;  %v10402_v60 = vld [vmem:[%s11079_s17 + $0x188] ss:$12 sps:$4 sm:$0xff]   ;;  %v10403_v14 = vld [vmem:[%s11079_s17 + $0x398] ss:$12 sps:$4 sm:$0xff]   ;;  %v10404_v4 = vld [vmem:[%s11079_s17 + $0x440] ss:$12 sps:$4 sm:$0xff]  }
 0x4fb   : > { %9107 = vmatpush3.bf16.msra.mxu0 %v10375_v59  ;;  %7464 = vmatprep.mubr.bf16.mxu0 %v11320_v8  ;;  %v10388_v8 = vld [vmem:[%s11079_s17 + $0xe0] ss:$12 sps:$4 sm:$0xff]   ;;  %v10400_v59 = vld [vmem:[%s11079_s17 + $0x248] ss:$12 sps:$4 sm:$0xff]  }
 0x4fc   : > { %9089 = vmatpush3.bf16.msra.mxu1 %v10374_v56  ;;  %9108 = vmatprep.subr.bf16.mxu0 %v10377_v25  ;;  %v10399_v56 = vld [vmem:[%s11079_s17 + $0x3b0] ss:$12 sps:$4 sm:$0xff]   ;;  %v10406_v25 = vld [vmem:[%s11079_s17 + $0x380] ss:$12 sps:$4 sm:$0xff]  }
 0x4fd   : > { %9090 = vmatprep.subr.bf16.mxu1 %v10376_v11  ;;  %v10405_v11 = vld [vmem:[%s11079_s17 + $0x5f0] ss:$12 sps:$4 sm:$0xff]  }
 0x4ff   : > { %9109 = vmatpush3.bf16.msra.mxu0 %v10379_v13  ;;  %v10409_v13 = vld [vmem:[%s11079_s17 + $0x5d8] ss:$12 sps:$4 sm:$0xff]  }
 0x500   : > { %9091 = vmatpush3.bf16.msra.mxu1 %v10378_v3  ;;  %9110 = vmatprep.subr.bf16.mxu0 %v10381_v17  ;;  %v10407_v3 = vld [vmem:[%s11079_s17 + $0x530] ss:$12 sps:$4 sm:$0xff]   ;;  %v10411_v17 = vld [vmem:[%s11079_s17 + $0x518] ss:$12 sps:$4 sm:$0xff]  }
 0x501   : > { %9092 = vmatprep.subr.bf16.mxu1 %v10380_v35  ;;  %v10410_v35 = vld [vmem:[%s11079_s17 + $0x368] ss:$12 sps:$4 sm:$0xff]  }
 0x503   : > { %9111 = vmatpush3.bf16.msra.mxu0 %v10383_v5  ;;  %v10414_v5 = vld [vmem:[%s11079_s17 + $0x350] ss:$12 sps:$4 sm:$0xff]  }
 0x504   : > { %9093 = vmatpush3.bf16.msra.mxu1 %v10382_v28  ;;  %9112 = vmatprep.subr.bf16.mxu0 %v10385_v26  ;;  %v10413_v28 = vld [vmem:[%s11079_s17 + $0x5c0] ss:$12 sps:$4 sm:$0xff]   ;;  %v10417_v26 = vld [vmem:[%s11079_s17 + $0x5a8] ss:$12 sps:$4 sm:$0xff]  }
 0x505   : > { %9094 = vmatprep.subr.bf16.mxu1 %v10384_v24  ;;  %v10415_v24 = vld [vmem:[%s11079_s17 + $0x500] ss:$12 sps:$4 sm:$0xff]  }
 0x507   : > { %9113 = vmatpush3.bf16.msra.mxu0 %v10387_v27  ;;  %v10419_v27 = vld [vmem:[%s11079_s17 + $0x4e8] ss:$12 sps:$4 sm:$0xff]  }
 0x508   : > { %9095 = vmatpush3.bf16.msra.mxu1 %v10386_v12  ;;  %9114 = vmatprep.subr.bf16.mxu0 %v10389_v32  ;;  %v10418_v12 = vld [vmem:[%s11079_s17 + $0x338] ss:$12 sps:$4 sm:$0xff]   ;;  %v10422_v32 = vld [vmem:[%s11079_s17 + $0x320] ss:$12 sps:$4 sm:$0xff]  }
 0x509   : > { %9096 = vmatprep.subr.bf16.mxu1 %v10388_v8  ;;  %v10421_v8 = vld [vmem:[%s11079_s17 + $0x590] ss:$12 sps:$4 sm:$0xff]  }
 0x50b   : > { %9115 = vmatpush3.bf16.msra.mxu0 %v10391_v20  ;;  %v10424_v20 = vld [vmem:[%s11079_s17 + $0x3c8] ss:$12 sps:$4 sm:$0xff]  }
 0x50c   : > { %9097 = vmatpush3.bf16.msra.mxu1 %v10390_v33  ;;  %9116 = vmatprep.subr.bf16.mxu0 %v10393_v18  ;;  %v10423_v33 = vld [vmem:[%s11079_s17 + $0x4d0] ss:$12 sps:$4 sm:$0xff]   ;;  %v10426_v18 = vld [vmem:[%s11079_s17 + $0x308] ss:$12 sps:$4 sm:$0xff]  }
 0x50d   : > { %9098 = vmatprep.subr.bf16.mxu1 %v10392_v49  ;;  %v10425_v49 = vld [vmem:[%s11079_s17 + $0x578] ss:$12 sps:$4 sm:$0xff]  }
 0x50f   : > { %9117 = vmatpush3.bf16.msra.mxu0 %v10395_v40  ;;  %v10428_v40 = vld [vmem:[%s11079_s17 + $0x560] ss:$12 sps:$4 sm:$0xff]  }
 0x510   : > { %9099 = vmatpush3.bf16.msra.mxu1 %v10394_v39  ;;  %9118 = vmatprep.subr.bf16.mxu0 %v10396_v41  ;;  %v10427_v39 = vld [vmem:[%s11079_s17 + $0x4b8] ss:$12 sps:$4 sm:$0xff]   ;;  %v10429_v41 = vld [vmem:[%s11079_s17 + $0x770] ss:$12 sps:$4 sm:$0xff]  }
 0x511   : > { %9128 = vmatprep.subr.bf16.mxu1 %v10397_v0  ;;  %v10430_v0 = vld [vmem:[%s11079_s17 + $0x4a0] ss:$12 sps:$4 sm:$0xff]  }
 0x513   : > { %7425 = vmatmul.mubr.bf16.vlgmr.msra.gmra.mxu1 %v11336_v21  ;;  %9119 = vmatpush3.bf16.msra.mxu0 %v10398_v50  ;;  %v10408_v21 = vld [vmem:[%s11079_s17 + $0x428] ss:$12 sps:$4 sm:$0xff]   ;;  %v10431_v50 = vld [vmem:[%s11079_s17 + $0x6b0] ss:$12 sps:$4 sm:$0xff]  }
 0x514   : > { %9129 = vmatpush3.bf16.msra.mxu1 %v10399_v56  ;;  %9120 = vmatprep.subr.bf16.mxu0 %v10400_v59  ;;  %v10432_v56 = vld [vmem:[%s11079_s17 + $0x548] ss:$12 sps:$4 sm:$0xff]   ;;  %v10433_v59 = vld [vmem:[%s11079_s17 + $0x758] ss:$12 sps:$4 sm:$0xff]  }
 0x515   : > { %9130 = vmatprep.subr.bf16.mxu1 %v10401_v2  ;;  %7504 = vmatprep.mubr.bf16.mxu1 %v11378_v58  ;;  %v10412_v58 = vld [vmem:[%s11079_s17 + $0x410] ss:$12 sps:$4 sm:$0xff]   ;;  %v10434_v2 = vld [vmem:[%s11079_s17 + $0x488] ss:$12 sps:$4 sm:$0xff]  }
 0x517   : > { %9121 = vmatpush3.bf16.msra.mxu0 %v10402_v60  ;;  %v10435_v60 = vld [vmem:[%s11079_s17 + $0x698] ss:$12 sps:$4 sm:$0xff]  }
 0x518   : > { %9131 = vmatpush3.bf16.msra.mxu1 %v10403_v14  ;;  %9150 = vmatprep.subr.bf16.mxu0 %v10405_v11 }
 0x519   : > { %9132 = vmatprep.subr.bf16.mxu1 %v10404_v4 }
 0x51a   : > { %7465 = vmatmul.mubr.bf16.vlgmr.msra.gmra.mxu0 %v11338_v22  ;;  %v10416_v22 = vld [vmem:[%s11079_s17 + $0x3f8] ss:$12 sps:$4 sm:$0xff]  }
 0x51b   : > { %9151 = vmatpush3.bf16.msra.mxu0 %v10407_v3  ;;  %7544 = vmatprep.mubr.bf16.mxu0 %v11384_v62  ;;  %v10420_v62 = vld [vmem:[%s11079_s17 + $0x3e0] ss:$12 sps:$4 sm:$0xff]  }
 0x51c   : > { %9133 = vmatpush3.bf16.msra.mxu1 %v10406_v25  ;;  %9152 = vmatprep.subr.bf16.mxu0 %v10409_v13  ;;  %v10437_v13 = vld [vmem:[%s11079_s17 + $0x8f0] ss:$12 sps:$4 sm:$0xff]  }
 0x51d   : > { %9134 = vmatprep.subr.bf16.mxu1 %v10408_v21  ;;  %v10436_v21 = vld [vmem:[%s11079_s17 + $0x740] ss:$12 sps:$4 sm:$0xff]  }
 0x51f   : > { %9153 = vmatpush3.bf16.msra.mxu0 %v10411_v17 }
 0x520   : > { %9135 = vmatpush3.bf16.msra.mxu1 %v10410_v35  ;;  %9154 = vmatprep.subr.bf16.mxu0 %v10413_v28 }
 0x521   : > { %9136 = vmatprep.subr.bf16.mxu1 %v10412_v58  ;;  %v10438_v58 = vld [vmem:[%s11079_s17 + $0x680] ss:$12 sps:$4 sm:$0xff]  }
 0x523   : > { %9155 = vmatpush3.bf16.msra.mxu0 %v10415_v24 }
 0x524   : > { %9137 = vmatpush3.bf16.msra.mxu1 %v10414_v5  ;;  %9156 = vmatprep.subr.bf16.mxu0 %v10417_v26  ;;  %v10439_v5 = vld [vmem:[%s11079_s17 + $0x830] ss:$12 sps:$4 sm:$0xff]   ;;  %v10441_v26 = vld [vmem:[%s11079_s17 + $0x8d8] ss:$12 sps:$4 sm:$0xff]  }
 0x525   : > { %9138 = vmatprep.subr.bf16.mxu1 %v10416_v22 }
 0x527   : > { %9157 = vmatpush3.bf16.msra.mxu0 %v10419_v27  ;;  %v10444_v27 = vld [vmem:[%s11079_s17 + $0x710] ss:$12 sps:$4 sm:$0xff]  }
 0x528   : > { %9139 = vmatpush3.bf16.msra.mxu1 %v10418_v12  ;;  %9158 = vmatprep.subr.bf16.mxu0 %v10421_v8  ;;  %v10443_v12 = vld [vmem:[%s11079_s17 + $0x818] ss:$12 sps:$4 sm:$0xff]   ;;  %v10446_v8 = vld [vmem:[%s11079_s17 + $0x650] ss:$12 sps:$4 sm:$0xff]  }
 0x529   : > { %9140 = vmatprep.subr.bf16.mxu1 %v10420_v62  ;;  %v10445_v62 = vld [vmem:[%s11079_s17 + $0x8c0] ss:$12 sps:$4 sm:$0xff]  }
 0x52b   : > { %9159 = vmatpush3.bf16.msra.mxu0 %v10423_v33  ;;  %v10449_v33 = vld [vmem:[%s11079_s17 + $0x8a8] ss:$12 sps:$4 sm:$0xff]  }
 0x52c   : > { %9141 = vmatpush3.bf16.msra.mxu1 %v10422_v32  ;;  %9160 = vmatprep.subr.bf16.mxu0 %v10425_v49  ;;  %v10448_v32 = vld [vmem:[%s11079_s17 + $0x6f8] ss:$12 sps:$4 sm:$0xff]   ;;  %v10451_v49 = vld [vmem:[%s11079_s17 + $0x7e8] ss:$12 sps:$4 sm:$0xff]  }
 0x52d   : > { %9142 = vmatprep.subr.bf16.mxu1 %v10424_v20  ;;  %v10450_v20 = vld [vmem:[%s11079_s17 + $0x638] ss:$12 sps:$4 sm:$0xff]  }
 0x52f   : > { %9161 = vmatpush3.bf16.msra.mxu0 %v10427_v39  ;;  %v10454_v39 = vld [vmem:[%s11079_s17 + $0x620] ss:$12 sps:$4 sm:$0xff]  }
 0x530   : > { %9143 = vmatpush3.bf16.msra.mxu1 %v10426_v18  ;;  %9162 = vmatprep.subr.bf16.mxu0 %v10428_v40  ;;  %v10453_v18 = vld [vmem:[%s11079_s17 + $0x890] ss:$12 sps:$4 sm:$0xff]  }
 0x531   : > { %9172 = vmatprep.subr.bf16.mxu1 %v10429_v41  ;;  %v10455_v40 = vld [vmem:[%s11079_s17 + $0x7d0] ss:$12 sps:$4 sm:$0xff]   ;;  %v10456_v41 = vld [vmem:[%s11079_s17 + $0x6c8] ss:$12 sps:$4 sm:$0xff]  }
 0x532   : > { %v7139_v14 = vpop.f32.mrf.mxu0 }
 0x533   : > { %v7180_v4 = vpop.f32.mrf.mxu1  ;;  %7505 = vmatmul.mubr.bf16.vlgmr.msra.gmra.mxu1 %v11424_v37  ;;  %v7140_v11 = vadd.f32 %v7139_v14, %v12008_v47  ;;  %9163 = vmatpush3.bf16.msra.mxu0 %v10430_v0  ;;  %v10457_v0 = vld [vmem:[%s11079_s17 + $0x878] ss:$12 sps:$4 sm:$0xff]   ;;  %v10463_v14 = vld [vmem:[%s11079_s17 + $0x9b0] ss:$12 sps:$4 sm:$0xff]  }
 0x534   : > { %9173 = vmatpush3.bf16.msra.mxu1 %v10431_v50  ;;  %v7141_v25 = vpop.f32.mrf.mxu0  ;;  %9164 = vmatprep.subr.bf16.mxu0 %v10432_v56  ;;  %v10458_v50 = vld [vmem:[%s11079_s17 + $0x608] ss:$12 sps:$4 sm:$0xff]   ;;  %v10459_v56 = vld [vmem:[%s11079_s17 + $0x7b8] ss:$12 sps:$4 sm:$0xff]  }
 0x535   : > { %v7182_v3 = vpop.f32.mrf.mxu1  ;;  %9174 = vmatprep.subr.bf16.mxu1 %v10433_v59  ;;  %v12089_v35 = vadd.f32 %v7180_v4, %v7140_v11  ;;  %v7142_v17 = vadd.f32 %v7141_v25, %v12016_v31  ;;  %7584 = vmatprep.mubr.bf16.mxu1 %v11448_v53  ;;  %v10440_v31 = vld [vmem:[%s11079_s17 + $0x728] ss:$12 sps:$4 sm:$0xff]   ;;  %v10460_v59 = vld [vmem:[%s11079_s17 + $0x860] ss:$12 sps:$4 sm:$0xff]   ;;  %v10465_v11 = vld [vmem:[%s11079_s17 + $0xa58] ss:$12 sps:$4 sm:$0xff]  }
 0x536   : > { %v7143_v37 = vpop.f32.mrf.mxu0  ;;  %v10442_v53 = vld [vmem:[%s11079_s17 + $0x668] ss:$12 sps:$4 sm:$0xff]  }
 0x537   : > { %v7184_v47 = vpop.f32.mrf.mxu1  ;;  %v12094_v28 = vadd.f32 %v7182_v3, %v7142_v17  ;;  %9165 = vmatpush3.bf16.msra.mxu0 %v10434_v2  ;;  %v10461_v2 = vld [vmem:[%s11079_s17 + $0xa70] ss:$12 sps:$4 sm:$0xff]   ;;  %v10464_v4 = vld [vmem:[%s11079_s17 + $0x848] ss:$12 sps:$4 sm:$0xff]   ;;  %v10467_v3 = vld [vmem:[%s11079_s17 + $0x998] ss:$12 sps:$4 sm:$0xff]  }
 0x538   : > { %9175 = vmatpush3.bf16.msra.mxu1 %v10435_v60  ;;  %v7144_v24 = vpop.f32.mrf.mxu0  ;;  %9194 = vmatprep.subr.bf16.mxu0 %v10437_v13  ;;  %v10462_v60 = vld [vmem:[%s11079_s17 + $0x7a0] ss:$12 sps:$4 sm:$0xff]   ;;  %v10466_v25 = vld [vmem:[%s11079_s17 + $0x788] ss:$12 sps:$4 sm:$0xff]   ;;  %v10469_v13 = vld [vmem:[%s11079_s17 + $0xbf0] ss:$12 sps:$4 sm:$0xff]  }
 0x539   : > { %v7185_v22 = vpop.f32.mrf.mxu1  ;;  %9176 = vmatprep.subr.bf16.mxu1 %v10436_v21  ;;  %v10468_v21 = vld [vmem:[%s11079_s17 + $0xa40] ss:$12 sps:$4 sm:$0xff]   ;;  %v10473_v37 = vld [vmem:[%s11079_s17 + $0xbd8] ss:$12 sps:$4 sm:$0xff]   ;;  %v10474_v47 = vld [vmem:[%s11079_s17 + $0x968] ss:$12 sps:$4 sm:$0xff]  }
 0x53a   : > { %7545 = vmatmul.mubr.bf16.vlgmr.msra.gmra.mxu0 %v11428_v38  ;;  %v10447_v38 = vld [vmem:[%s11079_s17 + $0x800] ss:$12 sps:$4 sm:$0xff]   ;;  %v10478_v22 = vld [vmem:[%s11079_s17 + $0x950] ss:$12 sps:$4 sm:$0xff]  }
 0x53b   : > { %9195 = vmatpush3.bf16.msra.mxu0 %v10439_v5  ;;  %7624 = vmatprep.mubr.bf16.mxu0 %v11454_v57  ;;  %v10452_v57 = vld [vmem:[%s11079_s17 + $0x6e0] ss:$12 sps:$4 sm:$0xff]   ;;  %v10476_v5 = vld [vmem:[%s11079_s17 + $0xa10] ss:$12 sps:$4 sm:$0xff]  }
 0x53c   : > { %9177 = vmatpush3.bf16.msra.mxu1 %v10438_v58  ;;  %9196 = vmatprep.subr.bf16.mxu0 %v10441_v26  ;;  %v10470_v17 = vld [vmem:[%s11079_s17 + $0x980] ss:$12 sps:$4 sm:$0xff]   ;;  %v10472_v58 = vld [vmem:[%s11079_s17 + $0xa28] ss:$12 sps:$4 sm:$0xff]  }
 0x53d   : > { %9178 = vmatprep.subr.bf16.mxu1 %v10440_v31  ;;  %v10477_v24 = vld [vmem:[%s11079_s17 + $0xbc0] ss:$12 sps:$4 sm:$0xff]   ;;  %v10480_v31 = vld [vmem:[%s11079_s17 + $0x9f8] ss:$12 sps:$4 sm:$0xff]   ;;  %v10481_v26 = vld [vmem:[%s11079_s17 + $0xba8] ss:$12 sps:$4 sm:$0xff]  }
 0x53f   : > { %9197 = vmatpush3.bf16.msra.mxu0 %v10443_v12  ;;  %v10483_v12 = vld [vmem:[%s11079_s17 + $0xae8] ss:$12 sps:$4 sm:$0xff]  }
 0x540   : > { %9179 = vmatpush3.bf16.msra.mxu1 %v10442_v53  ;;  %9198 = vmatprep.subr.bf16.mxu0 %v10445_v62  ;;  %v10482_v53 = vld [vmem:[%s11079_s17 + $0x938] ss:$12 sps:$4 sm:$0xff]   ;;  %v10486_v62 = vld [vmem:[%s11079_s17 + $0x920] ss:$12 sps:$4 sm:$0xff]  }
 0x541   : > { %9180 = vmatprep.subr.bf16.mxu1 %v10444_v27  ;;  %v10485_v27 = vld [vmem:[%s11079_s17 + $0xb90] ss:$12 sps:$4 sm:$0xff]  }
 0x543   : > { %9199 = vmatpush3.bf16.msra.mxu0 %v10447_v38  ;;  %v10488_v38 = vld [vmem:[%s11079_s17 + $0x9c8] ss:$12 sps:$4 sm:$0xff]  }
 0x544   : > { %9181 = vmatpush3.bf16.msra.mxu1 %v10446_v8  ;;  %9200 = vmatprep.subr.bf16.mxu0 %v10449_v33  ;;  %v10487_v8 = vld [vmem:[%s11079_s17 + $0xad0] ss:$12 sps:$4 sm:$0xff]   ;;  %v10490_v33 = vld [vmem:[%s11079_s17 + $0x908] ss:$12 sps:$4 sm:$0xff]  }
 0x545   : > { %9182 = vmatprep.subr.bf16.mxu1 %v10448_v32  ;;  %v10489_v32 = vld [vmem:[%s11079_s17 + $0xb78] ss:$12 sps:$4 sm:$0xff]  }
 0x547   : > { %9201 = vmatpush3.bf16.msra.mxu0 %v10451_v49  ;;  %v10492_v49 = vld [vmem:[%s11079_s17 + $0xb60] ss:$12 sps:$4 sm:$0xff]  }
 0x548   : > { %9183 = vmatpush3.bf16.msra.mxu1 %v10450_v20  ;;  %9202 = vmatprep.subr.bf16.mxu0 %v10453_v18  ;;  %v10491_v20 = vld [vmem:[%s11079_s17 + $0xab8] ss:$12 sps:$4 sm:$0xff]   ;;  %v10494_v18 = vld [vmem:[%s11079_s17 + $0xaa0] ss:$12 sps:$4 sm:$0xff]  }
 0x549   : > { %9184 = vmatprep.subr.bf16.mxu1 %v10452_v57  ;;  %v10493_v57 = vld [vmem:[%s11079_s17 + $0xd70] ss:$12 sps:$4 sm:$0xff]  }
 0x54b   : > { %9203 = vmatpush3.bf16.msra.mxu0 %v10455_v40  ;;  %v10496_v40 = vld [vmem:[%s11079_s17 + $0xb48] ss:$12 sps:$4 sm:$0xff]  }
 0x54c   : > { %9185 = vmatpush3.bf16.msra.mxu1 %v10454_v39  ;;  %9204 = vmatprep.subr.bf16.mxu0 %v10457_v0  ;;  %v10495_v39 = vld [vmem:[%s11079_s17 + $0xcb0] ss:$12 sps:$4 sm:$0xff]  }
 0x54d   : > { %9186 = vmatprep.subr.bf16.mxu1 %v10456_v41  ;;  %v10497_v41 = vld [vmem:[%s11079_s17 + $0xd58] ss:$12 sps:$4 sm:$0xff]  }
 0x54f   : > { %9205 = vmatpush3.bf16.msra.mxu0 %v10459_v56 }
 0x550   : > { %9187 = vmatpush3.bf16.msra.mxu1 %v10458_v50  ;;  %9206 = vmatprep.subr.bf16.mxu0 %v10460_v59  ;;  %v10498_v59 = vld [vmem:[%s11079_s17 + $0xa88] ss:$12 sps:$4 sm:$0xff]  }
 0x551   : > { %9216 = vmatprep.subr.bf16.mxu1 %v10461_v2  ;;  %v10499_v2 = vld [vmem:[%s11079_s17 + $0xc98] ss:$12 sps:$4 sm:$0xff]  }
 0x553   : > { %7585 = vmatmul.mubr.bf16.vlgmr.msra.gmra.mxu1 %v11524_v9  ;;  %9207 = vmatpush3.bf16.msra.mxu0 %v10462_v60  ;;  %v10471_v9 = vld [vmem:[%s11079_s17 + $0xb30] ss:$12 sps:$4 sm:$0xff]  }
 0x554   : > { %9217 = vmatpush3.bf16.msra.mxu1 %v10463_v14  ;;  %9208 = vmatprep.subr.bf16.mxu0 %v10464_v4  ;;  %v10500_v4 = vld [vmem:[%s11079_s17 + $0xd40] ss:$12 sps:$4 sm:$0xff]  }
 0x555   : > { %9218 = vmatprep.subr.bf16.mxu1 %v10465_v11  ;;  %7664 = vmatprep.mubr.bf16.mxu1 %v11534_v15  ;;  %v10475_v15 = vld [vmem:[%s11079_s17 + $0xb18] ss:$12 sps:$4 sm:$0xff]   ;;  %v10501_v11 = vld [vmem:[%s11079_s17 + $0xef0] ss:$12 sps:$4 sm:$0xff]  }
 0x557   : > { %9209 = vmatpush3.bf16.msra.mxu0 %v10466_v25 }
 0x558   : > { %9219 = vmatpush3.bf16.msra.mxu1 %v10467_v3  ;;  %9238 = vmatprep.subr.bf16.mxu0 %v10469_v13  ;;  %v10502_v13 = vld [vmem:[%s11079_s17 + $0xc80] ss:$12 sps:$4 sm:$0xff]  }
 0x559   : > { %9220 = vmatprep.subr.bf16.mxu1 %v10468_v21 }
 0x55a   : > { %7625 = vmatmul.mubr.bf16.vlgmr.msra.gmra.mxu0 %v11528_v10  ;;  %v10479_v10 = vld [vmem:[%s11079_s17 + $0xb00] ss:$12 sps:$4 sm:$0xff]  }
 0x55b   : > { %9239 = vmatpush3.bf16.msra.mxu0 %v10471_v9  ;;  %7704 = vmatprep.mubr.bf16.mxu0 %v11536_v44  ;;  %v10484_v44 = vld [vmem:[%s11079_s17 + $0x9e0] ss:$12 sps:$4 sm:$0xff]  }
 0x55c   : > { %9221 = vmatpush3.bf16.msra.mxu1 %v10470_v17  ;;  %9240 = vmatprep.subr.bf16.mxu0 %v10473_v37  ;;  %v10503_v17 = vld [vmem:[%s11079_s17 + $0xe30] ss:$12 sps:$4 sm:$0xff]   ;;  %v10506_v37 = vld [vmem:[%s11079_s17 + $0xc68] ss:$12 sps:$4 sm:$0xff]  }
 0x55d   : > { %9222 = vmatprep.subr.bf16.mxu1 %v10472_v58 }
 0x55f   : > { %9241 = vmatpush3.bf16.msra.mxu0 %v10475_v15  ;;  %v10508_v15 = vld [vmem:[%s11079_s17 + $0xd10] ss:$12 sps:$4 sm:$0xff]  }
 0x560   : > { %9223 = vmatpush3.bf16.msra.mxu1 %v10474_v47  ;;  %9242 = vmatprep.subr.bf16.mxu0 %v10477_v24  ;;  %v10507_v47 = vld [vmem:[%s11079_s17 + $0xe18] ss:$12 sps:$4 sm:$0xff]   ;;  %v10510_v24 = vld [vmem:[%s11079_s17 + $0xc50] ss:$12 sps:$4 sm:$0xff]  }
 0x561   : > { %9224 = vmatprep.subr.bf16.mxu1 %v10476_v5  ;;  %v10509_v5 = vld [vmem:[%s11079_s17 + $0xec0] ss:$12 sps:$4 sm:$0xff]  }
 0x563   : > { %9243 = vmatpush3.bf16.msra.mxu0 %v10479_v10  ;;  %v10513_v10 = vld [vmem:[%s11079_s17 + $0xea8] ss:$12 sps:$4 sm:$0xff]  }
 0x564   : > { %9225 = vmatpush3.bf16.msra.mxu1 %v10478_v22  ;;  %9244 = vmatprep.subr.bf16.mxu0 %v10481_v26  ;;  %v10512_v22 = vld [vmem:[%s11079_s17 + $0xcf8] ss:$12 sps:$4 sm:$0xff]   ;;  %v10515_v26 = vld [vmem:[%s11079_s17 + $0xde8] ss:$12 sps:$4 sm:$0xff]  }
 0x565   : > { %9226 = vmatprep.subr.bf16.mxu1 %v10480_v31  ;;  %v10514_v31 = vld [vmem:[%s11079_s17 + $0xc38] ss:$12 sps:$4 sm:$0xff]  }
 0x567   : > { %9245 = vmatpush3.bf16.msra.mxu0 %v10483_v12  ;;  %v10518_v12 = vld [vmem:[%s11079_s17 + $0xc20] ss:$12 sps:$4 sm:$0xff]  }
 0x568   : > { %9227 = vmatpush3.bf16.msra.mxu1 %v10482_v53  ;;  %9246 = vmatprep.subr.bf16.mxu0 %v10485_v27  ;;  %v10517_v53 = vld [vmem:[%s11079_s17 + $0xe90] ss:$12 sps:$4 sm:$0xff]   ;;  %v10520_v27 = vld [vmem:[%s11079_s17 + $0xcc8] ss:$12 sps:$4 sm:$0xff]  }
 0x569   : > { %9228 = vmatprep.subr.bf16.mxu1 %v10484_v44  ;;  %v10519_v44 = vld [vmem:[%s11079_s17 + $0xdd0] ss:$12 sps:$4 sm:$0xff]  }
 0x56b   : > { %9247 = vmatpush3.bf16.msra.mxu0 %v10487_v8  ;;  %v10522_v8 = vld [vmem:[%s11079_s17 + $0xc08] ss:$12 sps:$4 sm:$0xff]  }
 0x56c   : > { %9229 = vmatpush3.bf16.msra.mxu1 %v10486_v62  ;;  %9248 = vmatprep.subr.bf16.mxu0 %v10489_v32  ;;  %v10521_v62 = vld [vmem:[%s11079_s17 + $0xe78] ss:$12 sps:$4 sm:$0xff]   ;;  %v10524_v32 = vld [vmem:[%s11079_s17 + $0xe60] ss:$12 sps:$4 sm:$0xff]  }
 0x56d   : > { %9230 = vmatprep.subr.bf16.mxu1 %v10488_v38  ;;  %v10523_v38 = vld [vmem:[%s11079_s17 + $0xdb8] ss:$12 sps:$4 sm:$0xff]  }
 0x56f   : > { %9249 = vmatpush3.bf16.msra.mxu0 %v10491_v20  ;;  %v10526_v20 = vld [vmem:[%s11079_s17 + $0xda0] ss:$12 sps:$4 sm:$0xff]  }
 0x570   : > { %9231 = vmatpush3.bf16.msra.mxu1 %v10490_v33  ;;  %9250 = vmatprep.subr.bf16.mxu0 %v10492_v49  ;;  %v10525_v33 = vld [vmem:[%s11079_s17 + $0x1070] ss:$12 sps:$4 sm:$0xff]  }
 0x571   : > { %9260 = vmatprep.subr.bf16.mxu1 %v10493_v57  ;;  %v10527_v49 = vld [vmem:[%s11079_s17 + $0xfb0] ss:$12 sps:$4 sm:$0xff]   ;;  %v10528_v57 = vld [vmem:[%s11079_s17 + $0xe48] ss:$12 sps:$4 sm:$0xff]  }
 0x572   : > { %v7221_v0 = vpop.f32.mrf.mxu0 }
 0x573   : > { %v7262_v50 = vpop.f32.mrf.mxu1  ;;  %7665 = vmatmul.mubr.bf16.vlgmr.msra.gmra.mxu1 %v11618_v42  ;;  %v7222_v56 = vadd.f32 %v7221_v0, %v12089_v35  ;;  %9251 = vmatpush3.bf16.msra.mxu0 %v10494_v18  ;;  %v10529_v18 = vld [vmem:[%s11079_s17 + $0x1058] ss:$12 sps:$4 sm:$0xff]   ;;  %v10533_v0 = vld [vmem:[%s11079_s17 + $0x11f0] ss:$12 sps:$4 sm:$0xff]  }
 0x574   : > { %9261 = vmatpush3.bf16.msra.mxu1 %v10495_v39  ;;  %v7223_v60 = vpop.f32.mrf.mxu0  ;;  %9252 = vmatprep.subr.bf16.mxu0 %v10496_v40  ;;  %v10530_v39 = vld [vmem:[%s11079_s17 + $0xd88] ss:$12 sps:$4 sm:$0xff]   ;;  %v10531_v40 = vld [vmem:[%s11079_s17 + $0xf98] ss:$12 sps:$4 sm:$0xff]  }
 0x575   : > { %v7264_v14 = vpop.f32.mrf.mxu1  ;;  %9262 = vmatprep.subr.bf16.mxu1 %v10497_v41  ;;  %v12167_v25 = vadd.f32 %v7262_v50, %v7222_v56  ;;  %v7224_v42 = vadd.f32 %v7223_v60, %v12094_v28  ;;  %7744 = vmatprep.mubr.bf16.mxu1 %v11628_v55  ;;  %v10504_v28 = vld [vmem:[%s11079_s17 + $0xd28] ss:$12 sps:$4 sm:$0xff]   ;;  %v10505_v55 = vld [vmem:[%s11079_s17 + $0xed8] ss:$12 sps:$4 sm:$0xff]   ;;  %v10532_v41 = vld [vmem:[%s11079_s17 + $0x1040] ss:$12 sps:$4 sm:$0xff]  }
 0x576   : > { %v7225_v35 = vpop.f32.mrf.mxu0  ;;  %v10534_v50 = vld [vmem:[%s11079_s17 + $0xf80] ss:$12 sps:$4 sm:$0xff]   ;;  %v10536_v56 = vld [vmem:[%s11079_s17 + $0x1028] ss:$12 sps:$4 sm:$0xff]   ;;  %v10540_v60 = vld [vmem:[%s11079_s17 + $0x1010] ss:$12 sps:$4 sm:$0xff]  }
 0x577   : > { %v7266_v3 = vpop.f32.mrf.mxu1  ;;  %v12171_v21 = vadd.f32 %v7264_v14, %v7224_v42  ;;  %9253 = vmatpush3.bf16.msra.mxu0 %v10498_v59  ;;  %v10537_v59 = vld [vmem:[%s11079_s17 + $0x11d8] ss:$12 sps:$4 sm:$0xff]   ;;  %v10541_v14 = vld [vmem:[%s11079_s17 + $0x11c0] ss:$12 sps:$4 sm:$0xff]   ;;  %v10545_v42 = vld [vmem:[%s11079_s17 + $0x11a8] ss:$12 sps:$4 sm:$0xff]  }
 0x578   : > { %9263 = vmatpush3.bf16.msra.mxu1 %v10499_v2  ;;  %v7226_v9 = vpop.f32.mrf.mxu0  ;;  %9282 = vmatprep.subr.bf16.mxu0 %v10501_v11  ;;  %v10538_v2 = vld [vmem:[%s11079_s17 + $0xf68] ss:$12 sps:$4 sm:$0xff]   ;;  %v10544_v11 = vld [vmem:[%s11079_s17 + $0xff8] ss:$12 sps:$4 sm:$0xff]  }
 0x579   : > { %v7267_v58 = vpop.f32.mrf.mxu1  ;;  %9264 = vmatprep.subr.bf16.mxu1 %v10500_v4  ;;  %v10542_v4 = vld [vmem:[%s11079_s17 + $0xf50] ss:$12 sps:$4 sm:$0xff]   ;;  %v10546_v35 = vld [vmem:[%s11079_s17 + $0xf38] ss:$12 sps:$4 sm:$0xff]   ;;  %v10547_v3 = vld [vmem:[%s11079_s17 + $0x10e8] ss:$12 sps:$4 sm:$0xff]  }
 0x57a   : > { %7705 = vmatmul.mubr.bf16.vlgmr.msra.gmra.mxu0 %v11622_v43  ;;  %v10511_v43 = vld [vmem:[%s11079_s17 + $0xe00] ss:$12 sps:$4 sm:$0xff]   ;;  %v10551_v9 = vld [vmem:[%s11079_s17 + $0x10d0] ss:$12 sps:$4 sm:$0xff]   ;;  %v10552_v58 = vld [vmem:[%s11079_s17 + $0xfc8] ss:$12 sps:$4 sm:$0xff]  }
 0x57b   : > { %9283 = vmatpush3.bf16.msra.mxu0 %v10503_v17  ;;  %7784 = vmatprep.mubr.bf16.mxu0 %v11630_v63  ;;  %v10516_v63 = vld [vmem:[%s11079_s17 + $0xce0] ss:$12 sps:$4 sm:$0xff]  }
 0x57c   : > { %9265 = vmatpush3.bf16.msra.mxu1 %v10502_v13  ;;  %9284 = vmatprep.subr.bf16.mxu0 %v10505_v55  ;;  %v10549_v13 = vld [vmem:[%s11079_s17 + $0x1190] ss:$12 sps:$4 sm:$0xff]   ;;  %v10550_v17 = vld [vmem:[%s11079_s17 + $0xf20] ss:$12 sps:$4 sm:$0xff]   ;;  %v10554_v55 = vld [vmem:[%s11079_s17 + $0xf08] ss:$12 sps:$4 sm:$0xff]  }
 0x57d   : > { %9266 = vmatprep.subr.bf16.mxu1 %v10504_v28  ;;  %v10553_v28 = vld [vmem:[%s11079_s17 + $0x1178] ss:$12 sps:$4 sm:$0xff]  }
 0x57f   : > { %9285 = vmatpush3.bf16.msra.mxu0 %v10507_v47  ;;  %v10556_v47 = vld [vmem:[%s11079_s17 + $0x1160] ss:$12 sps:$4 sm:$0xff]  }
 0x580   : > { %9267 = vmatpush3.bf16.msra.mxu1 %v10506_v37  ;;  %9286 = vmatprep.subr.bf16.mxu0 %v10509_v5  ;;  %v10555_v37 = vld [vmem:[%s11079_s17 + $0x10b8] ss:$12 sps:$4 sm:$0xff]   ;;  %v10558_v5 = vld [vmem:[%s11079_s17 + $0x10a0] ss:$12 sps:$4 sm:$0xff]  }
 0x581   : > { %9268 = vmatprep.subr.bf16.mxu1 %v10508_v15  ;;  %v10557_v15 = vld [vmem:[%s11079_s17 + $0x1370] ss:$12 sps:$4 sm:$0xff]  }
 0x583   : > { %9287 = vmatpush3.bf16.msra.mxu0 %v10511_v43  ;;  %v10560_v43 = vld [vmem:[%s11079_s17 + $0x1148] ss:$12 sps:$4 sm:$0xff]  }
 0x584   : > { %9269 = vmatpush3.bf16.msra.mxu1 %v10510_v24  ;;  %9288 = vmatprep.subr.bf16.mxu0 %v10513_v10  ;;  %v10559_v24 = vld [vmem:[%s11079_s17 + $0x12b0] ss:$12 sps:$4 sm:$0xff]  }
 0x585   : > { %9270 = vmatprep.subr.bf16.mxu1 %v10512_v22  ;;  %v10561_v22 = vld [vmem:[%s11079_s17 + $0x1358] ss:$12 sps:$4 sm:$0xff]  }
 0x587   : > { %9289 = vmatpush3.bf16.msra.mxu0 %v10515_v26 }
 0x588   : > { %9271 = vmatpush3.bf16.msra.mxu1 %v10514_v31  ;;  %9290 = vmatprep.subr.bf16.mxu0 %v10517_v53  ;;  %v10563_v53 = vld [vmem:[%s11079_s17 + $0x1298] ss:$12 sps:$4 sm:$0xff]  }
 0x589   : > { %9272 = vmatprep.subr.bf16.mxu1 %v10516_v63  ;;  %v10562_v63 = vld [vmem:[%s11079_s17 + $0x1088] ss:$12 sps:$4 sm:$0xff]  }
 0x58b   : > { %9291 = vmatpush3.bf16.msra.mxu0 %v10519_v44 }
 0x58c   : > { %9273 = vmatpush3.bf16.msra.mxu1 %v10518_v12  ;;  %9292 = vmatprep.subr.bf16.mxu0 %v10521_v62  ;;  %v10565_v62 = vld [vmem:[%s11079_s17 + $0x14f0] ss:$12 sps:$4 sm:$0xff]  }
 0x58d   : > { %9274 = vmatprep.subr.bf16.mxu1 %v10520_v27  ;;  %v10564_v27 = vld [vmem:[%s11079_s17 + $0x1340] ss:$12 sps:$4 sm:$0xff]  }
 0x58f   : > { %9293 = vmatpush3.bf16.msra.mxu0 %v10523_v38 }
 0x590   : > { %9275 = vmatpush3.bf16.msra.mxu1 %v10522_v8  ;;  %9294 = vmatprep.subr.bf16.mxu0 %v10524_v32 }
 0x591   : > { %9304 = vmatprep.subr.bf16.mxu1 %v10525_v33  ;;  %v10566_v33 = vld [vmem:[%s11079_s17 + $0x1280] ss:$12 sps:$4 sm:$0xff]  }
 0x593   : > { %7745 = vmatmul.mubr.bf16.vlgmr.msra.gmra.mxu1 %v11714_v51  ;;  %9295 = vmatpush3.bf16.msra.mxu0 %v10526_v20  ;;  %v10535_v51 = vld [vmem:[%s11079_s17 + $0x1130] ss:$12 sps:$4 sm:$0xff]  }
 0x594   : > { %9305 = vmatpush3.bf16.msra.mxu1 %v10527_v49  ;;  %9296 = vmatprep.subr.bf16.mxu0 %v10528_v57  ;;  %v10567_v20 = vld [vmem:[%s11079_s17 + $0x1430] ss:$12 sps:$4 sm:$0xff]  }
 0x595   : > { %9306 = vmatprep.subr.bf16.mxu1 %v10529_v18  ;;  %7824 = vmatprep.mubr.bf16.mxu1 %v11724_v61  ;;  %v10539_v61 = vld [vmem:[%s11079_s17 + $0x1118] ss:$12 sps:$4 sm:$0xff]   ;;  %v10568_v18 = vld [vmem:[%s11079_s17 + $0x1328] ss:$12 sps:$4 sm:$0xff]  }
 0x597   : > { %9297 = vmatpush3.bf16.msra.mxu0 %v10530_v39  ;;  %v10569_v39 = vld [vmem:[%s11079_s17 + $0x14d8] ss:$12 sps:$4 sm:$0xff]  }
 0x598   : > { %9307 = vmatpush3.bf16.msra.mxu1 %v10531_v40  ;;  %9326 = vmatprep.subr.bf16.mxu0 %v10533_v0  ;;  %v10570_v40 = vld [vmem:[%s11079_s17 + $0x1268] ss:$12 sps:$4 sm:$0xff]  }
 0x599   : > { %9308 = vmatprep.subr.bf16.mxu1 %v10532_v41  ;;  %v10571_v41 = vld [vmem:[%s11079_s17 + $0x1418] ss:$12 sps:$4 sm:$0xff]  }
 0x59a   : > { %7785 = vmatmul.mubr.bf16.vlgmr.msra.gmra.mxu0 %v11718_v52  ;;  %v10543_v52 = vld [vmem:[%s11079_s17 + $0x1100] ss:$12 sps:$4 sm:$0xff]  }
 0x59b   : > { %9327 = vmatpush3.bf16.msra.mxu0 %v10535_v51  ;;  %7864 = vmatprep.mubr.bf16.mxu0 %v11726_v1  ;;  %v10548_v1 = vld [vmem:[%s11079_s17 + $0xfe0] ss:$12 sps:$4 sm:$0xff]  }
 0x59c   : > { %9309 = vmatpush3.bf16.msra.mxu1 %v10534_v50  ;;  %9328 = vmatprep.subr.bf16.mxu0 %v10537_v59  ;;  %v10572_v50 = vld [vmem:[%s11079_s17 + $0x1310] ss:$12 sps:$4 sm:$0xff]   ;;  %v10573_v51 = vld [vmem:[%s11079_s17 + $0x14c0] ss:$12 sps:$4 sm:$0xff]  }
 0x59d   : > { %9310 = vmatprep.subr.bf16.mxu1 %v10536_v56 }
 0x59f   : > { %9329 = vmatpush3.bf16.msra.mxu0 %v10539_v61  ;;  %v10575_v61 = vld [vmem:[%s11079_s17 + $0x1400] ss:$12 sps:$4 sm:$0xff]  }
 0x5a0   : > { %9311 = vmatpush3.bf16.msra.mxu1 %v10538_v2  ;;  %9330 = vmatprep.subr.bf16.mxu0 %v10541_v14  ;;  %v10574_v2 = vld [vmem:[%s11079_s17 + $0x1250] ss:$12 sps:$4 sm:$0xff]   ;;  %v10576_v14 = vld [vmem:[%s11079_s17 + $0x12f8] ss:$12 sps:$4 sm:$0xff]  }
 0x5a1   : > { %9312 = vmatprep.subr.bf16.mxu1 %v10540_v60 }
 0x5a3   : > { %9331 = vmatpush3.bf16.msra.mxu0 %v10543_v52  ;;  %v10579_v52 = vld [vmem:[%s11079_s17 + $0x13e8] ss:$12 sps:$4 sm:$0xff]  }
 0x5a4   : > { %9313 = vmatpush3.bf16.msra.mxu1 %v10542_v4  ;;  %9332 = vmatprep.subr.bf16.mxu0 %v10545_v42  ;;  %v10577_v4 = vld [vmem:[%s11079_s17 + $0x14a8] ss:$12 sps:$4 sm:$0xff]   ;;  %v10581_v42 = vld [vmem:[%s11079_s17 + $0x1490] ss:$12 sps:$4 sm:$0xff]  }
 0x5a5   : > { %9314 = vmatprep.subr.bf16.mxu1 %v10544_v11  ;;  %v10580_v11 = vld [vmem:[%s11079_s17 + $0x12e0] ss:$12 sps:$4 sm:$0xff]  }
 0x5a7   : > { %9333 = vmatpush3.bf16.msra.mxu0 %v10547_v3  ;;  %v10583_v3 = vld [vmem:[%s11079_s17 + $0x13d0] ss:$12 sps:$4 sm:$0xff]  }
 0x5a8   : > { %9315 = vmatpush3.bf16.msra.mxu1 %v10546_v35  ;;  %9334 = vmatprep.subr.bf16.mxu0 %v10549_v13  ;;  %v10582_v35 = vld [vmem:[%s11079_s17 + $0x1220] ss:$12 sps:$4 sm:$0xff]   ;;  %v10585_v13 = vld [vmem:[%s11079_s17 + $0x1478] ss:$12 sps:$4 sm:$0xff]  }
 0x5a9   : > { %9316 = vmatprep.subr.bf16.mxu1 %v10548_v1  ;;  %v10584_v1 = vld [vmem:[%s11079_s17 + $0x12c8] ss:$12 sps:$4 sm:$0xff]  }
 0x5ab   : > { %9335 = vmatpush3.bf16.msra.mxu0 %v10551_v9  ;;  %v10587_v9 = vld [vmem:[%s11079_s17 + $0x13b8] ss:$12 sps:$4 sm:$0xff]  }
 0x5ac   : > { %9317 = vmatpush3.bf16.msra.mxu1 %v10550_v17  ;;  %9336 = vmatprep.subr.bf16.mxu0 %v10553_v28  ;;  %v10586_v17 = vld [vmem:[%s11079_s17 + $0x1208] ss:$12 sps:$4 sm:$0xff]   ;;  %v10589_v28 = vld [vmem:[%s11079_s17 + $0x1670] ss:$12 sps:$4 sm:$0xff]  }
 0x5ad   : > { %9318 = vmatprep.subr.bf16.mxu1 %v10552_v58  ;;  %v10588_v58 = vld [vmem:[%s11079_s17 + $0x1460] ss:$12 sps:$4 sm:$0xff]  }
 0x5af   : > { %9337 = vmatpush3.bf16.msra.mxu0 %v10555_v37  ;;  %v10591_v37 = vld [vmem:[%s11079_s17 + $0x15b0] ss:$12 sps:$4 sm:$0xff]  }
 0x5b0   : > { %9319 = vmatpush3.bf16.msra.mxu1 %v10554_v55  ;;  %9338 = vmatprep.subr.bf16.mxu0 %v10556_v47  ;;  %v10590_v55 = vld [vmem:[%s11079_s17 + $0x13a0] ss:$12 sps:$4 sm:$0xff]   ;;  %v10592_v47 = vld [vmem:[%s11079_s17 + $0x1448] ss:$12 sps:$4 sm:$0xff]  }
 0x5b1   : > { %9348 = vmatprep.subr.bf16.mxu1 %v10557_v15  ;;  %v10593_v15 = vld [vmem:[%s11079_s17 + $0x1658] ss:$12 sps:$4 sm:$0xff]  }
 0x5b2   : > { %v7303_v10 = vpop.f32.mrf.mxu0 }
 0x5b3   : > { %v7344_v31 = vpop.f32.mrf.mxu1  ;;  %7825 = vmatmul.mubr.bf16.vlgmr.msra.gmra.mxu1 %v11810_v30  ;;  %v7304_v26 = vadd.f32 %v7303_v10, %v12167_v25  ;;  %9339 = vmatpush3.bf16.msra.mxu0 %v10558_v5 }
 0x5b4   : > { %9349 = vmatpush3.bf16.msra.mxu1 %v10559_v24  ;;  %v7305_v12 = vpop.f32.mrf.mxu0  ;;  %9340 = vmatprep.subr.bf16.mxu0 %v10560_v43  ;;  %v2556_v24 = vsub.s32 2, %v11296_v48  ;;  %v10594_v43 = vld [vmem:[%s11079_s17 + $0x1388] ss:$12 sps:$4 sm:$0xff]   ;;  %v10598_v48 = vld [vmem:[%s11079_s17 + $0x1580] ss:$12 sps:$4 sm:$0xff]  }
 0x5b5   : > { %v7346_v44 = vpop.f32.mrf.mxu1  ;;  %9350 = vmatprep.subr.bf16.mxu1 %v10561_v22  ;;  %v7345_v8 = vadd.f32 %v7344_v31, %v7304_v26  ;;  %v7306_v38 = vadd.f32 %v7305_v12, %v12171_v21  ;;  %7904 = vmatprep.mubr.bf16.mxu1 %v11819_v16  ;;  %v10595_v22 = vld [vmem:[%s11079_s17 + $0x1598] ss:$12 sps:$4 sm:$0xff]   ;;  %v10596_v31 = vld [vmem:[%s11079_s17 + $0x1640] ss:$12 sps:$4 sm:$0xff]   ;;  %v10597_v26 = vld [vmem:[%s11079_s17 + $0x17f0] ss:$12 sps:$4 sm:$0xff]  }
 0x5b6   : > { %v7307_v30 = vpop.f32.mrf.mxu0 }
 0x5b7   : > { %v7348_v25 = vpop.f32.mrf.mxu1  ;;  %v7347_v32 = vadd.f32 %v7346_v44, %v7306_v38  ;;  %9341 = vmatpush3.bf16.msra.mxu0 %v10562_v63  ;;  %v10599_v44 = vld [vmem:[%s11079_s17 + $0x1730] ss:$12 sps:$4 sm:$0xff]   ;;  %v10602_v30 = vld [vmem:[%s11079_s17 + $0x1568] ss:$12 sps:$4 sm:$0xff]  }
 0x5b8   : > { %9351 = vmatpush3.bf16.msra.mxu1 %v10563_v53  ;;  %v7308_v49 = vpop.f32.mrf.mxu0  ;;  %9370 = vmatprep.subr.bf16.mxu0 %v10565_v62  ;;  %v10600_v62 = vld [vmem:[%s11079_s17 + $0x1628] ss:$12 sps:$4 sm:$0xff]   ;;  %v10603_v25 = vld [vmem:[%s11079_s17 + $0x1718] ss:$12 sps:$4 sm:$0xff]  }
 0x5b9   : > { %v7349_v57 = vpop.f32.mrf.mxu1  ;;  %9352 = vmatprep.subr.bf16.mxu1 %v10564_v27 }
 0x5ba   : > { %v7385_v21 = vpop.f32.mrf.mxu0  ;;  %7865 = vmatmul.mubr.bf16.vlgmr.msra.gmra.mxu0 %v11814_v7 }
 0x5bb   : > { %v12252_v16 = vadd.f32 %v7385_v21, %v7345_v8  ;;  %9371 = vmatpush3.bf16.msra.mxu0 %v10567_v20  ;;  %7944 = vmatprep.mubr.bf16.mxu0 %v11821_v6  ;;  %v10578_v6 = vld [vmem:[%s11079_s17 + $0x1238] ss:$12 sps:$4 sm:$0xff]   ;;  %v10605_v20 = vld [vmem:[%s11079_s17 + $0x17c0] ss:$12 sps:$4 sm:$0xff]  }
 0x5bc   : > { %9353 = vmatpush3.bf16.msra.mxu1 %v10566_v33  ;;  %v7387_v0 = vpop.f32.mrf.mxu0  ;;  %9372 = vmatprep.subr.bf16.mxu0 %v10569_v39  ;;  %v10601_v8 = vld [vmem:[%s11079_s17 + $0x17d8] ss:$12 sps:$4 sm:$0xff]   ;;  %v10604_v33 = vld [vmem:[%s11079_s17 + $0x1610] ss:$12 sps:$4 sm:$0xff]   ;;  %v10607_v39 = vld [vmem:[%s11079_s17 + $0x1700] ss:$12 sps:$4 sm:$0xff]  }
 0x5bd   : > { %9354 = vmatprep.subr.bf16.mxu1 %v10568_v18  ;;  %v12258_v56 = vadd.f32 %v7387_v0, %v7347_v32  ;;  %v10606_v18 = vld [vmem:[%s11079_s17 + $0x1550] ss:$12 sps:$4 sm:$0xff]   ;;  %v10611_v0 = vld [vmem:[%s11079_s17 + $0x16e8] ss:$12 sps:$4 sm:$0xff]  }
 0x5be   : > { %v7389_v7 = vpop.f32.mrf.mxu0 }
 0x5bf   : > { %v8075_v59 = vcombine.low %v12252_v16, %v12258_v56  ;;  %9373 = vmatpush3.bf16.msra.mxu0 %v10571_v41  ;;  %v10609_v41 = vld [vmem:[%s11079_s17 + $0x17a8] ss:$12 sps:$4 sm:$0xff]   ;;  %v10614_v7 = vld [vmem:[%s11079_s17 + $0x1520] ss:$12 sps:$4 sm:$0xff]  }
 0x5c0   : > { %9355 = vmatpush3.bf16.msra.mxu1 %v10570_v40  ;;  %v7390_v60 = vpop.f32.mrf.mxu0  ;;  %9374 = vmatprep.subr.bf16.mxu0 %v10573_v51  ;;  %v10608_v40 = vld [vmem:[%s11079_s17 + $0x15f8] ss:$12 sps:$4 sm:$0xff]   ;;  %v10613_v51 = vld [vmem:[%s11079_s17 + $0x1790] ss:$12 sps:$4 sm:$0xff]  }
 0x5c1   : > { %9356 = vmatprep.subr.bf16.mxu1 %v10572_v50  ;;  %v10612_v50 = vld [vmem:[%s11079_s17 + $0x15e0] ss:$12 sps:$4 sm:$0xff]   ;;  %v10617_v60 = vld [vmem:[%s11079_s17 + $0x1778] ss:$12 sps:$4 sm:$0xff]  }
 0x5c3   : > { %9375 = vmatpush3.bf16.msra.mxu0 %v10575_v61  ;;  %v10616_v61 = vld [vmem:[%s11079_s17 + $0x15c8] ss:$12 sps:$4 sm:$0xff]  }
 0x5c4   : > { %9357 = vmatpush3.bf16.msra.mxu1 %v10574_v2  ;;  %9376 = vmatprep.subr.bf16.mxu0 %v10577_v4  ;;  %v10615_v2 = vld [vmem:[%s11079_s17 + $0x16d0] ss:$12 sps:$4 sm:$0xff]   ;;  %v10619_v4 = vld [vmem:[%s11079_s17 + $0x16b8] ss:$12 sps:$4 sm:$0xff]  }
 0x5c5   : > { %9358 = vmatprep.subr.bf16.mxu1 %v10576_v14  ;;  %v10618_v14 = vld [vmem:[%s11079_s17 + $0x1508] ss:$12 sps:$4 sm:$0xff]  }
 0x5c7   : > { %9377 = vmatpush3.bf16.msra.mxu0 %v10579_v52  ;;  %v10622_v52 = vld [vmem:[%s11079_s17 + $0x1820] ss:$0 sps:$4 sm:$0xff]  }
 0x5c8   : > { %9359 = vmatpush3.bf16.msra.mxu1 %v10578_v6  ;;  %9378 = vmatprep.subr.bf16.mxu0 %v10581_v42  ;;  %v10620_v6 = vld [vmem:[%s11079_s17 + $0x1760] ss:$12 sps:$4 sm:$0xff]   ;;  %v10856_v42 = vmov 0.0  }
 0x5c9   : > { %9360 = vmatprep.subr.bf16.mxu1 %v10580_v11  ;;  %v10621_v11 = vld [vmem:[%s11079_s17 + $0x16a0] ss:$12 sps:$4 sm:$0xff]  }
 0x5cb   : > { %9379 = vmatpush3.bf16.msra.mxu0 %v10583_v3  ;;  %v10623_v3 = vld [vmem:[%s11079_s17 + $0x1748] ss:$12 sps:$4 sm:$0xff]  }
 0x5cc   : > { %9361 = vmatpush3.bf16.msra.mxu1 %v10582_v35  ;;  %9380 = vmatprep.subr.bf16.mxu0 %v10585_v13  ;;  %v6693_v35 = vsel %vm6685_vm12, %v10622_v52, 0  ;;  %v10624_v13 = vld [vmem:[%s11079_s17 + $0x1688] ss:$12 sps:$4 sm:$0xff]  }
 0x5cd   : > { %9362 = vmatprep.subr.bf16.mxu1 %v10584_v1 }
 0x5cf   : > { %9381 = vmatpush3.bf16.msra.mxu0 %v10587_v9 }
 0x5d0   : > { %9363 = vmatpush3.bf16.msra.mxu1 %v10586_v17  ;;  %9382 = vmatprep.subr.bf16.mxu0 %v10588_v58  ;;  %v10625_v17 = vld [vmem:[%s11079_s17 + $0x1808] ss:$12 sps:$4 sm:$0xff]  }
 0x5d1   : > { %9392 = vmatprep.subr.bf16.mxu1 %v10589_v28 }
 0x5d3   : > { %v9100_v5 = vpop.f32.mrf.mxu1  ;;  %7905 = vmatmul.mubr.bf16.vlgmr.msra.gmra.mxu1 %v11906_v34  ;;  %9383 = vmatpush3.bf16.msra.mxu0 %v10590_v55  ;;  %v10626_v34 = vld [vmem:[%s395_s21] sm:$0x7] }
 0x5d4   : > { %9393 = vmatpush3.bf16.msra.mxu1 %v10591_v37  ;;  %9384 = vmatprep.subr.bf16.mxu0 %v10592_v47  ;;  %v2557_v12 = vrot.slane %v10626_v34, %v2556_v24 }
 0x5d5   : > { %v9101_v10 = vpop.f32.mrf.mxu1  ;;  %9394 = vmatprep.subr.bf16.mxu1 %v10593_v15  ;;  %7984 = vmatprep.mubr.bf16.mxu1 %v11916_v45 }
 0x5d6   : > { %v9102_v63 = vadd.f32 %v9101_v10, %v9100_v5 }
 0x5d7   : > { %v9103_v53 = vpop.f32.mrf.mxu1  ;;  %9385 = vmatpush3.bf16.msra.mxu0 %v10594_v43 }
 0x5d8   : > { %9395 = vmatpush3.bf16.msra.mxu1 %v10595_v22  ;;  %9414 = vmatprep.subr.bf16.mxu0 %v10597_v26  ;;  %v7427_v45 = vadd.f32 %v9102_v63, %v2557_v12 }
 0x5d9   : > { %v9104_v27 = vpop.f32.mrf.mxu1  ;;  %9396 = vmatprep.subr.bf16.mxu1 %v10596_v31 }
 0x5da   : > { %v9122_v38 = vpop.f32.mrf.mxu0  ;;  %7945 = vmatmul.mubr.bf16.vlgmr.msra.gmra.mxu0 %v11910_v36 }
 0x5db   : > { %9415 = vmatpush3.bf16.msra.mxu0 %v10599_v44  ;;  %8024 = vmatprep.mubr.bf16.mxu0 %v11918_v46  ;;  %v10610_v46 = vld [vmem:[%s11079_s17 + $0x1538] ss:$12 sps:$4 sm:$0xff]  }
 0x5dc   : > { %9397 = vmatpush3.bf16.msra.mxu1 %v10598_v48  ;;  %v9123_v32 = vpop.f32.mrf.mxu0  ;;  %9416 = vmatprep.subr.bf16.mxu0 %v10601_v8 }
 0x5dd   : > { %9398 = vmatprep.subr.bf16.mxu1 %v10600_v62  ;;  %v9124_v49 = vadd.f32 %v9123_v32, %v9122_v38 }
 0x5de   : > { %v9125_v36 = vpop.f32.mrf.mxu0 }
 0x5df   : > { %v7467_v57 = vadd.f32 %v9124_v49, %v7427_v45  ;;  %9417 = vmatpush3.bf16.msra.mxu0 %v10603_v25 }
 0x5e0   : > { %9399 = vmatpush3.bf16.msra.mxu1 %v10602_v30  ;;  %v9126_v21 = vpop.f32.mrf.mxu0  ;;  %9418 = vmatprep.subr.bf16.mxu0 %v10605_v20 }
 0x5e1   : > { %9400 = vmatprep.subr.bf16.mxu1 %v10604_v33 }
 0x5e3   : > { %9419 = vmatpush3.bf16.msra.mxu0 %v10607_v39 }
 0x5e4   : > { %9401 = vmatpush3.bf16.msra.mxu1 %v10606_v18  ;;  %9420 = vmatprep.subr.bf16.mxu0 %v10609_v41 }
 0x5e5   : > { %9402 = vmatprep.subr.bf16.mxu1 %v10608_v40 }
 0x5e7   : > { %9421 = vmatpush3.bf16.msra.mxu0 %v10611_v0 }
 0x5e8   : > { %9403 = vmatpush3.bf16.msra.mxu1 %v10610_v46  ;;  %9422 = vmatprep.subr.bf16.mxu0 %v10613_v51 }
 0x5e9   : > { %9404 = vmatprep.subr.bf16.mxu1 %v10612_v50 }
 0x5eb   : > { %9423 = vmatpush3.bf16.msra.mxu0 %v10615_v2 }
 0x5ec   : > { %9405 = vmatpush3.bf16.msra.mxu1 %v10614_v7  ;;  %9424 = vmatprep.subr.bf16.mxu0 %v10617_v60 }
 0x5ed   : > { %9406 = vmatprep.subr.bf16.mxu1 %v10616_v61 }
 0x5ef   : > { %9425 = vmatpush3.bf16.msra.mxu0 %v10619_v4 }
 0x5f0   : > { %9407 = vmatpush3.bf16.msra.mxu1 %v10618_v14  ;;  %9426 = vmatprep.subr.bf16.mxu0 %v10620_v6 }
 0x5f1   : > { %9469 = vmatprep.subr.bf16.mxu1 %v10856_v42 }
 0x5f3   : > { %v9144_v1 = vpop.f32.mrf.mxu1  ;;  %7985 = vmatmul.mubr.bf16.vlgmr.msra.gmra.mxu1 %v11992_v19  ;;  %9427 = vmatpush3.bf16.msra.mxu0 %v10621_v11 }
 0x5f4   : > { %9470 = vmatpush3.bf16.msra.mxu1 %v6693_v35  ;;  %9428 = vmatprep.subr.bf16.mxu0 %v10623_v3 }
 0x5f5   : > { %v9145_v9 = vpop.f32.mrf.mxu1  ;;  %9471 = vmatprep.subr.bf16.mxu1 %v10856_v42  ;;  %9473 = vmatprep.mubr.msk.bf16.mxu1 %vm10857_vm14, %v10856_v42 }
 0x5f6   : > { %v9146_v58 = vadd.f32 %v9145_v9, %v9144_v1 }
 0x5f7   : > { %v9147_v28 = vpop.f32.mrf.mxu1  ;;  %9429 = vmatpush3.bf16.msra.mxu0 %v10624_v13 }
 0x5f8   : > { %v7507_v55 = vadd.f32 %v9146_v58, %v7467_v57  ;;  %9472 = vmatpush3.bf16.msra.mxu1 %v10625_v17 }
 0x5f9   : > { %v9148_v37 = vpop.f32.mrf.mxu1 }
 0x5fa   : > { %v9166_v47 = vpop.f32.mrf.mxu0  ;;  %8025 = vmatmul.mubr.bf16.vlgmr.msra.gmra.mxu0 %v11996_v23 }
 0x5fb   : > { %9474 = vmatmul.mubr.msk.bf16.vlgmr.msra.gmra.mxu1 %vm6681_vm13, %v12014_v29 }
 0x5fc   : > { %v9167_v19 = vpop.f32.mrf.mxu0 }
 0x5fd   : > { %v9168_v15 = vadd.f32 %v9167_v19, %v9166_v47 }
 0x5fe   : > { %v9169_v5 = vpop.f32.mrf.mxu0 }
 0x5ff   : > { %v7547_v24 = vadd.f32 %v9168_v15, %v7507_v55 }
 0x600   : > { %v9170_v43 = vpop.f32.mrf.mxu0 }
 0x613   : > { %v9188_v22 = vpop.f32.mrf.mxu1 }
 0x615   : > { %v9189_v10 = vpop.f32.mrf.mxu1 }
 0x616   : > { %v9190_v31 = vadd.f32 %v9189_v10, %v9188_v22 }
 0x617   : > { %v9191_v26 = vpop.f32.mrf.mxu1 }
 0x618   : > { %v7587_v63 = vadd.f32 %v9190_v31, %v7547_v24 }
 0x619   : > { %v9192_v53 = vpop.f32.mrf.mxu1 }
 0x61a   : > { %v9210_v34 = vpop.f32.mrf.mxu0 }
 0x61c   : > { %v9211_v12 = vpop.f32.mrf.mxu0 }
 0x61d   : > { %v9212_v48 = vadd.f32 %v9211_v12, %v9210_v34 }
 0x61e   : > { %v9213_v44 = vpop.f32.mrf.mxu0 }
 0x61f   : > { %v7627_v27 = vadd.f32 %v9212_v48, %v7587_v63 }
 0x620   : > { %v9214_v23 = vpop.f32.mrf.mxu0 }
 0x633   : > { %v9232_v62 = vpop.f32.mrf.mxu1 }
 0x635   : > { %v9233_v8 = vpop.f32.mrf.mxu1 }
 0x636   : > { %v9234_v29 = vadd.f32 %v9233_v8, %v9232_v62 }
 0x637   : > { %v9235_v38 = vpop.f32.mrf.mxu1 }
 0x638   : > { %v7667_v45 = vadd.f32 %v9234_v29, %v7627_v27 }
 0x639   : > { %v9236_v30 = vpop.f32.mrf.mxu1 }
 0x63a   : > { %v9254_v25 = vpop.f32.mrf.mxu0  ;;  %v8082_v30 = vrot.slane %v8075_v59, %v11304_v54 }
 0x63c   : > { %v9255_v32 = vpop.f32.mrf.mxu0 }
 0x63d   : > { %v9256_v33 = vadd.f32 %v9255_v32, %v9254_v25 }
 0x63e   : > { %v9257_v20 = vpop.f32.mrf.mxu0 }
 0x63f   : > { %v7707_v49 = vadd.f32 %v9256_v33, %v7667_v45 }
 0x640   : > { %v9258_v36 = vpop.f32.mrf.mxu0 }
 0x653   : > { %v9276_v57 = vpop.f32.mrf.mxu1 }
 0x655   : > { %v9277_v18 = vpop.f32.mrf.mxu1 }
 0x656   : > { %v9278_v39 = vadd.f32 %v9277_v18, %v9276_v57 }
 0x657   : > { %v9279_v21 = vpop.f32.mrf.mxu1 }
 0x658   : > { %v7747_v40 = vadd.f32 %v9278_v39, %v7707_v49 }
 0x659   : > { %v9280_v41 = vpop.f32.mrf.mxu1 }
 0x65a   : > { %v9298_v46 = vpop.f32.mrf.mxu0 }
 0x65c   : > { %v9299_v0 = vpop.f32.mrf.mxu0 }
 0x65d   : > { %v9300_v50 = vadd.f32 %v9299_v0, %v9298_v46 }
 0x65e   : > { %v9301_v51 = vpop.f32.mrf.mxu0 }
 0x65f   : > { %v7787_v7 = vadd.f32 %v9300_v50, %v7747_v40 }
 0x660   : > { %v9302_v2 = vpop.f32.mrf.mxu0 }
 0x673   : > { %v9320_v61 = vpop.f32.mrf.mxu1 }
 0x675   : > { %v9321_v60 = vpop.f32.mrf.mxu1 }
 0x676   : > { %v9322_v14 = vadd.f32 %v9321_v60, %v9320_v61 }
 0x677   : > { %v9323_v4 = vpop.f32.mrf.mxu1 }
 0x678   : > { %v7827_v6 = vadd.f32 %v9322_v14, %v7787_v7 }
 0x679   : > { %v9324_v52 = vpop.f32.mrf.mxu1 }
 0x67a   : > { %v9342_v11 = vpop.f32.mrf.mxu0 }
 0x67c   : > { %v9343_v42 = vpop.f32.mrf.mxu0 }
 0x67d   : > { %v9344_v19 = vadd.f32 %v9343_v42, %v9342_v11 }
 0x67e   : > { %v9345_v35 = vpop.f32.mrf.mxu0 }
 0x67f   : > { %v7867_v43 = vadd.f32 %v9344_v19, %v7827_v6 }
 0x680   : > { %v9346_v3 = vpop.f32.mrf.mxu0 }
 0x693   : > { %v9364_v1 = vpop.f32.mrf.mxu1 }
 0x695   : > { %v9365_v13 = vpop.f32.mrf.mxu1 }
 0x696   : > { %v9366_v5 = vadd.f32 %v9365_v13, %v9364_v1 }
 0x697   : > { %v9367_v17 = vpop.f32.mrf.mxu1 }
 0x698   : > { %v7907_v31 = vadd.f32 %v9366_v5, %v7867_v43 }
 0x699   : > { %v9368_v9 = vpop.f32.mrf.mxu1 }
 0x69a   : > { %v9386_v58 = vpop.f32.mrf.mxu0 }
 0x69c   : > { %v9387_v28 = vpop.f32.mrf.mxu0 }
 0x69d   : > { %v9388_v22 = vadd.f32 %v9387_v28, %v9386_v58 }
 0x69e   : > { %v9389_v55 = vpop.f32.mrf.mxu0 }
 0x69f   : > { %v7947_v34 = vadd.f32 %v9388_v22, %v7907_v31 }
 0x6a0   : > { %v9390_v37 = vpop.f32.mrf.mxu0 }
 0x6b3   : > { %v9408_v47 = vpop.f32.mrf.mxu1 }
 0x6b5   : > { %v9409_v15 = vpop.f32.mrf.mxu1 }
 0x6b6   : > { %v9410_v26 = vadd.f32 %v9409_v15, %v9408_v47 }
 0x6b7   : > { %v9411_v24 = vpop.f32.mrf.mxu1 }
 0x6b8   : > { %v7987_v44 = vadd.f32 %v9410_v26, %v7947_v34 }
 0x6b9   : > { %v9412_v10 = vpop.f32.mrf.mxu1 }
 0x6ba   : > { %v9430_v63 = vpop.f32.mrf.mxu0 }
 0x6bb   : > { %v8066_v53 = vpop.f32.mrf.mxu1 }
 0x6bc   : > { %v9431_v12 = vpop.f32.mrf.mxu0 }
 0x6bd   : > { %v9475_v48 = vpop.f32.mrf.mxu1  ;;  %v9432_v27 = vadd.f32 %v9431_v12, %v9430_v63 }
 0x6be   : > { %v9433_v23 = vpop.f32.mrf.mxu0 }
 0x6bf   : > { %v8069_v62 = vpop.f32.mrf.mxu1  ;;  %v8027_v8 = vadd.f32 %v9432_v27, %v7987_v44 }
 0x6c0   : > { %v9434_v29 = vpop.f32.mrf.mxu0 }
 0x6c1   : > { %v9476_v38 = vpop.f32.mrf.mxu1  ;;  %v8067_v45 = vadd.f32 %v8066_v53, %v8027_v8 }
 0x6c3   : > { %v8089_v25 = vrot.slane %v8067_v45, %v11304_v54 }
 0x6c5   : > { %v8090_v32 = vcombine.low %v8082_v30, %v8089_v25 }
 0x6c7   : > { %8092 = vst [vmem:[%s11091_s1] sm:$0x3f] %v8090_v32 }
 0x6c8 PF: > { %p19_p9 = scmp.ge.s32.totalorder %s10971_s29, 5   ;;  %s12381_s30 = smov %s10825_s10 }
 0x6c9   : > { %s12382_s10 = smov %s10829_s11  ;;  %s12383_s11 = smov %s10982_s19 }
 0x6ca   : > { %s12384_s12 = smov %s10971_s29  ;;  %21 = sbr.rel (!%p19_p9) target bundleno = 7 (0x7), region = 126 }
 0x6cf   :  { %8115 = vsyncpa [#allocation4], 1 }
 0x6d0   :  { %8117 = vsyncpa [#allocation4 + $0x1], 1 }
 0x6d1   :  { %8118 = vsyncpa [#allocation6], 1 }
 0x6d2   :  { %8119 = vsyncpa [#allocation9], 1 }

</bundles_post_ra>
